<compile_context>
chip_gen: v5e
topology: v5e:2x2
jax: 0.10.0
libtpu: 0.0.40
codegen_flags: <defaults>
</compile_context>

<pallas_src>
import jax
import jax.numpy as jnp
from jax import lax
from jax.experimental import pallas as pl
from jax.experimental.pallas import tpu as pltpu

_EPS = 1e-5  # InstanceNorm1d default eps, affine=False, biased variance


def _rownorm(x):
    # InstanceNorm1d(C) on unbatched (C, L): per-row mean / biased variance over L. f32 math.
    mean = jnp.mean(x, axis=-1, keepdims=True)
    centered = x - mean
    var = jnp.mean(centered * centered, axis=-1, keepdims=True)
    return centered * lax.rsqrt(var + _EPS)


def artemis_kernel(text_ref, vitals_ref,
                   w1_ref, b1_ref,
                   w4_ref, b4_ref,
                   wt_ref, wv_ref, bf_ref,
                   out_ref):
    # td1: bf16 x bf16 MXU dot, f32 accumulate; then InstanceNorm1d in f32.
    t1 = jnp.dot(text_ref[...].astype(jnp.bfloat16), w1_ref[...],
                 preferred_element_type=jnp.float32) + b1_ref[...]
    t1 = _rownorm(t1)
    # td4 + InstanceNorm1d
    t1 = jnp.dot(t1.astype(jnp.bfloat16), w4_ref[...],
                 preferred_element_type=jnp.float32) + b4_ref[...]
    t1 = _rownorm(t1)
    # hidden1 + hidden2 folded into a single affine map (weights pre-folded in wrapper):
    #   cat([t1, v], -1) @ Wh1.T @ Wh2.T + (bh1 @ Wh2.T + bh2)
    o = (jnp.dot(t1, wt_ref[...], preferred_element_type=jnp.float32)
         + jnp.dot(vitals_ref[...], wv_ref[...], preferred_element_type=jnp.float32)
         + bf_ref[...])
    # softmax over last dim (nn.Softmax() on a 2D tensor -> dim=1)
    m = jnp.max(o, axis=-1, keepdims=True)
    e = jnp.exp(o - m)
    out_ref[...] = e / jnp.sum(e, axis=-1, keepdims=True)


def make_params(key):
    """Deterministic PyTorch-style init: U(-1/sqrt(fan_in), 1/sqrt(fan_in))."""
    def linear(k, out_f, in_f):
        kw, kb = jax.random.split(k)
        bound = 1.0 / (in_f ** 0.5)
        w = jax.random.uniform(kw, (out_f, in_f), jnp.float32, -bound, bound)
        b = jax.random.uniform(kb, (out_f,), jnp.float32, -bound, bound)
        return w, b

    k1, k4, kh1, kh2 = jax.random.split(key, 4)
    return {
        "td1": linear(k1, 524, 1536),
        "td4": linear(k4, 250, 524),
        "hidden1": linear(kh1, 8, 255),
        "hidden2": linear(kh2, 5, 8),
    }


def prepare_params(params):
    """One-time (amortized) parameter transform for the kernel:
    - pre-transpose weights to [in, out],
    - cast the two large weights to bf16 (halves the HBM weight traffic),
    - split hidden1's weight at the concat boundary and fold hidden1+hidden2,
    - lift biases to [1, out]."""
    w1, b1 = params["td1"]
    w4, b4 = params["td4"]
    wh1, bh1 = params["hidden1"]
    wh2, bh2 = params["hidden2"]

    wh1t = wh1[:, :250].T          # (250, 8)  -- acts on t1
    wh1v = wh1[:, 250:].T          # (5, 8)    -- acts on vitals_x
    wh2t = wh2.T                   # (8, 5)

    return {
        "w1t": w1.T.astype(jnp.bfloat16),                    # (1536, 524) bf16
        "b1": b1[None, :].astype(jnp.float32),               # (1, 524)
        "w4t": w4.T.astype(jnp.bfloat16),                    # (524, 250) bf16
        "b4": b4[None, :].astype(jnp.float32),               # (1, 250)
        "wt_fold": (wh1t @ wh2t).astype(jnp.float32),        # (250, 5)
        "wv_fold": (wh1v @ wh2t).astype(jnp.float32),        # (5, 5)
        "b_fold": (bh1 @ wh2t + bh2)[None, :].astype(jnp.float32),  # (1, 5)
    }


def artemis_forward(text_x, vitals_x, pp):
    vmem = pl.BlockSpec(memory_space=pltpu.MemorySpace.VMEM)
    out = pl.pallas_call(
        artemis_kernel,
        out_shape=jax.ShapeDtypeStruct((text_x.shape[0], 5), jnp.float32),
        in_specs=[vmem] * 9,
        out_specs=vmem,
    )(text_x, vitals_x,
      pp["w1t"], pp["b1"],
      pp["w4t"], pp["b4"],
      pp["wt_fold"], pp["wv_fold"], pp["b_fold"])
    return out


def artemis_ref(text_x, vitals_x, params):
    """Pure-JAX f32 reference of the PyTorch forward (exact semantics)."""
    w1, b1 = params["td1"]
    w4, b4 = params["td4"]
    wh1, bh1 = params["hidden1"]
    wh2, bh2 = params["hidden2"]

    def inorm(x):
        mean = jnp.mean(x, axis=-1, keepdims=True)
        var = jnp.mean((x - mean) ** 2, axis=-1, keepdims=True)
        return (x - mean) / jnp.sqrt(var + _EPS)

    t1 = text_x @ w1.T + b1
    t1 = inorm(t1)
    t1 = t1 @ w4.T + b4
    t1 = inorm(t1)
    model_in = jnp.concatenate([t1, vitals_x], axis=1)
    out = model_in @ wh1.T + bh1
    out = out @ wh2.T + bh2
    return jax.nn.softmax(out, axis=1)


def artemis_ref_prepared(text_x, vitals_x, pp):
    """Pure-JAX reference that mirrors the kernel's numerics (bf16 weights, folded tail)."""
    t1 = jnp.dot(text_x.astype(jnp.bfloat16), pp["w1t"],
                 preferred_element_type=jnp.float32) + pp["b1"]
    t1 = _rownorm(t1)
    t1 = jnp.dot(t1.astype(jnp.bfloat16), pp["w4t"],
                 preferred_element_type=jnp.float32) + pp["b4"]
    t1 = _rownorm(t1)
    o = t1 @ pp["wt_fold"] + vitals_x @ pp["wv_fold"] + pp["b_fold"]
    return jax.nn.softmax(o, axis=1)


if __name__ == "__main__":
    key = jax.random.PRNGKey(0)
    kp, kt, kv = jax.random.split(key, 3)

    params = make_params(kp)
    prepped = prepare_params(params)   # one-time prep; amortized across repeated calls
    prepped = jax.tree_util.tree_map(jax.block_until_ready, prepped)

    text_x = jax.random.normal(kt, (2, 1536), jnp.float32)   # (C=2, L=1536)
    vitals_x = jax.random.normal(kv, (2, 5), jnp.float32)

    forward = jax.jit(artemis_forward)
    out = jax.block_until_ready(forward(text_x, vitals_x, prepped))

    ref_same = artemis_ref_prepared(text_x, vitals_x, prepped)   # matches kernel numerics
    ref_exact = artemis_ref(text_x, vitals_x, params)            # exact f32 PyTorch semantics

    assert out.shape == (2, 5)
    assert jnp.allclose(out, ref_same, atol=2e-3, rtol=2e-3), (out, ref_same)
    assert jnp.allclose(out, ref_exact, atol=2e-2, rtol=2e-2), (out, ref_exact)
    print("KERNEL_OK")
</pallas_src>

<mosaic_0001>
module attributes {stable_mosaic.version = 11 : i64} {
  func.func @artemis_kernel(%arg0: memref<2x1536xf32, #tpu.memory_space<vmem>>, %arg1: memref<2x5xf32, #tpu.memory_space<vmem>>, %arg2: memref<1536x524xbf16, #tpu.memory_space<vmem>>, %arg3: memref<1x524xf32, #tpu.memory_space<vmem>>, %arg4: memref<524x250xbf16, #tpu.memory_space<vmem>>, %arg5: memref<1x250xf32, #tpu.memory_space<vmem>>, %arg6: memref<250x5xf32, #tpu.memory_space<vmem>>, %arg7: memref<5x5xf32, #tpu.memory_space<vmem>>, %arg8: memref<1x5xf32, #tpu.memory_space<vmem>>, %arg9: memref<2x5xf32, #tpu.memory_space<vmem>>) attributes {dimension_semantics = [], scalar_prefetch = 0 : i64, scratch_operands = 0 : i64, tpu.core_type = #tpu.core_type<tc>} {
    %c0 = arith.constant 0 : index
    %c0_0 = arith.constant 0 : index
    %0 = vector.load %arg0[%c0, %c0_0] : memref<2x1536xf32, #tpu.memory_space<vmem>>, vector<2x1536xf32>
    %1 = arith.truncf %0 : vector<2x1536xf32> to vector<2x1536xbf16>
    %c0_1 = arith.constant 0 : index
    %c0_2 = arith.constant 0 : index
    %2 = vector.load %arg2[%c0_1, %c0_2] : memref<1536x524xbf16, #tpu.memory_space<vmem>>, vector<1536x524xbf16>
    %cst = arith.constant dense<0.000000e+00> : vector<2x524xf32>
    %3 = tpu.matmul %1, %2, %cst {dimension_numbers = #tpu.dot_dimension_numbers<[1], [0], [0], [1], [0, 0, 1, 1], [], []>} : vector<2x1536xbf16>, vector<1536x524xbf16>, vector<2x524xf32> -> vector<2x524xf32>
    %c0_3 = arith.constant 0 : index
    %c0_4 = arith.constant 0 : index
    %4 = vector.load %arg3[%c0_3, %c0_4] : memref<1x524xf32, #tpu.memory_space<vmem>>, vector<1x524xf32>
    %5 = vector.broadcast %4 : vector<1x524xf32> to vector<2x524xf32>
    %6 = arith.addf %3, %5 : vector<2x524xf32>
    %cst_5 = arith.constant dense<0.000000e+00> : vector<2xf32>
    %7 = vector.multi_reduction <add>, %6, %cst_5 [1] : vector<2x524xf32> to vector<2xf32>
    %8 = vector.shape_cast %7 : vector<2xf32> to vector<2x1xf32>
    %cst_6 = arith.constant 5.240000e+02 : f32
    %9 = vector.broadcast %cst_6 : f32 to vector<2x1xf32>
    %10 = arith.divf %8, %9 : vector<2x1xf32>
    %11 = vector.broadcast %10 : vector<2x1xf32> to vector<2x524xf32>
    %12 = arith.subf %6, %11 : vector<2x524xf32>
    %13 = arith.mulf %12, %12 : vector<2x524xf32>
    %cst_7 = arith.constant dense<0.000000e+00> : vector<2xf32>
    %14 = vector.multi_reduction <add>, %13, %cst_7 [1] : vector<2x524xf32> to vector<2xf32>
    %15 = vector.shape_cast %14 : vector<2xf32> to vector<2x1xf32>
    %cst_8 = arith.constant 5.240000e+02 : f32
    %16 = vector.broadcast %cst_8 : f32 to vector<2x1xf32>
    %17 = arith.divf %15, %16 : vector<2x1xf32>
    %cst_9 = arith.constant 9.99999974E-6 : f32
    %18 = vector.broadcast %cst_9 : f32 to vector<2x1xf32>
    %19 = arith.addf %17, %18 : vector<2x1xf32>
    %20 = math.rsqrt %19 : vector<2x1xf32>
    %21 = vector.broadcast %20 : vector<2x1xf32> to vector<2x524xf32>
    %22 = arith.mulf %12, %21 : vector<2x524xf32>
    %23 = arith.truncf %22 : vector<2x524xf32> to vector<2x524xbf16>
    %c0_10 = arith.constant 0 : index
    %c0_11 = arith.constant 0 : index
    %24 = vector.load %arg4[%c0_10, %c0_11] : memref<524x250xbf16, #tpu.memory_space<vmem>>, vector<524x250xbf16>
    %cst_12 = arith.constant dense<0.000000e+00> : vector<2x250xf32>
    %25 = tpu.matmul %23, %24, %cst_12 {dimension_numbers = #tpu.dot_dimension_numbers<[1], [0], [0], [1], [0, 0, 1, 1], [], []>} : vector<2x524xbf16>, vector<524x250xbf16>, vector<2x250xf32> -> vector<2x250xf32>
    %c0_13 = arith.constant 0 : index
    %c0_14 = arith.constant 0 : index
    %26 = vector.load %arg5[%c0_13, %c0_14] : memref<1x250xf32, #tpu.memory_space<vmem>>, vector<1x250xf32>
    %27 = vector.broadcast %26 : vector<1x250xf32> to vector<2x250xf32>
    %28 = arith.addf %25, %27 : vector<2x250xf32>
    %cst_15 = arith.constant dense<0.000000e+00> : vector<2xf32>
    %29 = vector.multi_reduction <add>, %28, %cst_15 [1] : vector<2x250xf32> to vector<2xf32>
    %30 = vector.shape_cast %29 : vector<2xf32> to vector<2x1xf32>
    %cst_16 = arith.constant 2.500000e+02 : f32
    %31 = vector.broadcast %cst_16 : f32 to vector<2x1xf32>
    %32 = arith.divf %30, %31 : vector<2x1xf32>
    %33 = vector.broadcast %32 : vector<2x1xf32> to vector<2x250xf32>
    %34 = arith.subf %28, %33 : vector<2x250xf32>
    %35 = arith.mulf %34, %34 : vector<2x250xf32>
    %cst_17 = arith.constant dense<0.000000e+00> : vector<2xf32>
    %36 = vector.multi_reduction <add>, %35, %cst_17 [1] : vector<2x250xf32> to vector<2xf32>
    %37 = vector.shape_cast %36 : vector<2xf32> to vector<2x1xf32>
    %cst_18 = arith.constant 2.500000e+02 : f32
    %38 = vector.broadcast %cst_18 : f32 to vector<2x1xf32>
    %39 = arith.divf %37, %38 : vector<2x1xf32>
    %cst_19 = arith.constant 9.99999974E-6 : f32
    %40 = vector.broadcast %cst_19 : f32 to vector<2x1xf32>
    %41 = arith.addf %39, %40 : vector<2x1xf32>
    %42 = math.rsqrt %41 : vector<2x1xf32>
    %43 = vector.broadcast %42 : vector<2x1xf32> to vector<2x250xf32>
    %44 = arith.mulf %34, %43 : vector<2x250xf32>
    %c0_20 = arith.constant 0 : index
    %c0_21 = arith.constant 0 : index
    %45 = vector.load %arg6[%c0_20, %c0_21] : memref<250x5xf32, #tpu.memory_space<vmem>>, vector<250x5xf32>
    %cst_22 = arith.constant dense<0.000000e+00> : vector<2x5xf32>
    %46 = tpu.matmul %44, %45, %cst_22 {dimension_numbers = #tpu.dot_dimension_numbers<[1], [0], [0], [1], [0, 0, 1, 1], [], []>} : vector<2x250xf32>, vector<250x5xf32>, vector<2x5xf32> -> vector<2x5xf32>
    %c0_23 = arith.constant 0 : index
    %c0_24 = arith.constant 0 : index
    %47 = vector.load %arg1[%c0_23, %c0_24] : memref<2x5xf32, #tpu.memory_space<vmem>>, vector<2x5xf32>
    %c0_25 = arith.constant 0 : index
    %c0_26 = arith.constant 0 : index
    %48 = vector.load %arg7[%c0_25, %c0_26] : memref<5x5xf32, #tpu.memory_space<vmem>>, vector<5x5xf32>
    %cst_27 = arith.constant dense<0.000000e+00> : vector<2x5xf32>
    %49 = tpu.matmul %47, %48, %cst_27 {dimension_numbers = #tpu.dot_dimension_numbers<[1], [0], [0], [1], [0, 0, 1, 1], [], []>} : vector<2x5xf32>, vector<5x5xf32>, vector<2x5xf32> -> vector<2x5xf32>
    %50 = arith.addf %46, %49 : vector<2x5xf32>
    %c0_28 = arith.constant 0 : index
    %c0_29 = arith.constant 0 : index
    %51 = vector.load %arg8[%c0_28, %c0_29] : memref<1x5xf32, #tpu.memory_space<vmem>>, vector<1x5xf32>
    %52 = vector.broadcast %51 : vector<1x5xf32> to vector<2x5xf32>
    %53 = arith.addf %50, %52 : vector<2x5xf32>
    %cst_30 = arith.constant dense<0xFF800000> : vector<2xf32>
    %54 = vector.multi_reduction <maximumf>, %53, %cst_30 [1] : vector<2x5xf32> to vector<2xf32>
    %55 = vector.shape_cast %54 : vector<2xf32> to vector<2x1xf32>
    %56 = vector.broadcast %55 : vector<2x1xf32> to vector<2x5xf32>
    %57 = arith.subf %53, %56 : vector<2x5xf32>
    %58 = math.exp %57 : vector<2x5xf32>
    %cst_31 = arith.constant dense<0.000000e+00> : vector<2xf32>
    %59 = vector.multi_reduction <add>, %58, %cst_31 [1] : vector<2x5xf32> to vector<2xf32>
    %60 = vector.shape_cast %59 : vector<2xf32> to vector<2x1xf32>
    %61 = vector.broadcast %60 : vector<2x1xf32> to vector<2x5xf32>
    %62 = arith.divf %58, %61 : vector<2x5xf32>
    %c0_32 = arith.constant 0 : index
    %c0_33 = arith.constant 0 : index
    %63 = vector.load %arg9[%c0_32, %c0_33] : memref<2x5xf32, #tpu.memory_space<vmem>>, vector<2x5xf32>
    tpu.vector_store %arg9[%c0_32, %c0_33], %62 {strides = array<i32>} : memref<2x5xf32, #tpu.memory_space<vmem>>, vector<2x5xf32>,
    return
  }
}

</mosaic_0001>

<bundles_post_ra>
// kernel: artemis_forward.1
= control target key start
LH: loop header
LB: loop body
LE: loop exit
PB: predicated region body
PF: predicated region fallthrough
CT: control target
= control target key end

     0   :  { %s11187_s0 = inlined_call_operand.vmem [shape: f32[2,1536], index: 0, kind: input, shape index: {}]   ;;  %s11188_s1 = inlined_call_operand.vmem [shape: f32[2,5], index: 1, kind: input, shape index: {}]   ;;  %s11189_s2 = inlined_call_operand.vmem [shape: bf16[1536,524], index: 2, kind: input, shape index: {}]   ;;  %s11190_s3 = inlined_call_operand.vmem [shape: f32[1,524], index: 3, kind: input, shape index: {}]   ;;  %s11191_s4 = inlined_call_operand.vmem [shape: bf16[524,250], index: 4, kind: input, shape index: {}]   ;;  %s11192_s5 = inlined_call_operand.vmem [shape: f32[1,250], index: 5, kind: input, shape index: {}]   ;;  %s11193_s6 = inlined_call_operand.vmem [shape: f32[250,5], index: 6, kind: input, shape index: {}]   ;;  %s11194_s7 = inlined_call_operand.vmem [shape: f32[5,5], index: 7, kind: input, shape index: {}]   ;;  %s11195_s8 = inlined_call_operand.vmem [shape: f32[1,5], index: 8, kind: input, shape index: {}]   ;;  %s11196_s9 = inlined_call_operand.hbm [shape: f32[2,5], index: 9, kind: output, shape index: {}]  }
   0x1   :  { %v4884_v0 = vld [vmem:[%s11189_s2 + $0x118] sm:$0xf]  ;;  %v6969_v1 = vld [vmem:[%s11189_s2 + $0x128] sm:$0xf0]  ;;  %v4864_v11 = vld [vmem:[%s11189_s2 + $0xf0] sm:$0xf] }
   0x2   :  { %v5044_v2 = vld [vmem:[%s11189_s2 + $0x258] sm:$0xf]  ;;  %v4885_v3 = vor.u32 %v6969_v1, %v4884_v0  ;;  %v7009_v4 = vld [vmem:[%s11189_s2 + $0x268] sm:$0xf0]  ;;  %v6964_v13 = vld [vmem:[%s11189_s2 + $0x100] sm:$0xf0] }
   0x3   :  { %v5204_v5 = vld [vmem:[%s11189_s2 + $0x398] sm:$0xf]  ;;  %v7049_v6 = vld [vmem:[%s11189_s2 + $0x3a8] sm:$0xf0]  ;;  %v5045_v7 = vor.u32 %v7009_v4, %v5044_v2  ;;  %v5024_v14 = vld [vmem:[%s11189_s2 + $0x230] sm:$0xf]  ;;  %v4865_v16 = vor.u32 %v6964_v13, %v4864_v11 }
   0x4   :  { %v5205_v8 = vor.u32 %v7049_v6, %v5204_v5  ;;  %v5364_v9 = vld [vmem:[%s11189_s2 + $0x4d8] sm:$0xf]  ;;  %v7089_v10 = vld [vmem:[%s11189_s2 + $0x4e8] sm:$0xf0]  ;;  %3164 = vmatpush.bf16.msra.mxu0 %v4885_v3  ;;  %v7004_v15 = vld [vmem:[%s11189_s2 + $0x240] sm:$0xf0] }
   0x5   :  { %v5365_v12 = vor.u32 %v7089_v10, %v5364_v9  ;;  %3177 = vmatpush.bf16.msra.mxu1 %v5045_v7  ;;  %v5025_v17 = vor.u32 %v7004_v15, %v5024_v14  ;;  %v5184_v18 = vld [vmem:[%s11189_s2 + $0x370] sm:$0xf]  ;;  %v7044_v19 = vld [vmem:[%s11189_s2 + $0x380] sm:$0xf0]  ;;  %v4844_v23 = vld [vmem:[%s11189_s2 + $0xc8] sm:$0xf] }
   0x6   :  { %3190 = vmatpush.bf16.msra.mxu2 %v5205_v8  ;;  %v5344_v20 = vld [vmem:[%s11189_s2 + $0x4b0] sm:$0xf]  ;;  %v5185_v21 = vor.u32 %v7044_v19, %v5184_v18  ;;  %v7084_v22 = vld [vmem:[%s11189_s2 + $0x4c0] sm:$0xf0]  ;;  %v6959_v24 = vld [vmem:[%s11189_s2 + $0xd8] sm:$0xf0] }
   0x7   :  { %3203 = vmatpush.bf16.msra.mxu3 %v5365_v12  ;;  %v5345_v25 = vor.u32 %v7084_v22, %v5344_v20  ;;  %v5004_v26 = vld [vmem:[%s11189_s2 + $0x208] sm:$0xf]  ;;  %v6999_v27 = vld [vmem:[%s11189_s2 + $0x218] sm:$0xf0]  ;;  %v4845_v29 = vor.u32 %v6959_v24, %v4844_v23  ;;  %v4824_v35 = vld [vmem:[%s11189_s2 + $0xa0] sm:$0xf] }
   0x8   :  { %v5164_v28 = vld [vmem:[%s11189_s2 + $0x348] sm:$0xf]  ;;  %3165 = vmatpush.bf16.msra.mxu0 %v4865_v16  ;;  %v7039_v30 = vld [vmem:[%s11189_s2 + $0x358] sm:$0xf0]  ;;  %v5005_v33 = vor.u32 %v6999_v27, %v5004_v26  ;;  %v6954_v36 = vld [vmem:[%s11189_s2 + $0xb0] sm:$0xf0] }
   0x9   :  { %v5324_v31 = vld [vmem:[%s11189_s2 + $0x488] sm:$0xf]  ;;  %v7079_v32 = vld [vmem:[%s11189_s2 + $0x498] sm:$0xf0]  ;;  %3178 = vmatpush.bf16.msra.mxu1 %v5025_v17  ;;  %v5165_v34 = vor.u32 %v7039_v30, %v5164_v28  ;;  %v4984_v37 = vld [vmem:[%s11189_s2 + $0x1e0] sm:$0xf]  ;;  %v4825_v44 = vor.u32 %v6954_v36, %v4824_v35 }
   0xa   :  { %3191 = vmatpush.bf16.msra.mxu2 %v5185_v21  ;;  %v5325_v38 = vor.u32 %v7079_v32, %v5324_v31  ;;  %v6994_v39 = vld [vmem:[%s11189_s2 + $0x1f0] sm:$0xf0]  ;;  %v5144_v40 = vld [vmem:[%s11189_s2 + $0x320] sm:$0xf]  ;;  %v4804_v47 = vld [vmem:[%s11189_s2 + $0x78] sm:$0xf] }
   0xb   :  { %3204 = vmatpush.bf16.msra.mxu3 %v5345_v25  ;;  %v7034_v41 = vld [vmem:[%s11189_s2 + $0x330] sm:$0xf0]  ;;  %v5304_v42 = vld [vmem:[%s11189_s2 + $0x460] sm:$0xf]  ;;  %v4985_v45 = vor.u32 %v6994_v39, %v4984_v37  ;;  %v6949_v48 = vld [vmem:[%s11189_s2 + $0x88] sm:$0xf0] }
   0xc   :  { %v7074_v43 = vld [vmem:[%s11189_s2 + $0x470] sm:$0xf0]  ;;  %3166 = vmatpush.bf16.msra.mxu0 %v4845_v29  ;;  %v5145_v46 = vor.u32 %v7034_v41, %v5144_v40  ;;  %v4964_v49 = vld [vmem:[%s11189_s2 + $0x1b8] sm:$0xf]  ;;  %v6989_v51 = vld [vmem:[%s11189_s2 + $0x1c8] sm:$0xf0]  ;;  %v4805_v56 = vor.u32 %v6949_v48, %v4804_v47 }
   0xd   :  { %3179 = vmatpush.bf16.msra.mxu1 %v5005_v33  ;;  %v5305_v50 = vor.u32 %v7074_v43, %v5304_v42  ;;  %v5124_v52 = vld [vmem:[%s11189_s2 + $0x2f8] sm:$0xf]  ;;  %v7029_v53 = vld [vmem:[%s11189_s2 + $0x308] sm:$0xf0]  ;;  %v4965_v57 = vor.u32 %v6989_v51, %v4964_v49  ;;  %v4784_v59 = vld [vmem:[%s11189_s2 + $0x50] sm:$0xf] }
   0xe   :  { %3192 = vmatpush.bf16.msra.mxu2 %v5165_v34  ;;  %v5284_v54 = vld [vmem:[%s11189_s2 + $0x438] sm:$0xf]  ;;  %v7069_v55 = vld [vmem:[%s11189_s2 + $0x448] sm:$0xf0]  ;;  %v5125_v58 = vor.u32 %v7029_v53, %v5124_v52  ;;  %v6944_v60 = vld [vmem:[%s11189_s2 + $0x60] sm:$0xf0] }
   0xf   :  { %3205 = vmatpush.bf16.msra.mxu3 %v5325_v38  ;;  %v4944_v61 = vld [vmem:[%s11189_s2 + $0x190] sm:$0xf]  ;;  %v5285_v62 = vor.u32 %v7069_v55, %v5284_v54  ;;  %v6984_v63 = vld [vmem:[%s11189_s2 + $0x1a0] sm:$0xf0]  ;;  %v4785_v4 = vor.u32 %v6944_v60, %v4784_v59  ;;  %v4764_v7 = vld [vmem:[%s11189_s2 + $0x28] sm:$0xf] }
  0x10   :  { %3167 = vmatpush.bf16.msra.mxu0 %v4825_v44  ;;  %v5104_v0 = vld [vmem:[%s11189_s2 + $0x2d0] sm:$0xf]  ;;  %v7024_v1 = vld [vmem:[%s11189_s2 + $0x2e0] sm:$0xf0]  ;;  %v4945_v5 = vor.u32 %v6984_v63, %v4944_v61  ;;  %v6939_v8 = vld [vmem:[%s11189_s2 + $0x38] sm:$0xf0] }
  0x11   :  { %3180 = vmatpush.bf16.msra.mxu1 %v4985_v45  ;;  %v5264_v2 = vld [vmem:[%s11189_s2 + $0x410] sm:$0xf]  ;;  %v7064_v3 = vld [vmem:[%s11189_s2 + $0x420] sm:$0xf0]  ;;  %v5105_v6 = vor.u32 %v7024_v1, %v5104_v0  ;;  %v4924_v9 = vld [vmem:[%s11189_s2 + $0x168] sm:$0xf]  ;;  %v4765_v16 = vor.u32 %v6939_v8, %v4764_v7 }
  0x12   :  { %3193 = vmatpush.bf16.msra.mxu2 %v5145_v46  ;;  %v5265_v10 = vor.u32 %v7064_v3, %v5264_v2  ;;  %v6979_v11 = vld [vmem:[%s11189_s2 + $0x178] sm:$0xf0]  ;;  %v5084_v12 = vld [vmem:[%s11189_s2 + $0x2a8] sm:$0xf]  ;;  %v4744_v17 = vld [vmem:[%s11189_s2] sm:$0xf] }
  0x13   :  { %3206 = vmatpush.bf16.msra.mxu3 %v5305_v50  ;;  %v7019_v13 = vld [vmem:[%s11189_s2 + $0x2b8] sm:$0xf0]  ;;  %v5244_v14 = vld [vmem:[%s11189_s2 + $0x3e8] sm:$0xf]  ;;  %v6934_v18 = vld [vmem:[%s11189_s2 + $0x10] sm:$0xf0]  ;;  %v4925_v19 = vor.u32 %v6979_v11, %v4924_v9 }
  0x14   :  { %3168 = vmatpush.bf16.msra.mxu0 %v4805_v56  ;;  %v7059_v15 = vld [vmem:[%s11189_s2 + $0x3f8] sm:$0xf0]  ;;  %v5085_v20 = vor.u32 %v7019_v13, %v5084_v12  ;;  %v4904_v21 = vld [vmem:[%s11189_s2 + $0x140] sm:$0xf]  ;;  %v6974_v22 = vld [vmem:[%s11189_s2 + $0x150] sm:$0xf0]  ;;  %v4745_v31 = vor.u32 %v6934_v18, %v4744_v17 }
  0x15   :  { %3181 = vmatpush.bf16.msra.mxu1 %v4965_v57  ;;  %v5064_v23 = vld [vmem:[%s11189_s2 + $0x280] sm:$0xf]  ;;  %v5245_v24 = vor.u32 %v7059_v15, %v5244_v14  ;;  %v7014_v25 = vld [vmem:[%s11189_s2 + $0x290] sm:$0xf0]  ;;  %v5524_v28 = vld [vmem:[%s11189_s2 + $0x618] sm:$0xf]  ;;  %v4905_v35 = vor.u32 %v6974_v22, %v4904_v21 }
  0x16   :  { %3194 = vmatpush.bf16.msra.mxu2 %v5125_v58  ;;  %v5224_v26 = vld [vmem:[%s11189_s2 + $0x3c0] sm:$0xf]  ;;  %v7054_v27 = vld [vmem:[%s11189_s2 + $0x3d0] sm:$0xf0]  ;;  %v7129_v29 = vld [vmem:[%s11189_s2 + $0x628] sm:$0xf0]  ;;  %v5065_v36 = vor.u32 %v7014_v25, %v5064_v23 }
  0x17   :  { %3207 = vmatpush.bf16.msra.mxu3 %v5285_v62  ;;  %v5684_v30 = vld [vmem:[%s11189_s2 + $0x758] sm:$0xf]  ;;  %v7169_v32 = vld [vmem:[%s11189_s2 + $0x768] sm:$0xf0]  ;;  %v5225_v39 = vor.u32 %v7054_v27, %v5224_v26  ;;  %v5525_v40 = vor.u32 %v7129_v29, %v5524_v28  ;;  %v5504_v43 = vld [vmem:[%s11189_s2 + $0x5f0] sm:$0xf] }
  0x18   :  { %3169 = vmatpush.bf16.msra.mxu0 %v4785_v4  ;;  %v5844_v33 = vld [vmem:[%s11189_s2 + $0x898] sm:$0xf]  ;;  %v7209_v34 = vld [vmem:[%s11189_s2 + $0x8a8] sm:$0xf0]  ;;  %v5685_v41 = vor.u32 %v7169_v32, %v5684_v30  ;;  %v7124_v44 = vld [vmem:[%s11189_s2 + $0x600] sm:$0xf0] }
  0x19   :  { %3182 = vmatpush.bf16.msra.mxu1 %v4945_v5  ;;  %v6004_v37 = vld [vmem:[%s11189_s2 + $0x9d8] sm:$0xf]  ;;  %v7249_v38 = vld [vmem:[%s11189_s2 + $0x9e8] sm:$0xf0]  ;;  %v5845_v42 = vor.u32 %v7209_v34, %v5844_v33  ;;  %v5664_v45 = vld [vmem:[%s11189_s2 + $0x730] sm:$0xf]  ;;  %v5505_v52 = vor.u32 %v7124_v44, %v5504_v43 }
  0x1a   :  { %3195 = vmatpush.bf16.msra.mxu2 %v5105_v6  ;;  %v6005_v46 = vor.u32 %v7249_v38, %v6004_v37  ;;  %v7164_v47 = vld [vmem:[%s11189_s2 + $0x740] sm:$0xf0]  ;;  %v5824_v48 = vld [vmem:[%s11189_s2 + $0x870] sm:$0xf]  ;;  %v5484_v55 = vld [vmem:[%s11189_s2 + $0x5c8] sm:$0xf] }
  0x1b   :  { %3208 = vmatpush.bf16.msra.mxu3 %v5265_v10  ;;  %v7204_v49 = vld [vmem:[%s11189_s2 + $0x880] sm:$0xf0]  ;;  %v5984_v50 = vld [vmem:[%s11189_s2 + $0x9b0] sm:$0xf]  ;;  %v5665_v53 = vor.u32 %v7164_v47, %v5664_v45  ;;  %v7119_v56 = vld [vmem:[%s11189_s2 + $0x5d8] sm:$0xf0] }
  0x1c   :  { %3170 = vmatpush.bf16.msra.mxu0 %v4765_v16  ;;  %v7244_v51 = vld [vmem:[%s11189_s2 + $0x9c0] sm:$0xf0]  ;;  %v5825_v54 = vor.u32 %v7204_v49, %v5824_v48  ;;  %v5644_v57 = vld [vmem:[%s11189_s2 + $0x708] sm:$0xf]  ;;  %v7159_v59 = vld [vmem:[%s11189_s2 + $0x718] sm:$0xf0]  ;;  %v5485_v0 = vor.u32 %v7119_v56, %v5484_v55 }
  0x1d   :  { %3183 = vmatpush.bf16.msra.mxu1 %v4925_v19  ;;  %v5985_v58 = vor.u32 %v7244_v51, %v5984_v50  ;;  %v5804_v60 = vld [vmem:[%s11189_s2 + $0x848] sm:$0xf]  ;;  %v7199_v61 = vld [vmem:[%s11189_s2 + $0x858] sm:$0xf0]  ;;  %v5464_v1 = vld [vmem:[%s11189_s2 + $0x5a0] sm:$0xf]  ;;  %v5645_v3 = vor.u32 %v7159_v59, %v5644_v57 }
  0x1e   :  { %3196 = vmatpush.bf16.msra.mxu2 %v5085_v20  ;;  %v5964_v62 = vld [vmem:[%s11189_s2 + $0x988] sm:$0xf]  ;;  %v7239_v63 = vld [vmem:[%s11189_s2 + $0x998] sm:$0xf0]  ;;  %v34_v2 = vld [vmem:[%s11187_s0] sm:$0xff]  ;;  %v5805_v4 = vor.u32 %v7199_v61, %v5804_v60 }
  0x1f   :  { %3209 = vmatpush.bf16.msra.mxu3 %v5245_v24  ;;  %v7114_v5 = vld [vmem:[%s11189_s2 + $0x5b0] sm:$0xf0]  ;;  %v5624_v6 = vld [vmem:[%s11189_s2 + $0x6e0] sm:$0xf]  ;;  %40 = vst [vmem:[#allocation1] ss:$4 sm:$0xff] %v34_v2  ;;  %v5965_v7 = vor.u32 %v7239_v63, %v5964_v62 }
  0x20   :  { %3171 = vmatpush.bf16.msra.mxu0 %v4745_v31  ;;  %v7154_v8 = vld [vmem:[%s11189_s2 + $0x6f0] sm:$0xf0]  ;;  %v5784_v9 = vld [vmem:[%s11189_s2 + $0x820] sm:$0xf]  ;;  %v5465_v13 = vor.u32 %v7114_v5, %v5464_v1  ;;  %v5444_v14 = vld [vmem:[%s11189_s2 + $0x578] sm:$0xf] }
  0x21   :  { %3184 = vmatpush.bf16.msra.mxu1 %v4905_v35  ;;  %v7194_v10 = vld [vmem:[%s11189_s2 + $0x830] sm:$0xf0]  ;;  %v5944_v11 = vld [vmem:[%s11189_s2 + $0x960] sm:$0xf]  ;;  %v7109_v15 = vld [vmem:[%s11189_s2 + $0x588] sm:$0xf0]  ;;  %v5625_v16 = vor.u32 %v7154_v8, %v5624_v6 }
  0x22   :  { %3197 = vmatpush.bf16.msra.mxu2 %v5065_v36  ;;  %v7234_v12 = vld [vmem:[%s11189_s2 + $0x970] sm:$0xf0]  ;;  %v5785_v17 = vor.u32 %v7194_v10, %v5784_v9  ;;  %v5604_v18 = vld [vmem:[%s11189_s2 + $0x6b8] sm:$0xf]  ;;  %v7149_v19 = vld [vmem:[%s11189_s2 + $0x6c8] sm:$0xf0]  ;;  %v5445_v28 = vor.u32 %v7109_v15, %v5444_v14 }
  0x23   :  { %3210 = vmatpush.bf16.msra.mxu3 %v5225_v39  ;;  %v5764_v20 = vld [vmem:[%s11189_s2 + $0x7f8] sm:$0xf]  ;;  %v5945_v21 = vor.u32 %v7234_v12, %v5944_v11  ;;  %v7189_v22 = vld [vmem:[%s11189_s2 + $0x808] sm:$0xf0]  ;;  %v5424_v25 = vld [vmem:[%s11189_s2 + $0x550] sm:$0xf]  ;;  %v5605_v29 = vor.u32 %v7149_v19, %v5604_v18 }
  0x24   :  { %3216 = vmatpush.bf16.msrb.mxu0 %v5525_v40  ;;  %v5924_v23 = vld [vmem:[%s11189_s2 + $0x938] sm:$0xf]  ;;  %v7229_v24 = vld [vmem:[%s11189_s2 + $0x948] sm:$0xf0]  ;;  %v7104_v26 = vld [vmem:[%s11189_s2 + $0x560] sm:$0xf0]  ;;  %v5765_v34 = vor.u32 %v7189_v22, %v5764_v20 }
  0x25   :  { %3229 = vmatpush.bf16.msrb.mxu1 %v5685_v41  ;;  %v36_v27 = vld [vmem:[%s11187_s0 + $0x10] sm:$0xff]  ;;  %v7144_v31 = vld [vmem:[%s11189_s2 + $0x6a0] sm:$0xf0]  ;;  %v5925_v39 = vor.u32 %v7229_v24, %v5924_v23  ;;  %v5404_v47 = vld [vmem:[%s11189_s2 + $0x528] sm:$0xf] }
  0x26   :  { %3242 = vmatpush.bf16.msrb.mxu2 %v5845_v42  ;;  %v5584_v30 = vld [vmem:[%s11189_s2 + $0x690] sm:$0xf]  ;;  %v43_v33 = vld.sshfl [vmem:[#allocation1] sm:$0xff pattern:$0x73625140]  ;;  %v35_v56 = vld [vmem:[%s11187_s0 + $0x8] sm:$0xff] }
  0x27   :  { %3255 = vmatpush.bf16.msrb.mxu3 %v6005_v46  ;;  %v45_v32 = vld.sshfl [vmem:[#allocation1 + $0x10] sm:$0xff pattern:$0x73625140]  ;;  %v7907_v36 = vpack.c.bf16 %v43_v33, %v43_v33  ;;  %v46_v37 = vld.sshfl [vmem:[#allocation1 + $0x18] sm:$0xff pattern:$0x73625140]  ;;  %v5425_v46 = vor.u32 %v7104_v26, %v5424_v25  ;;  %v5585_v48 = vor.u32 %v7144_v31, %v5584_v30 }
  0x28   :  { %3217 = vmatpush.bf16.msrb.mxu0 %v5505_v52  ;;  %v7905_v35 = vpack.c.bf16 %v45_v32, %v45_v32  ;;  %v44_v38 = vld.sshfl [vmem:[#allocation1 + $0x8] sm:$0xff pattern:$0x73625140]  ;;  %v5744_v40 = vld [vmem:[%s11189_s2 + $0x7d0] sm:$0xf]  ;;  %v7915_v42 = vpack.c.bf16 %v46_v37, %v46_v37 }
  0x29   :  { %3230 = vmatpush.bf16.msrb.mxu1 %v5665_v53  ;;  %v7184_v41 = vld [vmem:[%s11189_s2 + $0x7e0] sm:$0xf0]  ;;  %51 = vst [vmem:[#allocation1] ss:$4 sm:$0xff] %v36_v27  ;;  %v7917_v43 = vpack.c.bf16 %v44_v38, %v44_v38  ;;  %v5904_v44 = vld [vmem:[%s11189_s2 + $0x910] sm:$0xf]  ;;  %3172 = vmatmul.bf16.vlgmr.msra.gmra.mxu0 %v7907_v36 }
  0x2a   :  { %3243 = vmatpush.bf16.msrb.mxu2 %v5825_v54  ;;  %v7224_v45 = vld [vmem:[%s11189_s2 + $0x920] sm:$0xf0]  ;;  %3211 = vmatmul.bf16.vlgmr.msra.gmra.mxu3 %v7915_v42  ;;  %v5745_v49 = vor.u32 %v7184_v41, %v5744_v40  ;;  %v7099_v50 = vld [vmem:[%s11189_s2 + $0x538] sm:$0xf0]  ;;  %v5564_v51 = vld [vmem:[%s11189_s2 + $0x668] sm:$0xf] }
  0x2b   :  { %3256 = vmatpush.bf16.msrb.mxu3 %v5985_v58  ;;  %3198 = vmatmul.bf16.vlgmr.msra.gmra.mxu2 %v7905_v35  ;;  %v7139_v52 = vld [vmem:[%s11189_s2 + $0x678] sm:$0xf0]  ;;  %v5905_v53 = vor.u32 %v7224_v45, %v5904_v44  ;;  %v5724_v54 = vld [vmem:[%s11189_s2 + $0x7a8] sm:$0xf]  ;;  %42 = vst [vmem:[#allocation1 + $0x20] ss:$4 sm:$0xff] %v35_v56  ;;  %v5405_v59 = vor.u32 %v7099_v50, %v5404_v47 }
  0x2c   :  { %3218 = vmatpush.bf16.msrb.mxu0 %v5485_v0  ;;  %v7179_v55 = vld [vmem:[%s11189_s2 + $0x7b8] sm:$0xf0]  ;;  %3185 = vmatmul.bf16.vlgmr.msra.gmra.mxu1 %v7917_v43  ;;  %v5884_v57 = vld [vmem:[%s11189_s2 + $0x8e8] sm:$0xf]  ;;  %v5384_v60 = vld [vmem:[%s11189_s2 + $0x500] sm:$0xf]  ;;  %v5565_v63 = vor.u32 %v7139_v52, %v5564_v51 }
  0x2d   :  { %3231 = vmatpush.bf16.msrb.mxu1 %v5645_v3  ;;  %v7219_v58 = vld [vmem:[%s11189_s2 + $0x8f8] sm:$0xf0]  ;;  %v7094_v61 = vld [vmem:[%s11189_s2 + $0x510] sm:$0xf0]  ;;  %v5544_v62 = vld [vmem:[%s11189_s2 + $0x640] sm:$0xf]  ;;  %v5725_v0 = vor.u32 %v7179_v55, %v5724_v54 }
  0x2e   :  { %3244 = vmatpush.bf16.msrb.mxu2 %v5805_v4  ;;  %v7134_v1 = vld [vmem:[%s11189_s2 + $0x650] sm:$0xf0]  ;;  %v5704_v2 = vld [vmem:[%s11189_s2 + $0x780] sm:$0xf]  ;;  %v5885_v4 = vor.u32 %v7219_v58, %v5884_v57  ;;  %v7289_v8 = vld [vmem:[%s11189_s2 + $0xb28] sm:$0xf0]  ;;  %v5385_v11 = vor.u32 %v7094_v61, %v5384_v60 }
  0x2f   :  { %3257 = vmatpush.bf16.msrb.mxu3 %v5965_v7  ;;  %v7174_v3 = vld [vmem:[%s11189_s2 + $0x790] sm:$0xf0]  ;;  %v5864_v5 = vld [vmem:[%s11189_s2 + $0x8c0] sm:$0xf]  ;;  %v6164_v7 = vld [vmem:[%s11189_s2 + $0xb18] sm:$0xf]  ;;  %v5545_v15 = vor.u32 %v7134_v1, %v5544_v62 }
  0x30   :  { %3219 = vmatpush.bf16.msrb.mxu0 %v5465_v13  ;;  %v7214_v6 = vld [vmem:[%s11189_s2 + $0x8d0] sm:$0xf0]  ;;  %v6324_v9 = vld [vmem:[%s11189_s2 + $0xc58] sm:$0xf]  ;;  %v7329_v10 = vld [vmem:[%s11189_s2 + $0xc68] sm:$0xf0] }
  0x31   :  { %3232 = vmatpush.bf16.msrb.mxu1 %v5625_v16  ;;  %v6484_v12 = vld [vmem:[%s11189_s2 + $0xd98] sm:$0xf]  ;;  %v7369_v13 = vld [vmem:[%s11189_s2 + $0xda8] sm:$0xf0]  ;;  %v5705_v16 = vor.u32 %v7174_v3, %v5704_v2  ;;  %v6144_v18 = vld [vmem:[%s11189_s2 + $0xaf0] sm:$0xf]  ;;  %v5865_v20 = vor.u32 %v7214_v6, %v5864_v5  ;;  %v6325_v25 = vor.u32 %v7329_v10, %v6324_v9 }
  0x32   :  { %3245 = vmatpush.bf16.msrb.mxu2 %v5785_v17  ;;  %v6644_v14 = vld [vmem:[%s11189_s2 + $0xed8] sm:$0xf]  ;;  %v7409_v17 = vld [vmem:[%s11189_s2 + $0xee8] sm:$0xf0]  ;;  %v7284_v19 = vld [vmem:[%s11189_s2 + $0xb00] sm:$0xf0]  ;;  %v6485_v26 = vor.u32 %v7369_v13, %v6484_v12 }
  0x33   :  { %3258 = vmatpush.bf16.msrb.mxu3 %v5945_v21  ;;  %v6165_v21 = vor.u32 %v7289_v8, %v6164_v7  ;;  %v6304_v22 = vld [vmem:[%s11189_s2 + $0xc30] sm:$0xf]  ;;  %v47_v24 = vld.sshfl [vmem:[#allocation1 + $0x20] sm:$0xff pattern:$0x73625140]  ;;  %v6145_v40 = vor.u32 %v7284_v19, %v6144_v18 }
  0x34   :  { %3220 = vmatpush.bf16.msrb.mxu0 %v5445_v28  ;;  %v49_v23 = vld.sshfl [vmem:[#allocation1 + $0x30] sm:$0xff pattern:$0x73625140]  ;;  %v50_v27 = vld.sshfl [vmem:[#allocation1 + $0x38] sm:$0xff pattern:$0x73625140]  ;;  %v8030_v38 = vpack.c.bf16 %v47_v24, %v47_v24 }
  0x35   :  { %3233 = vmatpush.bf16.msrb.mxu1 %v5605_v29  ;;  %v48_v28 = vld.sshfl [vmem:[#allocation1 + $0x28] sm:$0xff pattern:$0x73625140]  ;;  %v6645_v29 = vor.u32 %v7409_v17, %v6644_v14  ;;  %v7324_v30 = vld [vmem:[%s11189_s2 + $0xc40] sm:$0xf0]  ;;  %v8022_v33 = vpack.c.bf16 %v49_v23, %v49_v23 }
  0x36   :  { %3246 = vmatpush.bf16.msrb.mxu2 %v5765_v34  ;;  %v6464_v31 = vld [vmem:[%s11189_s2 + $0xd70] sm:$0xf]  ;;  %v7364_v32 = vld [vmem:[%s11189_s2 + $0xd80] sm:$0xf0]  ;;  %v8034_v41 = vpack.c.bf16 %v48_v28, %v48_v28  ;;  %v6305_v44 = vor.u32 %v7324_v30, %v6304_v22  ;;  %v7279_v47 = vld [vmem:[%s11189_s2 + $0xad8] sm:$0xf0] }
  0x37   :  { %3259 = vmatpush.bf16.msrb.mxu3 %v5925_v39  ;;  %v6624_v34 = vld [vmem:[%s11189_s2 + $0xeb0] sm:$0xf]  ;;  %v7404_v37 = vld [vmem:[%s11189_s2 + $0xec0] sm:$0xf0]  ;;  %v8032_v39 = vpack.c.bf16 %v50_v27, %v50_v27  ;;  %v6465_v45 = vor.u32 %v7364_v32, %v6464_v31  ;;  %v7319_v50 = vld [vmem:[%s11189_s2 + $0xc18] sm:$0xf0] }
  0x38   :  { %3221 = vmatpush.bf16.msrb.mxu0 %v5425_v46  ;;  %v6124_v46 = vld [vmem:[%s11189_s2 + $0xac8] sm:$0xf]  ;;  %v7359_v52 = vld [vmem:[%s11189_s2 + $0xd58] sm:$0xf0]  ;;  %v6104_v58 = vld [vmem:[%s11189_s2 + $0xaa0] sm:$0xf] }
  0x39   :  { %3234 = vmatpush.bf16.msrb.mxu1 %v5585_v48  ;;  %v6284_v48 = vld [vmem:[%s11189_s2 + $0xc08] sm:$0xf]  ;;  %v7399_v54 = vld [vmem:[%s11189_s2 + $0xe98] sm:$0xf0]  ;;  %v6125_v55 = vor.u32 %v7279_v47, %v6124_v46  ;;  %v6264_v60 = vld [vmem:[%s11189_s2 + $0xbe0] sm:$0xf] }
  0x3a   :  { %3247 = vmatpush.bf16.msrb.mxu2 %v5745_v49  ;;  %v6625_v49 = vor.u32 %v7404_v37, %v6624_v34  ;;  %v6444_v51 = vld [vmem:[%s11189_s2 + $0xd48] sm:$0xf]  ;;  %v6285_v56 = vor.u32 %v7319_v50, %v6284_v48  ;;  %v7314_v62 = vld [vmem:[%s11189_s2 + $0xbf0] sm:$0xf0]  ;;  %v6584_v1 = vld [vmem:[%s11189_s2 + $0xe60] sm:$0xf] }
  0x3b   :  { %3260 = vmatpush.bf16.msrb.mxu3 %v5905_v53  ;;  %v6604_v53 = vld [vmem:[%s11189_s2 + $0xe88] sm:$0xf]  ;;  %v6445_v57 = vor.u32 %v7359_v52, %v6444_v51  ;;  %v7394_v2 = vld [vmem:[%s11189_s2 + $0xe70] sm:$0xf0]  ;;  %v6084_v6 = vld [vmem:[%s11189_s2 + $0xa78] sm:$0xf] }
  0x3c   :  { %3222 = vmatpush.bf16.msrb.mxu0 %v5405_v59  ;;  %v7274_v59 = vld [vmem:[%s11189_s2 + $0xab0] sm:$0xf0]  ;;  %v6605_v61 = vor.u32 %v7399_v54, %v6604_v53  ;;  %v7269_v7 = vld [vmem:[%s11189_s2 + $0xa88] sm:$0xf0]  ;;  %v6244_v8 = vld [vmem:[%s11189_s2 + $0xbb8] sm:$0xf]  ;;  %v6585_v9 = vor.u32 %v7394_v2, %v6584_v1 }
  0x3d   :  { %3235 = vmatpush.bf16.msrb.mxu1 %v5565_v63  ;;  %v6424_v63 = vld [vmem:[%s11189_s2 + $0xd20] sm:$0xf]  ;;  %v6105_v3 = vor.u32 %v7274_v59, %v6104_v58  ;;  %v7309_v10 = vld [vmem:[%s11189_s2 + $0xbc8] sm:$0xf0]  ;;  %v6564_v13 = vld [vmem:[%s11189_s2 + $0xe38] sm:$0xf] }
  0x3e   :  { %3248 = vmatpush.bf16.msrb.mxu2 %v5725_v0  ;;  %v7354_v0 = vld [vmem:[%s11189_s2 + $0xd30] sm:$0xf0]  ;;  %v7349_v12 = vld [vmem:[%s11189_s2 + $0xd08] sm:$0xf0]  ;;  %v6064_v18 = vld [vmem:[%s11189_s2 + $0xa50] sm:$0xf] }
  0x3f   :  { %3261 = vmatpush.bf16.msrb.mxu3 %v5885_v4  ;;  %v6265_v4 = vor.u32 %v7314_v62, %v6264_v60  ;;  %v6425_v5 = vor.u32 %v7354_v0, %v6424_v63  ;;  %v7389_v14 = vld [vmem:[%s11189_s2 + $0xe48] sm:$0xf0]  ;;  %v7264_v19 = vld [vmem:[%s11189_s2 + $0xa60] sm:$0xf0]  ;;  %v6384_v23 = vld [vmem:[%s11189_s2 + $0xcd0] sm:$0xf] }
  0x40   :  { %3223 = vmatpush.bf16.msrb.mxu0 %v5385_v11  ;;  %v6404_v11 = vld [vmem:[%s11189_s2 + $0xcf8] sm:$0xf]  ;;  %v7304_v22 = vld [vmem:[%s11189_s2 + $0xba0] sm:$0xf0]  ;;  %v6065_v27 = vor.u32 %v7264_v19, %v6064_v18  ;;  %v6044_v30 = vld [vmem:[%s11189_s2 + $0xa28] sm:$0xf] }
  0x41   :  { %3236 = vmatpush.bf16.msrb.mxu1 %v5545_v15  ;;  %v6085_v15 = vor.u32 %v7269_v7, %v6084_v6  ;;  %v6405_v17 = vor.u32 %v7349_v12, %v6404_v11  ;;  %v7344_v24 = vld [vmem:[%s11189_s2 + $0xce0] sm:$0xf0]  ;;  %v7259_v31 = vld [vmem:[%s11189_s2 + $0xa38] sm:$0xf0]  ;;  %v6204_v32 = vld [vmem:[%s11189_s2 + $0xb68] sm:$0xf] }
  0x42   :  { %3249 = vmatpush.bf16.msrb.mxu2 %v5705_v16  ;;  %v6245_v16 = vor.u32 %v7309_v10, %v6244_v8  ;;  %v7299_v37 = vld [vmem:[%s11189_s2 + $0xb78] sm:$0xf0]  ;;  %v6024_v47 = vld [vmem:[%s11189_s2 + $0xa00] sm:$0xf]  ;;  %v6045_v48 = vor.u32 %v7259_v31, %v6044_v30  ;;  %v7294_v51 = vld [vmem:[%s11189_s2 + $0xb50] sm:$0xf0] }
  0x43   :  { %3262 = vmatpush.bf16.msrb.mxu3 %v5865_v20  ;;  %3224 = vmatmul.bf16.vlgmr.msrb.gmra.mxu0 %v8030_v38  ;;  %v6224_v20 = vld [vmem:[%s11189_s2 + $0xb90] sm:$0xf]  ;;  %v7379_v46 = vld [vmem:[%s11189_s2 + $0xdf8] sm:$0xf0]  ;;  %v6184_v50 = vld [vmem:[%s11189_s2 + $0xb40] sm:$0xf]  ;;  %v6205_v52 = vor.u32 %v7299_v37, %v6204_v32 }
  0x44   :  { %3268 = vmatpush.bf16.msra.mxu0 %v6165_v21  ;;  %3237 = vmatmul.bf16.vlgmr.msrb.gmra.mxu1 %v8034_v41  ;;  %v6565_v21 = vor.u32 %v7389_v14, %v6564_v13  ;;  %v6225_v28 = vor.u32 %v7304_v22, %v6224_v20  ;;  %v6344_v54 = vld [vmem:[%s11189_s2 + $0xc80] sm:$0xf]  ;;  %v7374_v58 = vld [vmem:[%s11189_s2 + $0xdd0] sm:$0xf0]  ;;  %v6967_v59 = vld [vmem:[%s11189_s2 + $0x11c] sm:$0xf] }
  0x45   :  { %3281 = vmatpush.bf16.msra.mxu1 %v6325_v25  ;;  %3250 = vmatmul.bf16.vlgmr.msrb.gmra.mxu2 %v8022_v33  ;;  %v6544_v25 = vld [vmem:[%s11189_s2 + $0xe10] sm:$0xf]  ;;  %v7047_v63 = vld [vmem:[%s11189_s2 + $0x39c] sm:$0xf]  ;;  %v6962_v14 = vld [vmem:[%s11189_s2 + $0xf4] sm:$0xf] }
  0x46   :  { %3294 = vmatpush.bf16.msra.mxu2 %v6485_v26  ;;  %3263 = vmatmul.bf16.vlgmr.msrb.gmra.mxu3 %v8032_v39  ;;  %v7384_v26 = vld [vmem:[%s11189_s2 + $0xe20] sm:$0xf0]  ;;  %v4886_v60 = vld [vmem:[%s11189_s2 + $0x12c] sm:$0xf0]  ;;  %v7087_v2 = vld [vmem:[%s11189_s2 + $0x4dc] sm:$0xf] }
  0x47   :  { %3307 = vmatpush.bf16.msra.mxu3 %v6645_v29  ;;  %v6385_v29 = vor.u32 %v7344_v24, %v6384_v23  ;;  %v6545_v34 = vor.u32 %v7384_v26, %v6544_v25  ;;  %v5046_v62 = vld [vmem:[%s11189_s2 + $0x26c] sm:$0xf0]  ;;  %v52_v6 = vld.sshfl [vmem:[#allocation1] sm:$0xff pattern:$0x73625140] }
  0x48   :  { %3269 = vmatpush.bf16.msra.mxu0 %v6145_v40  ;;  %v6364_v40 = vld [vmem:[%s11189_s2 + $0xca8] sm:$0xf]  ;;  %v5206_v1 = vld [vmem:[%s11189_s2 + $0x3ac] sm:$0xf0]  ;;  %v8217_v18 = vpack.c.bf16 %v52_v6, %v52_v6  ;;  %v7042_v20 = vld [vmem:[%s11189_s2 + $0x374] sm:$0xf] }
  0x49   :  { %3282 = vmatpush.bf16.msra.mxu1 %v6305_v44  ;;  %v7339_v44 = vld [vmem:[%s11189_s2 + $0xcb8] sm:$0xf0]  ;;  %v54_v7 = vld.sshfl [vmem:[#allocation1 + $0x10] sm:$0xff pattern:$0x73625140]  ;;  %v5209_v13 = vor.u32 %v7047_v63, %v5206_v1 }
  0x4a   :  { %3295 = vmatpush.bf16.msra.mxu2 %v6465_v45  ;;  %v6524_v45 = vld [vmem:[%s11189_s2 + $0xde8] sm:$0xf]  ;;  %v6365_v53 = vor.u32 %v7339_v44, %v6364_v40  ;;  %v55_v11 = vld.sshfl [vmem:[#allocation1 + $0x18] sm:$0xff pattern:$0x73625140]  ;;  %v8228_v22 = vpack.c.bf16 %v54_v7, %v54_v7 }
  0x4b   :  { %3308 = vmatpush.bf16.msra.mxu3 %v6625_v49  ;;  %v7254_v49 = vld [vmem:[%s11189_s2 + $0xa10] sm:$0xf0]  ;;  %v53_v10 = vld.sshfl [vmem:[#allocation1 + $0x8] sm:$0xff pattern:$0x73625140]  ;;  %v8238_v26 = vpack.c.bf16 %v55_v11, %v55_v11 }
  0x4c   :  { %3270 = vmatpush.bf16.msra.mxu0 %v6125_v55  ;;  %v7334_v55 = vld [vmem:[%s11189_s2 + $0xc90] sm:$0xf0]  ;;  %v6025_v0 = vor.u32 %v7254_v49, %v6024_v47  ;;  %v5026_v19 = vld [vmem:[%s11189_s2 + $0x244] sm:$0xf0]  ;;  %v8230_v23 = vpack.c.bf16 %v53_v10, %v53_v10  ;;  %v6957_v30 = vld [vmem:[%s11189_s2 + $0xcc] sm:$0xf] }
  0x4d   :  { %3283 = vmatpush.bf16.msra.mxu1 %v6285_v56  ;;  %v6504_v56 = vld [vmem:[%s11189_s2 + $0xdc0] sm:$0xf]  ;;  %v7082_v24 = vld [vmem:[%s11189_s2 + $0x4b4] sm:$0xf]  ;;  %v5346_v25 = vld [vmem:[%s11189_s2 + $0x4c4] sm:$0xf0] }
  0x4e   :  { %3296 = vmatpush.bf16.msra.mxu2 %v6445_v57  ;;  %v6525_v57 = vor.u32 %v7379_v46, %v6524_v45  ;;  %v6505_v8 = vor.u32 %v7374_v58, %v6504_v56  ;;  %v4846_v31 = vld [vmem:[%s11189_s2 + $0xdc] sm:$0xf0]  ;;  %v6997_v32 = vld [vmem:[%s11189_s2 + $0x20c] sm:$0xf]  ;;  %v5146_v56 = vld [vmem:[%s11189_s2 + $0x334] sm:$0xf0] }
  0x4f   :  { %3309 = vmatpush.bf16.msra.mxu3 %v6605_v61  ;;  %v7007_v61 = vld [vmem:[%s11189_s2 + $0x25c] sm:$0xf]  ;;  %v5006_v37 = vld [vmem:[%s11189_s2 + $0x21c] sm:$0xf0]  ;;  %v7037_v40 = vld [vmem:[%s11189_s2 + $0x34c] sm:$0xf]  ;;  %v4849_v47 = vor.u32 %v6957_v30, %v4846_v31 }
  0x50   :  { %3271 = vmatpush.bf16.msra.mxu0 %v6105_v3  ;;  %v5366_v3 = vld [vmem:[%s11189_s2 + $0x4ec] sm:$0xf0]  ;;  %v5049_v12 = vor.u32 %v7007_v61, %v5046_v62  ;;  %v5166_v44 = vld [vmem:[%s11189_s2 + $0x35c] sm:$0xf0]  ;;  %v7077_v45 = vld [vmem:[%s11189_s2 + $0x48c] sm:$0xf] }
  0x51   :  { %3284 = vmatpush.bf16.msra.mxu1 %v6265_v4  ;;  %v6185_v4 = vor.u32 %v7294_v51, %v6184_v50  ;;  %v5326_v46 = vld [vmem:[%s11189_s2 + $0x49c] sm:$0xf0]  ;;  %v5169_v49 = vor.u32 %v7037_v40, %v5166_v44  ;;  %v6952_v50 = vld [vmem:[%s11189_s2 + $0xa4] sm:$0xf]  ;;  %v4826_v51 = vld [vmem:[%s11189_s2 + $0xb4] sm:$0xf0] }
  0x52   :  { %3297 = vmatpush.bf16.msra.mxu2 %v6425_v5  ;;  %v6345_v5 = vor.u32 %v7334_v55, %v6344_v54  ;;  %v4986_v54 = vld [vmem:[%s11189_s2 + $0x1f4] sm:$0xf0]  ;;  %v7032_v55 = vld [vmem:[%s11189_s2 + $0x324] sm:$0xf]  ;;  %v4806_v63 = vld [vmem:[%s11189_s2 + $0x8c] sm:$0xf0] }
  0x53   :  { %3310 = vmatpush.bf16.msra.mxu3 %v6585_v9  ;;  %v4889_v9 = vor.u32 %v6967_v59, %v4886_v60  ;;  %v5306_v58 = vld [vmem:[%s11189_s2 + $0x474] sm:$0xf0]  ;;  %v4829_v59 = vor.u32 %v6952_v50, %v4826_v51  ;;  %v6947_v60 = vld [vmem:[%s11189_s2 + $0x7c] sm:$0xf]  ;;  %v5149_v62 = vor.u32 %v7032_v55, %v5146_v56  ;;  %v4966_v1 = vld [vmem:[%s11189_s2 + $0x1cc] sm:$0xf0] }
  0x54   :  { %3272 = vmatpush.bf16.msra.mxu0 %v6085_v15  ;;  %v4866_v15 = vld [vmem:[%s11189_s2 + $0x104] sm:$0xf0]  ;;  %v5286_v6 = vld [vmem:[%s11189_s2 + $0x44c] sm:$0xf0] }
  0x55   :  { %3285 = vmatpush.bf16.msra.mxu1 %v6245_v16  ;;  %v7002_v16 = vld [vmem:[%s11189_s2 + $0x234] sm:$0xf] }
  0x56   :  { %3298 = vmatpush.bf16.msra.mxu2 %v6405_v17  ;;  %v5369_v17 = vor.u32 %v7087_v2, %v5366_v3  ;;  %v7027_v3 = vld [vmem:[%s11189_s2 + $0x2fc] sm:$0xf] }
  0x57   :  { %3311 = vmatpush.bf16.msra.mxu3 %v6565_v21  ;;  %v5186_v21 = vld [vmem:[%s11189_s2 + $0x384] sm:$0xf0] }
  0x58   :  { %3273 = vmatpush.bf16.msra.mxu0 %v6065_v27  ;;  %v4869_v27 = vor.u32 %v6962_v14, %v4866_v15 }
  0x59   :  { %3286 = vmatpush.bf16.msra.mxu1 %v6225_v28  ;;  %v5029_v28 = vor.u32 %v7002_v16, %v5026_v19 }
  0x5a   :  { %3299 = vmatpush.bf16.msra.mxu2 %v6385_v29  ;;  %v5189_v29 = vor.u32 %v7042_v20, %v5186_v21 }
  0x5b   :  { %3312 = vmatpush.bf16.msra.mxu3 %v6545_v34  ;;  %v5349_v34 = vor.u32 %v7082_v24, %v5346_v25 }
  0x5c   :  { %3274 = vmatpush.bf16.msra.mxu0 %v6045_v48  ;;  %v5009_v48 = vor.u32 %v6997_v32, %v5006_v37 }
  0x5d   :  { %3287 = vmatpush.bf16.msra.mxu1 %v6205_v52  ;;  %v6992_v52 = vld [vmem:[%s11189_s2 + $0x1e4] sm:$0xf] }
  0x5e   :  { %3300 = vmatpush.bf16.msra.mxu2 %v6365_v53  ;;  %v5329_v53 = vor.u32 %v7077_v45, %v5326_v46  ;;  %v4989_v61 = vor.u32 %v6992_v52, %v4986_v54 }
  0x5f   :  { %3313 = vmatpush.bf16.msra.mxu3 %v6525_v57  ;;  %v7072_v57 = vld [vmem:[%s11189_s2 + $0x464] sm:$0xf] }
  0x60   :  { %3275 = vmatpush.bf16.msra.mxu0 %v6025_v0  ;;  %v6987_v0 = vld [vmem:[%s11189_s2 + $0x1bc] sm:$0xf]  ;;  %v5309_v2 = vor.u32 %v7072_v57, %v5306_v58 }
  0x61   :  { %3288 = vmatpush.bf16.msra.mxu1 %v6185_v4  ;;  %v5126_v4 = vld [vmem:[%s11189_s2 + $0x30c] sm:$0xf0] }
  0x62   :  { %3301 = vmatpush.bf16.msra.mxu2 %v6345_v5  ;;  %v7067_v5 = vld [vmem:[%s11189_s2 + $0x43c] sm:$0xf] }
  0x63   :  { %3314 = vmatpush.bf16.msra.mxu3 %v6505_v8  ;;  %3276 = vmatmul.bf16.vlgmr.msra.gmra.mxu0 %v8217_v18 }
  0x64   :  { %3320 = vmatpush.bf16.msrb.mxu0 %v4889_v9  ;;  %3289 = vmatmul.bf16.vlgmr.msra.gmra.mxu1 %v8230_v23 }
  0x65   :  { %3333 = vmatpush.bf16.msrb.mxu1 %v5049_v12  ;;  %3302 = vmatmul.bf16.vlgmr.msra.gmra.mxu2 %v8228_v22 }
  0x66   :  { %3346 = vmatpush.bf16.msrb.mxu2 %v5209_v13  ;;  %3315 = vmatmul.bf16.vlgmr.msra.gmra.mxu3 %v8238_v26 }
  0x67   :  { %3359 = vmatpush.bf16.msrb.mxu3 %v5369_v17 }
  0x68   :  { %3321 = vmatpush.bf16.msrb.mxu0 %v4869_v27 }
  0x69   :  { %3334 = vmatpush.bf16.msrb.mxu1 %v5029_v28 }
  0x6a   :  { %3347 = vmatpush.bf16.msrb.mxu2 %v5189_v29 }
  0x6b   :  { %3360 = vmatpush.bf16.msrb.mxu3 %v5349_v34 }
  0x6c   :  { %3322 = vmatpush.bf16.msrb.mxu0 %v4849_v47 }
  0x6d   :  { %3335 = vmatpush.bf16.msrb.mxu1 %v5009_v48 }
  0x6e   :  { %3348 = vmatpush.bf16.msrb.mxu2 %v5169_v49 }
  0x6f   :  { %3361 = vmatpush.bf16.msrb.mxu3 %v5329_v53 }
  0x70   :  { %14 = vsyncpa [#allocation3], 0  ;;  %3323 = vmatpush.bf16.msrb.mxu0 %v4829_v59  ;;  %v4809_v7 = vor.u32 %v6947_v60, %v4806_v63  ;;  %v4969_v8 = vor.u32 %v6987_v0, %v4966_v1  ;;  %v5129_v9 = vor.u32 %v7027_v3, %v5126_v4  ;;  %v6942_v10 = vld [vmem:[%s11189_s2 + $0x54] sm:$0xf]  ;;  %v4786_v11 = vld [vmem:[%s11189_s2 + $0x64] sm:$0xf0]  ;;  %v5289_v13 = vor.u32 %v7067_v5, %v5286_v6 }
  0x71   :  { %3336 = vmatpush.bf16.msrb.mxu1 %v4989_v61  ;;  %v6982_v12 = vld [vmem:[%s11189_s2 + $0x194] sm:$0xf]  ;;  %v4946_v14 = vld [vmem:[%s11189_s2 + $0x1a4] sm:$0xf0]  ;;  %v4789_v20 = vor.u32 %v6942_v10, %v4786_v11  ;;  %v6937_v25 = vld [vmem:[%s11189_s2 + $0x2c] sm:$0xf] }
  0x72   :  { %3349 = vmatpush.bf16.msrb.mxu2 %v5149_v62  ;;  %v7022_v15 = vld [vmem:[%s11189_s2 + $0x2d4] sm:$0xf]  ;;  %v5106_v16 = vld [vmem:[%s11189_s2 + $0x2e4] sm:$0xf0]  ;;  %v4949_v21 = vor.u32 %v6982_v12, %v4946_v14  ;;  %v4766_v27 = vld [vmem:[%s11189_s2 + $0x3c] sm:$0xf0] }
  0x73   :  { %3362 = vmatpush.bf16.msrb.mxu3 %v5309_v2  ;;  %v7062_v17 = vld [vmem:[%s11189_s2 + $0x414] sm:$0xf]  ;;  %v5266_v19 = vld [vmem:[%s11189_s2 + $0x424] sm:$0xf0]  ;;  %v5109_v24 = vor.u32 %v7022_v15, %v5106_v16  ;;  %v6977_v28 = vld [vmem:[%s11189_s2 + $0x16c] sm:$0xf]  ;;  %v4769_v40 = vor.u32 %v6937_v25, %v4766_v27 }
  0x74   :  { %3324 = vmatpush.bf16.msrb.mxu0 %v4809_v7  ;;  %v5269_v29 = vor.u32 %v7062_v17, %v5266_v19  ;;  %v4926_v30 = vld [vmem:[%s11189_s2 + $0x17c] sm:$0xf0]  ;;  %v7017_v31 = vld [vmem:[%s11189_s2 + $0x2ac] sm:$0xf]  ;;  %v6932_v44 = vld [vmem:[%s11189_s2 + $0x4] sm:$0xf] }
  0x75   :  { %3337 = vmatpush.bf16.msrb.mxu1 %v4969_v8  ;;  %v5086_v32 = vld [vmem:[%s11189_s2 + $0x2bc] sm:$0xf0]  ;;  %v7057_v34 = vld [vmem:[%s11189_s2 + $0x3ec] sm:$0xf]  ;;  %v4746_v45 = vld [vmem:[%s11189_s2 + $0x14] sm:$0xf0]  ;;  %v4929_v46 = vor.u32 %v6977_v28, %v4926_v30 }
  0x76   :  { %3350 = vmatpush.bf16.msrb.mxu2 %v5129_v9  ;;  %v5246_v37 = vld [vmem:[%s11189_s2 + $0x3fc] sm:$0xf0]  ;;  %v5089_v47 = vor.u32 %v7017_v31, %v5086_v32  ;;  %v6972_v48 = vld [vmem:[%s11189_s2 + $0x144] sm:$0xf]  ;;  %v4906_v49 = vld [vmem:[%s11189_s2 + $0x154] sm:$0xf0]  ;;  %v4749_v58 = vor.u32 %v6932_v44, %v4746_v45 }
  0x77   :  { %3363 = vmatpush.bf16.msrb.mxu3 %v5289_v13  ;;  %v7012_v50 = vld [vmem:[%s11189_s2 + $0x284] sm:$0xf]  ;;  %v5249_v51 = vor.u32 %v7057_v34, %v5246_v37  ;;  %v5066_v52 = vld [vmem:[%s11189_s2 + $0x294] sm:$0xf0]  ;;  %v7127_v55 = vld [vmem:[%s11189_s2 + $0x61c] sm:$0xf]  ;;  %v4909_v62 = vor.u32 %v6972_v48, %v4906_v49 }
  0x78   :  { %3325 = vmatpush.bf16.msrb.mxu0 %v4789_v20  ;;  %v7052_v53 = vld [vmem:[%s11189_s2 + $0x3c4] sm:$0xf]  ;;  %v5226_v54 = vld [vmem:[%s11189_s2 + $0x3d4] sm:$0xf0]  ;;  %v5526_v56 = vld [vmem:[%s11189_s2 + $0x62c] sm:$0xf0]  ;;  %v5069_v63 = vor.u32 %v7012_v50, %v5066_v52 }
  0x79   :  { %3338 = vmatpush.bf16.msrb.mxu1 %v4949_v21  ;;  %v7167_v57 = vld [vmem:[%s11189_s2 + $0x75c] sm:$0xf]  ;;  %v5686_v59 = vld [vmem:[%s11189_s2 + $0x76c] sm:$0xf0]  ;;  %v5229_v2 = vor.u32 %v7052_v53, %v5226_v54  ;;  %v5529_v3 = vor.u32 %v7127_v55, %v5526_v56  ;;  %v7122_v6 = vld [vmem:[%s11189_s2 + $0x5f4] sm:$0xf] }
  0x7a   :  { %3351 = vmatpush.bf16.msrb.mxu2 %v5109_v24  ;;  %v7207_v60 = vld [vmem:[%s11189_s2 + $0x89c] sm:$0xf]  ;;  %v5846_v61 = vld [vmem:[%s11189_s2 + $0x8ac] sm:$0xf0]  ;;  %v5689_v4 = vor.u32 %v7167_v57, %v5686_v59  ;;  %v5506_v7 = vld [vmem:[%s11189_s2 + $0x604] sm:$0xf0] }
  0x7b   :  { %3364 = vmatpush.bf16.msrb.mxu3 %v5269_v29  ;;  %v7247_v0 = vld [vmem:[%s11189_s2 + $0x9dc] sm:$0xf]  ;;  %v6006_v1 = vld [vmem:[%s11189_s2 + $0x9ec] sm:$0xf0]  ;;  %v5849_v5 = vor.u32 %v7207_v60, %v5846_v61  ;;  %v7162_v8 = vld [vmem:[%s11189_s2 + $0x734] sm:$0xf]  ;;  %v5509_v15 = vor.u32 %v7122_v6, %v5506_v7 }
  0x7c   :  { %3326 = vmatpush.bf16.msrb.mxu0 %v4769_v40  ;;  %v6009_v9 = vor.u32 %v7247_v0, %v6006_v1  ;;  %v5666_v10 = vld [vmem:[%s11189_s2 + $0x744] sm:$0xf0]  ;;  %v7202_v11 = vld [vmem:[%s11189_s2 + $0x874] sm:$0xf]  ;;  %v7117_v19 = vld [vmem:[%s11189_s2 + $0x5cc] sm:$0xf] }
  0x7d   :  { %3339 = vmatpush.bf16.msrb.mxu1 %v4929_v46  ;;  %v5826_v12 = vld [vmem:[%s11189_s2 + $0x884] sm:$0xf0]  ;;  %v7242_v13 = vld [vmem:[%s11189_s2 + $0x9b4] sm:$0xf]  ;;  %v5669_v16 = vor.u32 %v7162_v8, %v5666_v10  ;;  %v5486_v20 = vld [vmem:[%s11189_s2 + $0x5dc] sm:$0xf0] }
  0x7e   :  { %3352 = vmatpush.bf16.msrb.mxu2 %v5089_v47  ;;  %v5986_v14 = vld [vmem:[%s11189_s2 + $0x9c4] sm:$0xf0]  ;;  %v5829_v17 = vor.u32 %v7202_v11, %v5826_v12  ;;  %v7157_v21 = vld [vmem:[%s11189_s2 + $0x70c] sm:$0xf]  ;;  %v5646_v25 = vld [vmem:[%s11189_s2 + $0x71c] sm:$0xf0]  ;;  %v5489_v31 = vor.u32 %v7117_v19, %v5486_v20 }
  0x7f   :  { %3365 = vmatpush.bf16.msrb.mxu3 %v5249_v51  ;;  %v5989_v24 = vor.u32 %v7242_v13, %v5986_v14  ;;  %v7197_v27 = vld [vmem:[%s11189_s2 + $0x84c] sm:$0xf]  ;;  %v5806_v28 = vld [vmem:[%s11189_s2 + $0x85c] sm:$0xf0]  ;;  %v5649_v32 = vor.u32 %v7157_v21, %v5646_v25  ;;  %v7112_v37 = vld [vmem:[%s11189_s2 + $0x5a4] sm:$0xf] }
  0x80   :  { %3327 = vmatpush.bf16.msrb.mxu0 %v4749_v58  ;;  %v7237_v29 = vld [vmem:[%s11189_s2 + $0x98c] sm:$0xf]  ;;  %v5966_v30 = vld [vmem:[%s11189_s2 + $0x99c] sm:$0xf0]  ;;  %v5809_v34 = vor.u32 %v7197_v27, %v5806_v28  ;;  %v5466_v40 = vld [vmem:[%s11189_s2 + $0x5b4] sm:$0xf0] }
  0x81   :  { %3340 = vmatpush.bf16.msrb.mxu1 %v4909_v62  ;;  %v7152_v44 = vld [vmem:[%s11189_s2 + $0x6e4] sm:$0xf]  ;;  %v5969_v45 = vor.u32 %v7237_v29, %v5966_v30  ;;  %v5626_v46 = vld [vmem:[%s11189_s2 + $0x6f4] sm:$0xf0]  ;;  %v5469_v51 = vor.u32 %v7112_v37, %v5466_v40  ;;  %v7107_v54 = vld [vmem:[%s11189_s2 + $0x57c] sm:$0xf] }
  0x82   :  { %3353 = vmatpush.bf16.msrb.mxu2 %v5069_v63  ;;  %v7192_v47 = vld [vmem:[%s11189_s2 + $0x824] sm:$0xf]  ;;  %v5786_v48 = vld [vmem:[%s11189_s2 + $0x834] sm:$0xf0]  ;;  %v5629_v52 = vor.u32 %v7152_v44, %v5626_v46  ;;  %v5446_v55 = vld [vmem:[%s11189_s2 + $0x58c] sm:$0xf0] }
  0x83   :  { %3366 = vmatpush.bf16.msrb.mxu3 %v5229_v2  ;;  %3328 = vmatmul.bf16.vlgmr.msrb.gmra.mxu0 %v7907_v36  ;;  %v7232_v49 = vld [vmem:[%s11189_s2 + $0x964] sm:$0xf]  ;;  %v5946_v50 = vld [vmem:[%s11189_s2 + $0x974] sm:$0xf0]  ;;  %v5789_v53 = vor.u32 %v7192_v47, %v5786_v48  ;;  %v7147_v56 = vld [vmem:[%s11189_s2 + $0x6bc] sm:$0xf]  ;;  %v5449_v63 = vor.u32 %v7107_v54, %v5446_v55 }
  0x84   :  { %3372 = vmatpush.bf16.msra.mxu0 %v5529_v3  ;;  %3341 = vmatmul.bf16.vlgmr.msrb.gmra.mxu1 %v7917_v43  ;;  %v5949_v57 = vor.u32 %v7232_v49, %v5946_v50  ;;  %v5606_v58 = vld [vmem:[%s11189_s2 + $0x6cc] sm:$0xf0]  ;;  %v7187_v59 = vld [vmem:[%s11189_s2 + $0x7fc] sm:$0xf]  ;;  %v7102_v2 = vld [vmem:[%s11189_s2 + $0x554] sm:$0xf] }
  0x85   :  { %3385 = vmatpush.bf16.msra.mxu1 %v5689_v4  ;;  %3354 = vmatmul.bf16.vlgmr.msrb.gmra.mxu2 %v7905_v35  ;;  %v5766_v60 = vld [vmem:[%s11189_s2 + $0x80c] sm:$0xf0]  ;;  %v7227_v61 = vld [vmem:[%s11189_s2 + $0x93c] sm:$0xf]  ;;  %v5609_v0 = vor.u32 %v7147_v56, %v5606_v58  ;;  %v5426_v3 = vld [vmem:[%s11189_s2 + $0x564] sm:$0xf0] }
  0x86   :  { %3398 = vmatpush.bf16.msra.mxu2 %v5849_v5  ;;  %3367 = vmatmul.bf16.vlgmr.msrb.gmra.mxu3 %v7915_v42  ;;  %v5926_v62 = vld [vmem:[%s11189_s2 + $0x94c] sm:$0xf0]  ;;  %v5769_v1 = vor.u32 %v7187_v59, %v5766_v60  ;;  %v7142_v4 = vld [vmem:[%s11189_s2 + $0x694] sm:$0xf]  ;;  %v5586_v6 = vld [vmem:[%s11189_s2 + $0x6a4] sm:$0xf0]  ;;  %v5429_v11 = vor.u32 %v7102_v2, %v5426_v3 }
  0x87   :  { %3411 = vmatpush.bf16.msra.mxu3 %v6009_v9  ;;  %v5929_v5 = vor.u32 %v7227_v61, %v5926_v62  ;;  %v7182_v7 = vld [vmem:[%s11189_s2 + $0x7d4] sm:$0xf]  ;;  %v5746_v8 = vld [vmem:[%s11189_s2 + $0x7e4] sm:$0xf0]  ;;  %v5589_v12 = vor.u32 %v7142_v4, %v5586_v6  ;;  %v7097_v14 = vld [vmem:[%s11189_s2 + $0x52c] sm:$0xf] }
  0x88   :  { %3373 = vmatpush.bf16.msra.mxu0 %v5509_v15  ;;  %v7222_v9 = vld [vmem:[%s11189_s2 + $0x914] sm:$0xf]  ;;  %v5906_v10 = vld [vmem:[%s11189_s2 + $0x924] sm:$0xf0]  ;;  %v5749_v13 = vor.u32 %v7182_v7, %v5746_v8  ;;  %v5406_v15 = vld [vmem:[%s11189_s2 + $0x53c] sm:$0xf0] }
  0x89   :  { %3386 = vmatpush.bf16.msra.mxu1 %v5669_v16  ;;  %v7137_v16 = vld [vmem:[%s11189_s2 + $0x66c] sm:$0xf]  ;;  %v5566_v19 = vld [vmem:[%s11189_s2 + $0x67c] sm:$0xf0]  ;;  %v5409_v27 = vor.u32 %v7097_v14, %v5406_v15  ;;  %v7092_v28 = vld [vmem:[%s11189_s2 + $0x504] sm:$0xf] }
  0x8a   :  { %3399 = vmatpush.bf16.msra.mxu2 %v5829_v17  ;;  %v5909_v17 = vor.u32 %v7222_v9, %v5906_v10  ;;  %v7177_v20 = vld [vmem:[%s11189_s2 + $0x7ac] sm:$0xf]  ;;  %v5726_v21 = vld [vmem:[%s11189_s2 + $0x7bc] sm:$0xf0]  ;;  %v5386_v29 = vld [vmem:[%s11189_s2 + $0x514] sm:$0xf0]  ;;  %v5569_v30 = vor.u32 %v7137_v16, %v5566_v19 }
  0x8b   :  { %3412 = vmatpush.bf16.msra.mxu3 %v5989_v24  ;;  %v7217_v24 = vld [vmem:[%s11189_s2 + $0x8ec] sm:$0xf]  ;;  %v5886_v25 = vld [vmem:[%s11189_s2 + $0x8fc] sm:$0xf0]  ;;  %v7172_v37 = vld [vmem:[%s11189_s2 + $0x784] sm:$0xf]  ;;  %v5389_v50 = vor.u32 %v7092_v28, %v5386_v29 }
  0x8c   :  { %3374 = vmatpush.bf16.msra.mxu0 %v5489_v31  ;;  %v5729_v31 = vor.u32 %v7177_v20, %v5726_v21  ;;  %v5889_v40 = vor.u32 %v7217_v24, %v5886_v25  ;;  %v5706_v44 = vld [vmem:[%s11189_s2 + $0x794] sm:$0xf0]  ;;  %v7287_v47 = vld [vmem:[%s11189_s2 + $0xb1c] sm:$0xf]  ;;  %v6166_v48 = vld [vmem:[%s11189_s2 + $0xb2c] sm:$0xf0] }
  0x8d   :  { %3387 = vmatpush.bf16.msra.mxu1 %v5649_v32  ;;  %v7132_v32 = vld [vmem:[%s11189_s2 + $0x644] sm:$0xf]  ;;  %v5866_v46 = vld [vmem:[%s11189_s2 + $0x8d4] sm:$0xf0]  ;;  %v7327_v49 = vld [vmem:[%s11189_s2 + $0xc5c] sm:$0xf]  ;;  %v5709_v55 = vor.u32 %v7172_v37, %v5706_v44  ;;  %v6169_v59 = vor.u32 %v7287_v47, %v6166_v48 }
  0x8e   :  { %3400 = vmatpush.bf16.msra.mxu2 %v5809_v34  ;;  %v5546_v34 = vld [vmem:[%s11189_s2 + $0x654] sm:$0xf0]  ;;  %v7407_v56 = vld [vmem:[%s11189_s2 + $0xedc] sm:$0xf]  ;;  %v7282_v62 = vld [vmem:[%s11189_s2 + $0xaf4] sm:$0xf] }
  0x8f   :  { %3413 = vmatpush.bf16.msra.mxu3 %v5969_v45  ;;  %v7212_v45 = vld [vmem:[%s11189_s2 + $0x8c4] sm:$0xf]  ;;  %v5549_v54 = vor.u32 %v7132_v32, %v5546_v34  ;;  %v6306_v2 = vld [vmem:[%s11189_s2 + $0xc44] sm:$0xf0]  ;;  %v7362_v3 = vld [vmem:[%s11189_s2 + $0xd74] sm:$0xf] }
  0x90   :  { %3375 = vmatpush.bf16.msra.mxu0 %v5469_v51  ;;  %v6326_v51 = vld [vmem:[%s11189_s2 + $0xc6c] sm:$0xf0]  ;;  %v5869_v58 = vor.u32 %v7212_v45, %v5866_v46  ;;  %v6466_v4 = vld [vmem:[%s11189_s2 + $0xd84] sm:$0xf0]  ;;  %v7277_v10 = vld [vmem:[%s11189_s2 + $0xacc] sm:$0xf] }
  0x91   :  { %3388 = vmatpush.bf16.msra.mxu1 %v5629_v52  ;;  %v7367_v52 = vld [vmem:[%s11189_s2 + $0xd9c] sm:$0xf]  ;;  %v6329_v60 = vor.u32 %v7327_v49, %v6326_v51  ;;  %v6626_v6 = vld [vmem:[%s11189_s2 + $0xec4] sm:$0xf0]  ;;  %v6469_v9 = vor.u32 %v7362_v3, %v6466_v4  ;;  %v6286_v14 = vld [vmem:[%s11189_s2 + $0xc1c] sm:$0xf0] }
  0x92   :  { %3401 = vmatpush.bf16.msra.mxu2 %v5789_v53  ;;  %v6486_v53 = vld [vmem:[%s11189_s2 + $0xdac] sm:$0xf0]  ;;  %v7357_v15 = vld [vmem:[%s11189_s2 + $0xd4c] sm:$0xf]  ;;  %v6446_v16 = vld [vmem:[%s11189_s2 + $0xd5c] sm:$0xf0] }
  0x93   :  { %3414 = vmatpush.bf16.msra.mxu3 %v5949_v57  ;;  %v6646_v57 = vld [vmem:[%s11189_s2 + $0xeec] sm:$0xf0]  ;;  %v6489_v61 = vor.u32 %v7367_v52, %v6486_v53  ;;  %v6606_v19 = vld [vmem:[%s11189_s2 + $0xe9c] sm:$0xf0]  ;;  %v6449_v24 = vor.u32 %v7357_v15, %v6446_v16  ;;  %v7272_v25 = vld [vmem:[%s11189_s2 + $0xaa4] sm:$0xf] }
  0x94   :  { %3376 = vmatpush.bf16.msra.mxu0 %v5449_v63  ;;  %v6146_v63 = vld [vmem:[%s11189_s2 + $0xb04] sm:$0xf0]  ;;  %v7312_v28 = vld [vmem:[%s11189_s2 + $0xbe4] sm:$0xf]  ;;  %v6426_v32 = vld [vmem:[%s11189_s2 + $0xd34] sm:$0xf0] }
  0x95   :  { %3389 = vmatpush.bf16.msra.mxu1 %v5609_v0  ;;  %v7322_v0 = vld [vmem:[%s11189_s2 + $0xc34] sm:$0xf]  ;;  %v6149_v7 = vor.u32 %v7282_v62, %v6146_v63  ;;  %v7392_v34 = vld [vmem:[%s11189_s2 + $0xe64] sm:$0xf]  ;;  %v6586_v37 = vld [vmem:[%s11189_s2 + $0xe74] sm:$0xf0] }
  0x96   :  { %3402 = vmatpush.bf16.msra.mxu2 %v5769_v1  ;;  %v6649_v1 = vor.u32 %v7407_v56, %v6646_v57  ;;  %v6309_v8 = vor.u32 %v7322_v0, %v6306_v2  ;;  %v7267_v46 = vld [vmem:[%s11189_s2 + $0xa7c] sm:$0xf]  ;;  %v6086_v47 = vld [vmem:[%s11189_s2 + $0xa8c] sm:$0xf0]  ;;  %v6589_v49 = vor.u32 %v7392_v34, %v6586_v37  ;;  %v7262_v56 = vld [vmem:[%s11189_s2 + $0xa54] sm:$0xf] }
  0x97   :  { %3415 = vmatpush.bf16.msra.mxu3 %v5929_v5  ;;  %v7402_v5 = vld [vmem:[%s11189_s2 + $0xeb4] sm:$0xf]  ;;  %v7307_v48 = vld [vmem:[%s11189_s2 + $0xbbc] sm:$0xf]  ;;  %v6406_v52 = vld [vmem:[%s11189_s2 + $0xd0c] sm:$0xf0] }
  0x98   :  { %3377 = vmatpush.bf16.msra.mxu0 %v5429_v11  ;;  %v6126_v11 = vld [vmem:[%s11189_s2 + $0xadc] sm:$0xf0]  ;;  %v7347_v51 = vld [vmem:[%s11189_s2 + $0xcfc] sm:$0xf]  ;;  %v7342_v63 = vld [vmem:[%s11189_s2 + $0xcd4] sm:$0xf] }
  0x99   :  { %3390 = vmatpush.bf16.msra.mxu1 %v5589_v12  ;;  %v7317_v12 = vld [vmem:[%s11189_s2 + $0xc0c] sm:$0xf]  ;;  %v6129_v20 = vor.u32 %v7277_v10, %v6126_v11  ;;  %v7387_v53 = vld [vmem:[%s11189_s2 + $0xe3c] sm:$0xf]  ;;  %v6386_v0 = vld [vmem:[%s11189_s2 + $0xce4] sm:$0xf0] }
  0x9a   :  { %3403 = vmatpush.bf16.msra.mxu2 %v5749_v13  ;;  %v6629_v13 = vor.u32 %v7402_v5, %v6626_v6  ;;  %v6289_v21 = vor.u32 %v7317_v12, %v6286_v14  ;;  %v7382_v2 = vld [vmem:[%s11189_s2 + $0xe14] sm:$0xf]  ;;  %v6546_v3 = vld [vmem:[%s11189_s2 + $0xe24] sm:$0xf0]  ;;  %v7257_v5 = vld [vmem:[%s11189_s2 + $0xa2c] sm:$0xf] }
  0x9b   :  { %3416 = vmatpush.bf16.msra.mxu3 %v5909_v17  ;;  %v7397_v17 = vld [vmem:[%s11189_s2 + $0xe8c] sm:$0xf]  ;;  %v6549_v11 = vor.u32 %v7382_v2, %v6546_v3  ;;  %v6206_v12 = vld [vmem:[%s11189_s2 + $0xb7c] sm:$0xf0]  ;;  %v7372_v34 = vld [vmem:[%s11189_s2 + $0xdc4] sm:$0xf] }
  0x9c   :  { %3378 = vmatpush.bf16.msra.mxu0 %v5409_v27  ;;  %v6106_v27 = vld [vmem:[%s11189_s2 + $0xab4] sm:$0xf0]  ;;  %v6609_v29 = vor.u32 %v7397_v17, %v6606_v19  ;;  %v6366_v14 = vld [vmem:[%s11189_s2 + $0xcbc] sm:$0xf0]  ;;  %v7377_v15 = vld [vmem:[%s11189_s2 + $0xdec] sm:$0xf] }
  0x9d   :  { %3391 = vmatpush.bf16.msra.mxu1 %v5569_v30  ;;  %v6266_v30 = vld [vmem:[%s11189_s2 + $0xbf4] sm:$0xf0]  ;;  %v6526_v16 = vld [vmem:[%s11189_s2 + $0xdfc] sm:$0xf0]  ;;  %v7252_v19 = vld [vmem:[%s11189_s2 + $0xa04] sm:$0xf] }
  0x9e   :  { %3404 = vmatpush.bf16.msra.mxu2 %v5729_v31  ;;  %v7352_v31 = vld [vmem:[%s11189_s2 + $0xd24] sm:$0xf]  ;;  %v6269_v44 = vor.u32 %v7312_v28, %v6266_v30  ;;  %v6186_v28 = vld [vmem:[%s11189_s2 + $0xb54] sm:$0xf0]  ;;  %vm3944_vm0 = vcmask 1041408   ;;  %vm3952_vm1 = vcmask 91136  }
  0x9f   :  { %3417 = vmatpush.bf16.msra.mxu3 %v5889_v40  ;;  %v6109_v40 = vor.u32 %v7272_v25, %v6106_v27  ;;  %v6429_v45 = vor.u32 %v7352_v31, %v6426_v32  ;;  %v7292_v27 = vld [vmem:[%s11189_s2 + $0xb44] sm:$0xf]  ;;  %v6529_v31 = vor.u32 %v7377_v15, %v6526_v16  ;;  %v6346_v32 = vld [vmem:[%s11189_s2 + $0xc94] sm:$0xf0]  ;;  %v5012_v16 = vld [vmem:[%s11189_s2 + $0x210] sm:$0xf] }
  0xa0   :  { %3379 = vmatpush.bf16.msra.mxu0 %v5389_v50  ;;  %v6246_v50 = vld [vmem:[%s11189_s2 + $0xbcc] sm:$0xf0]  ;;  %v6506_v37 = vld [vmem:[%s11189_s2 + $0xdd4] sm:$0xf0]  ;;  %v6960_v15 = vld [vmem:[%s11189_s2 + $0xe0] sm:$0xf0] }
  0xa1   :  { %3392 = vmatpush.bf16.msra.mxu1 %v5549_v54  ;;  %v6566_v54 = vld [vmem:[%s11189_s2 + $0xe4c] sm:$0xf0]  ;;  %v6249_v57 = vor.u32 %v7307_v48, %v6246_v50  ;;  %v7010_v48 = vld [vmem:[%s11189_s2 + $0x270] sm:$0xf0]  ;;  %vm4412_vm3 = vcmask 1045504   ;;  %vm4408_vm7 = vcmask 97280  }
  0xa2   :  { %3405 = vmatpush.bf16.msra.mxu2 %v5709_v55  ;;  %v6089_v55 = vor.u32 %v7267_v46, %v6086_v47  ;;  %v6569_v62 = vor.u32 %v7387_v53, %v6566_v54  ;;  %v7050_v50 = vld [vmem:[%s11189_s2 + $0x3b0] sm:$0xf0]  ;;  %v5372_v54 = vld [vmem:[%s11189_s2 + $0x4e0] sm:$0xf]  ;;  %vm4550_vm8 = vcmask 992256   ;;  %vm4624_vm10 = vcmask 1044480  }
  0xa3   :  { %3418 = vmatpush.bf16.msra.mxu3 %v5869_v58  ;;  %3380 = vmatmul.bf16.vlgmr.msra.gmra.mxu0 %v8030_v38  ;;  %v6409_v58 = vor.u32 %v7347_v51, %v6406_v52  ;;  %v6189_v52 = vor.u32 %v7292_v27, %v6186_v28  ;;  %v7080_v27 = vld [vmem:[%s11189_s2 + $0x4a0] sm:$0xf0]  ;;  %vm4620_vm11 = vcmask 39936   ;;  %vm4648_vm15 = vcmask 998400   ;;  %s4733_s10 = sshll.u32 %s11196_s9, 4  ;;  %s4734_s10 = int_to_ptr.hbm [resolvable:$true] %s4733_s10 }
  0xa4   :  { %3424 = vmatpush.bf16.msrb.mxu0 %v6169_v59  ;;  %3393 = vmatmul.bf16.vlgmr.msra.gmra.mxu1 %v8034_v41  ;;  %v6066_v59 = vld [vmem:[%s11189_s2 + $0xa64] sm:$0xf0] }
  0xa5   :  { %3437 = vmatpush.bf16.msrb.mxu1 %v6329_v60  ;;  %3406 = vmatmul.bf16.vlgmr.msra.gmra.mxu2 %v8022_v33  ;;  %v7302_v60 = vld [vmem:[%s11189_s2 + $0xb94] sm:$0xf]  ;;  %v6069_v4 = vor.u32 %v7262_v56, %v6066_v59  ;;  %v6509_v56 = vor.u32 %v7372_v34, %v6506_v37  ;;  %v6955_v34 = vld [vmem:[%s11189_s2 + $0xb8] sm:$0xf0]  ;;  %v4992_v37 = vld [vmem:[%s11189_s2 + $0x1e8] sm:$0xf] }
  0xa6   :  { %3450 = vmatpush.bf16.msrb.mxu2 %v6489_v61  ;;  %3419 = vmatmul.bf16.vlgmr.msra.gmra.mxu3 %v8032_v39  ;;  %v6226_v61 = vld [vmem:[%s11189_s2 + $0xba4] sm:$0xf0] }
  0xa7   :  { %3463 = vmatpush.bf16.msrb.mxu3 %v6649_v1  ;;  %v8729_v1 = vld [vmem:[%s11190_s3] sm:$0x1f]  ;;  %v6229_v6 = vor.u32 %v7302_v60, %v6226_v61  ;;  %v4872_v61 = vld [vmem:[%s11189_s2 + $0xf8] sm:$0xf] }
  0xa8   :  { %3425 = vmatpush.bf16.msrb.mxu0 %v6149_v7  ;;  %v6389_v7 = vor.u32 %v7342_v63, %v6386_v0  ;;  %v658_v10 = vperm.slane %v8729_v1, 0  ;;  %v5032_v63 = vld [vmem:[%s11189_s2 + $0x238] sm:$0xf] }
  0xa9   :  { %3438 = vmatpush.bf16.msrb.mxu1 %v6309_v8  ;;  %v6046_v8 = vld [vmem:[%s11189_s2 + $0xa3c] sm:$0xf0]  ;;  %v3186_v46 = vpop.f32.mrf.mxu1 }
  0xaa   :  { %3451 = vmatpush.bf16.msrb.mxu2 %v6469_v9  ;;  %v7297_v9 = vld [vmem:[%s11189_s2 + $0xb6c] sm:$0xf]  ;;  %v6049_v17 = vor.u32 %v7257_v5, %v6046_v8  ;;  %v5192_v5 = vld [vmem:[%s11189_s2 + $0x378] sm:$0xf] }
  0xab   :  { %3464 = vmatpush.bf16.msrb.mxu3 %v6629_v13  ;;  %v7337_v13 = vld [vmem:[%s11189_s2 + $0xcac] sm:$0xf]  ;;  %v5352_v8 = vld [vmem:[%s11189_s2 + $0x4b8] sm:$0xf] }
  0xac   :  { %3426 = vmatpush.bf16.msrb.mxu0 %v6129_v20  ;;  %v6026_v20 = vld [vmem:[%s11189_s2 + $0xa14] sm:$0xf0]  ;;  %v6369_v25 = vor.u32 %v7337_v13, %v6366_v14  ;;  %v4852_v14 = vld [vmem:[%s11189_s2 + $0xd0] sm:$0xf] }
  0xad   :  { %3439 = vmatpush.bf16.msrb.mxu1 %v6289_v21  ;;  %v3173_v21 = vpop.f32.mrf.mxu0  ;;  %v6029_v47 = vor.u32 %v7252_v19, %v6026_v20  ;;  %v3212_v2 = vpop.f32.mrf.mxu3  ;;  %v7000_v20 = vld [vmem:[%s11189_s2 + $0x220] sm:$0xf0]  ;;  %v4853_v28 = vor.u32 %v6960_v15, %v4852_v14 }
  0xae   :  { %3452 = vmatpush.bf16.msrb.mxu2 %v6449_v24  ;;  %v6209_v24 = vor.u32 %v7297_v9, %v6206_v12  ;;  %v3174_v30 = vadd.f32 %v3173_v21, %v658_v10  ;;  %v7085_v9 = vld [vmem:[%s11189_s2 + $0x4c8] sm:$0xf0]  ;;  %v5172_v21 = vld [vmem:[%s11189_s2 + $0x350] sm:$0xf] }
  0xaf   :  { %3465 = vmatpush.bf16.msrb.mxu3 %v6609_v29  ;;  %v7332_v29 = vld [vmem:[%s11189_s2 + $0xc84] sm:$0xf]  ;;  %v5353_v19 = vor.u32 %v7085_v9, %v5352_v8  ;;  %v4952_v8 = vld [vmem:[%s11189_s2 + $0x198] sm:$0xf] }
  0xb0   :  { %3427 = vmatpush.bf16.msrb.mxu0 %v6109_v40  ;;  %v4892_v40 = vld [vmem:[%s11189_s2 + $0x120] sm:$0xf]  ;;  %v3187_v51 = vadd.f32 %v3186_v46, %v3174_v30  ;;  %v6349_v53 = vor.u32 %v7332_v29, %v6346_v32  ;;  %v5013_v30 = vor.u32 %v7000_v20, %v5012_v16  ;;  %v4832_v32 = vld [vmem:[%s11189_s2 + $0xa8] sm:$0xf]  ;;  %v5272_v16 = vld [vmem:[%s11189_s2 + $0x418] sm:$0xf] }
  0xb1   :  { %3440 = vmatpush.bf16.msrb.mxu1 %v6269_v44  ;;  %v6970_v44 = vld [vmem:[%s11189_s2 + $0x130] sm:$0xf0]  ;;  %v5152_v46 = vld [vmem:[%s11189_s2 + $0x328] sm:$0xf] }
  0xb2   :  { %3453 = vmatpush.bf16.msrb.mxu2 %v6429_v45  ;;  %v5052_v45 = vld [vmem:[%s11189_s2 + $0x260] sm:$0xf] }
  0xb3   :  { %3466 = vmatpush.bf16.msrb.mxu3 %v6589_v49  ;;  %v5212_v49 = vld [vmem:[%s11189_s2 + $0x3a0] sm:$0xf]  ;;  %v5053_v59 = vor.u32 %v7010_v48, %v5052_v45  ;;  %v6995_v45 = vld [vmem:[%s11189_s2 + $0x1f8] sm:$0xf0]  ;;  %v5312_v48 = vld [vmem:[%s11189_s2 + $0x468] sm:$0xf] }
  0xb4   :  { %3428 = vmatpush.bf16.msrb.mxu0 %v6089_v55  ;;  %v7090_v55 = vld [vmem:[%s11189_s2 + $0x4f0] sm:$0xf0]  ;;  %v5213_v60 = vor.u32 %v7050_v50, %v5212_v49  ;;  %v7075_v49 = vld [vmem:[%s11189_s2 + $0x478] sm:$0xf0]  ;;  %v4833_v50 = vor.u32 %v6955_v34, %v4832_v32  ;;  %v6980_v32 = vld [vmem:[%s11189_s2 + $0x180] sm:$0xf0] }
  0xb5   :  { %3441 = vmatpush.bf16.msrb.mxu1 %v6249_v57  ;;  %v4893_v57 = vor.u32 %v6970_v44, %v4892_v40  ;;  %v5373_v3 = vor.u32 %v7090_v55, %v5372_v54  ;;  %v3214_v40 = vpop.f32.mrf.mxu3  ;;  %v4812_v54 = vld [vmem:[%s11189_s2 + $0x80] sm:$0xf]  ;;  %v6950_v55 = vld [vmem:[%s11189_s2 + $0x90] sm:$0xf0]  ;;  %v5092_v34 = vld [vmem:[%s11189_s2 + $0x2b0] sm:$0xf] }
  0xb6   :  { %3454 = vmatpush.bf16.msrb.mxu2 %v6409_v58  ;;  %v3199_v58 = vpop.f32.mrf.mxu2  ;;  %v5252_v40 = vld [vmem:[%s11189_s2 + $0x3f0] sm:$0xf] }
  0xb7   :  { %3467 = vmatpush.bf16.msrb.mxu3 %v6569_v62  ;;  %v6965_v62 = vld [vmem:[%s11189_s2 + $0x108] sm:$0xf0]  ;;  %v3200_v0 = vadd.f32 %v3199_v58, %v3187_v51 }
  0xb8   :  { %3429 = vmatpush.bf16.msrb.mxu0 %v6069_v4  ;;  %v7005_v4 = vld [vmem:[%s11189_s2 + $0x248] sm:$0xf0] }
  0xb9   :  { %3442 = vmatpush.bf16.msrb.mxu1 %v6229_v6  ;;  %v7045_v6 = vld [vmem:[%s11189_s2 + $0x388] sm:$0xf0]  ;;  %v3213_v10 = vadd.f32 %v3212_v2, %v3200_v0  ;;  %v5033_v12 = vor.u32 %v7005_v4, %v5032_v63  ;;  %v5292_v63 = vld [vmem:[%s11189_s2 + $0x440] sm:$0xf]  ;;  %v7070_v0 = vld [vmem:[%s11189_s2 + $0x450] sm:$0xf0] }
  0xba   :  { %3455 = vmatpush.bf16.msrb.mxu2 %v6389_v7  ;;  %v3175_v7 = vpop.f32.mrf.mxu0  ;;  %v5193_v13 = vor.u32 %v7045_v6, %v5192_v5  ;;  %v4792_v6 = vld [vmem:[%s11189_s2 + $0x58] sm:$0xf] }
  0xbb   :  { %3468 = vmatpush.bf16.msrb.mxu3 %v6549_v11  ;;  %v4873_v11 = vor.u32 %v6965_v62, %v4872_v61  ;;  %v5132_v61 = vld [vmem:[%s11189_s2 + $0x300] sm:$0xf]  ;;  %v7030_v62 = vld [vmem:[%s11189_s2 + $0x310] sm:$0xf0]  ;;  %v6945_v7 = vld [vmem:[%s11189_s2 + $0x68] sm:$0xf0] }
  0xbc   :  { %3430 = vmatpush.bf16.msrb.mxu0 %v6049_v17  ;;  %v3188_v17 = vpop.f32.mrf.mxu1  ;;  %v5133_v5 = vor.u32 %v7030_v62, %v5132_v61  ;;  %v5692_v61 = vld [vmem:[%s11189_s2 + $0x760] sm:$0xf] }
  0xbd   :  { %3443 = vmatpush.bf16.msrb.mxu1 %v6209_v24  ;;  %v7040_v24 = vld [vmem:[%s11189_s2 + $0x360] sm:$0xf0]  ;;  %v7065_v17 = vld [vmem:[%s11189_s2 + $0x428] sm:$0xf0] }
  0xbe   :  { %3456 = vmatpush.bf16.msrb.mxu2 %v6369_v25  ;;  %v5332_v25 = vld [vmem:[%s11189_s2 + $0x490] sm:$0xf]  ;;  %v3201_v29 = vpop.f32.mrf.mxu2 }
  0xbf   :  { %3469 = vmatpush.bf16.msrb.mxu3 %v6529_v31  ;;  %v5173_v31 = vor.u32 %v7040_v24, %v5172_v21  ;;  %v5333_v44 = vor.u32 %v7080_v27, %v5332_v25  ;;  %v4772_v27 = vld [vmem:[%s11189_s2 + $0x30] sm:$0xf] }
  0xc0   :  { %3431 = vmatpush.bf16.msrb.mxu0 %v6029_v47  ;;  %v7035_v47 = vld [vmem:[%s11189_s2 + $0x338] sm:$0xf0]  ;;  %v4932_v29 = vld [vmem:[%s11189_s2 + $0x170] sm:$0xf] }
  0xc1   :  { %3444 = vmatpush.bf16.msrb.mxu1 %v6189_v52  ;;  %v4993_v52 = vor.u32 %v6995_v45, %v4992_v37  ;;  %v7020_v37 = vld [vmem:[%s11189_s2 + $0x2c0] sm:$0xf0] }
  0xc2   :  { %3457 = vmatpush.bf16.msrb.mxu2 %v6349_v53  ;;  %v3225_v51 = vpop.f32.mrf.mxu0  ;;  %v5153_v53 = vor.u32 %v7035_v47, %v5152_v46  ;;  %v4752_v46 = vld [vmem:[%s11189_s2 + $0x8] sm:$0xf]  ;;  %v6935_v47 = vld [vmem:[%s11189_s2 + $0x18] sm:$0xf0] }
  0xc3   :  { %3470 = vmatpush.bf16.msrb.mxu3 %v6509_v56  ;;  %3432 = vmatmul.bf16.vlgmr.msrb.gmra.mxu0 %v8217_v18  ;;  %v4972_v56 = vld [vmem:[%s11189_s2 + $0x1c0] sm:$0xf]  ;;  %v4753_v62 = vor.u32 %v6935_v47, %v4752_v46 }
  0xc4   :  { %3476 = vmatpush.bf16.msra.mxu0 %v4893_v57  ;;  %3445 = vmatmul.bf16.vlgmr.msrb.gmra.mxu1 %v8230_v23  ;;  %v3226_v57 = vadd.f32 %v3225_v51, %v3213_v10  ;;  %v3238_v58 = vpop.f32.mrf.mxu1  ;;  %v5293_v10 = vor.u32 %v7070_v0, %v5292_v63  ;;  %v6975_v51 = vld [vmem:[%s11189_s2 + $0x158] sm:$0xf0]  ;;  %v7170_v63 = vld [vmem:[%s11189_s2 + $0x770] sm:$0xf0]  ;;  %v5852_v0 = vld [vmem:[%s11189_s2 + $0x8a0] sm:$0xf] }
  0xc5   :  { %3489 = vmatpush.bf16.msra.mxu1 %v5053_v59  ;;  %3458 = vmatmul.bf16.vlgmr.msrb.gmra.mxu2 %v8228_v22  ;;  %v5313_v59 = vor.u32 %v7075_v49, %v5312_v48  ;;  %v4933_v48 = vor.u32 %v6980_v32, %v4932_v29  ;;  %v5093_v49 = vor.u32 %v7020_v37, %v5092_v34  ;;  %v7120_v29 = vld [vmem:[%s11189_s2 + $0x5e0] sm:$0xf0]  ;;  %v5812_v34 = vld [vmem:[%s11189_s2 + $0x850] sm:$0xf] }
  0xc6   :  { %3502 = vmatpush.bf16.msra.mxu2 %v5213_v60  ;;  %3471 = vmatmul.bf16.vlgmr.msrb.gmra.mxu3 %v8238_v26  ;;  %v6990_v60 = vld [vmem:[%s11189_s2 + $0x1d0] sm:$0xf0]  ;;  %v3239_v2 = vadd.f32 %v3238_v58, %v3226_v57  ;;  %v7055_v57 = vld [vmem:[%s11189_s2 + $0x3d8] sm:$0xf0]  ;;  %v7160_v32 = vld [vmem:[%s11189_s2 + $0x720] sm:$0xf0] }
  0xc7   :  { %3515 = vmatpush.bf16.msra.mxu3 %v5373_v3  ;;  %v4813_v3 = vor.u32 %v6950_v55, %v4812_v54  ;;  %v4973_v4 = vor.u32 %v6990_v60, %v4972_v56  ;;  %v7015_v55 = vld [vmem:[%s11189_s2 + $0x298] sm:$0xf0]  ;;  %v5232_v56 = vld [vmem:[%s11189_s2 + $0x3c8] sm:$0xf]  ;;  %v7130_v60 = vld [vmem:[%s11189_s2 + $0x630] sm:$0xf0] }
  0xc8   :  { %3477 = vmatpush.bf16.msra.mxu0 %v4873_v11  ;;  %v3251_v9 = vpop.f32.mrf.mxu2  ;;  %v6985_v11 = vld [vmem:[%s11189_s2 + $0x1a8] sm:$0xf0]  ;;  %v7200_v37 = vld [vmem:[%s11189_s2 + $0x860] sm:$0xf0] }
  0xc9   :  { %3490 = vmatpush.bf16.msra.mxu1 %v5033_v12  ;;  %v5112_v12 = vld [vmem:[%s11189_s2 + $0x2d8] sm:$0xf]  ;;  %v3252_v14 = vadd.f32 %v3251_v9, %v3239_v2  ;;  %v3264_v15 = vpop.f32.mrf.mxu3  ;;  %v4953_v24 = vor.u32 %v6985_v11, %v4952_v8  ;;  %v7210_v2 = vld [vmem:[%s11189_s2 + $0x8b0] sm:$0xf0]  ;;  %v5693_v9 = vor.u32 %v7170_v63, %v5692_v61  ;;  %v5813_v47 = vor.u32 %v7200_v37, %v5812_v34  ;;  %v5452_v63 = vld [vmem:[%s11189_s2 + $0x580] sm:$0xf] }
  0xca   :  { %3503 = vmatpush.bf16.msra.mxu2 %v5193_v13  ;;  %v7025_v13 = vld [vmem:[%s11189_s2 + $0x2e8] sm:$0xf0]  ;;  %v3227_v21 = vpop.f32.mrf.mxu0  ;;  %v5512_v11 = vld [vmem:[%s11189_s2 + $0x5f8] sm:$0xf] }
  0xcb   :  { %3516 = vmatpush.bf16.msra.mxu3 %v5353_v19  ;;  %v4793_v19 = vor.u32 %v6945_v7, %v4792_v6  ;;  %v8934_v20 = vadd.f32 %v3264_v15, %v3252_v14  ;;  %v5113_v25 = vor.u32 %v7025_v13, %v5112_v12  ;;  %v7250_v6 = vld [vmem:[%s11189_s2 + $0x9f0] sm:$0xf0]  ;;  %v5233_v7 = vor.u32 %v7055_v57, %v5232_v56  ;;  %v7125_v12 = vld [vmem:[%s11189_s2 + $0x608] sm:$0xf0]  ;;  %v5672_v13 = vld [vmem:[%s11189_s2 + $0x738] sm:$0xf] }
  0xcc   :  { %3478 = vmatpush.bf16.msra.mxu0 %v4853_v28  ;;  %v6940_v28 = vld [vmem:[%s11189_s2 + $0x40] sm:$0xf0]  ;;  %v7165_v15 = vld [vmem:[%s11189_s2 + $0x748] sm:$0xf0]  ;;  %v5952_v56 = vld [vmem:[%s11189_s2 + $0x968] sm:$0xf] }
  0xcd   :  { %3491 = vmatpush.bf16.msra.mxu1 %v5013_v30  ;;  %v3240_v30 = vpop.f32.mrf.mxu1  ;;  %v4773_v45 = vor.u32 %v6940_v28, %v4772_v27  ;;  %v7245_v21 = vld [vmem:[%s11189_s2 + $0x9c8] sm:$0xf0]  ;;  %v5492_v28 = vld [vmem:[%s11189_s2 + $0x5d0] sm:$0xf]  ;;  %v7235_v57 = vld [vmem:[%s11189_s2 + $0x978] sm:$0xf0] }
  0xce   :  { %3504 = vmatpush.bf16.msra.mxu2 %v5173_v31  ;;  %v5273_v31 = vor.u32 %v7065_v17, %v5272_v16  ;;  %v5832_v16 = vld [vmem:[%s11189_s2 + $0x878] sm:$0xf]  ;;  %v7205_v17 = vld [vmem:[%s11189_s2 + $0x888] sm:$0xf0]  ;;  %v5652_v30 = vld [vmem:[%s11189_s2 + $0x710] sm:$0xf] }
  0xcf   :  { %3517 = vmatpush.bf16.msra.mxu3 %v5333_v44  ;;  %v7060_v44 = vld [vmem:[%s11189_s2 + $0x400] sm:$0xf0]  ;;  %v5833_v27 = vor.u32 %v7205_v17, %v5832_v16  ;;  %v5653_v46 = vor.u32 %v7160_v32, %v5652_v30  ;;  %v7145_v17 = vld [vmem:[%s11189_s2 + $0x6a8] sm:$0xf0] }
  0xd0   :  { %3479 = vmatpush.bf16.msra.mxu0 %v4833_v50  ;;  %v4912_v50 = vld [vmem:[%s11189_s2 + $0x148] sm:$0xf]  ;;  %v5253_v54 = vor.u32 %v7060_v44, %v5252_v40  ;;  %v5972_v40 = vld [vmem:[%s11189_s2 + $0x990] sm:$0xf]  ;;  %v7240_v44 = vld [vmem:[%s11189_s2 + $0x9a0] sm:$0xf0] }
  0xd1   :  { %3492 = vmatpush.bf16.msra.mxu1 %v4993_v52  ;;  %v5072_v52 = vld [vmem:[%s11189_s2 + $0x288] sm:$0xf]  ;;  %v3266_v58 = vpop.f32.mrf.mxu3 }
  0xd2   :  { %3505 = vmatpush.bf16.msra.mxu2 %v5153_v53  ;;  %v3253_v53 = vpop.f32.mrf.mxu2 }
  0xd3   :  { %3518 = vmatpush.bf16.msra.mxu3 %v5313_v59  ;;  %v5532_v59 = vld [vmem:[%s11189_s2 + $0x620] sm:$0xf]  ;;  %v5792_v53 = vld [vmem:[%s11189_s2 + $0x828] sm:$0xf] }
  0xd4   :  { %3480 = vmatpush.bf16.msra.mxu0 %v4813_v3  ;;  %v4913_v3 = vor.u32 %v6975_v51, %v4912_v50  ;;  %v5533_v8 = vor.u32 %v7130_v60, %v5532_v59  ;;  %v5632_v50 = vld [vmem:[%s11189_s2 + $0x6e8] sm:$0xf]  ;;  %v5973_v51 = vor.u32 %v7240_v44, %v5972_v40  ;;  %v5412_v40 = vld [vmem:[%s11189_s2 + $0x530] sm:$0xf]  ;;  %v7100_v44 = vld [vmem:[%s11189_s2 + $0x540] sm:$0xf0] }
  0xd5   :  { %3493 = vmatpush.bf16.msra.mxu1 %v4973_v4  ;;  %v5073_v4 = vor.u32 %v7015_v55, %v5072_v52  ;;  %v7155_v52 = vld [vmem:[%s11189_s2 + $0x6f8] sm:$0xf0] }
  0xd6   :  { %3506 = vmatpush.bf16.msra.mxu2 %v5133_v5  ;;  %v6012_v5 = vld [vmem:[%s11189_s2 + $0x9e0] sm:$0xf]  ;;  %v5633_v61 = vor.u32 %v7155_v52, %v5632_v50  ;;  %v5892_v50 = vld [vmem:[%s11189_s2 + $0x8f0] sm:$0xf]  ;;  %v5413_v52 = vor.u32 %v7100_v44, %v5412_v40  ;;  %v7280_v44 = vld [vmem:[%s11189_s2 + $0xae0] sm:$0xf0] }
  0xd7   :  { %3519 = vmatpush.bf16.msra.mxu3 %v5293_v10  ;;  %v5853_v10 = vor.u32 %v7210_v2, %v5852_v0  ;;  %v6013_v14 = vor.u32 %v7250_v6, %v6012_v5  ;;  %v7110_v0 = vld [vmem:[%s11189_s2 + $0x590] sm:$0xf0]  ;;  %v5612_v2 = vld [vmem:[%s11189_s2 + $0x6c0] sm:$0xf]  ;;  %v6132_v40 = vld [vmem:[%s11189_s2 + $0xad0] sm:$0xf] }
  0xd8   :  { %3481 = vmatpush.bf16.msra.mxu0 %v4793_v19  ;;  %v5992_v19 = vld [vmem:[%s11189_s2 + $0x9b8] sm:$0xf]  ;;  %v5772_v5 = vld [vmem:[%s11189_s2 + $0x800] sm:$0xf]  ;;  %v7190_v6 = vld [vmem:[%s11189_s2 + $0x810] sm:$0xf0] }
  0xd9   :  { %3494 = vmatpush.bf16.msra.mxu1 %v4953_v24  ;;  %v5513_v24 = vor.u32 %v7125_v12, %v5512_v11  ;;  %v5773_v11 = vor.u32 %v7190_v6, %v5772_v5  ;;  %v5432_v12 = vld [vmem:[%s11189_s2 + $0x558] sm:$0xf]  ;;  %v7330_v6 = vld [vmem:[%s11189_s2 + $0xc70] sm:$0xf0] }
  0xda   :  { %3507 = vmatpush.bf16.msra.mxu2 %v5113_v25  ;;  %v5673_v25 = vor.u32 %v7165_v15, %v5672_v13  ;;  %v7105_v13 = vld [vmem:[%s11189_s2 + $0x568] sm:$0xf0] }
  0xdb   :  { %3520 = vmatpush.bf16.msra.mxu3 %v5273_v31  ;;  %v5993_v31 = vor.u32 %v7245_v21, %v5992_v19  ;;  %v5752_v19 = vld [vmem:[%s11189_s2 + $0x7d8] sm:$0xf]  ;;  %v7185_v21 = vld [vmem:[%s11189_s2 + $0x7e8] sm:$0xf0]  ;;  %v5433_v30 = vor.u32 %v7105_v13, %v5432_v12  ;;  %v7410_v12 = vld [vmem:[%s11189_s2 + $0xef0] sm:$0xf0] }
  0xdc   :  { %3482 = vmatpush.bf16.msra.mxu0 %v4773_v45  ;;  %v5493_v45 = vor.u32 %v7120_v29, %v5492_v28  ;;  %v7225_v28 = vld [vmem:[%s11189_s2 + $0x928] sm:$0xf0]  ;;  %v5753_v37 = vor.u32 %v7185_v21, %v5752_v19  ;;  %v6312_v21 = vld [vmem:[%s11189_s2 + $0xc38] sm:$0xf] }
  0xdd   :  { %3495 = vmatpush.bf16.msra.mxu1 %v4933_v48  ;;  %v5472_v48 = vld [vmem:[%s11189_s2 + $0x5a8] sm:$0xf]  ;;  %v7285_v19 = vld [vmem:[%s11189_s2 + $0xb08] sm:$0xf0] }
  0xde   :  { %3508 = vmatpush.bf16.msra.mxu2 %v5093_v49  ;;  %v7115_v49 = vld [vmem:[%s11189_s2 + $0x5b8] sm:$0xf0] }
  0xdf   :  { %3521 = vmatpush.bf16.msra.mxu3 %v5253_v54  ;;  %v7195_v54 = vld [vmem:[%s11189_s2 + $0x838] sm:$0xf0]  ;;  %v5473_v59 = vor.u32 %v7115_v49, %v5472_v48  ;;  %v5732_v48 = vld [vmem:[%s11189_s2 + $0x7b0] sm:$0xf]  ;;  %v7180_v49 = vld [vmem:[%s11189_s2 + $0x7c0] sm:$0xf0] }
  0xe0   :  { %3483 = vmatpush.bf16.msra.mxu0 %v4753_v62  ;;  %v3277_v55 = vpop.f32.mrf.mxu0  ;;  %v5793_v62 = vor.u32 %v7195_v54, %v5792_v53  ;;  %v5392_v53 = vld [vmem:[%s11189_s2 + $0x508] sm:$0xf]  ;;  %v7095_v54 = vld [vmem:[%s11189_s2 + $0x518] sm:$0xf0] }
  0xe1   :  { %3496 = vmatpush.bf16.msra.mxu1 %v4913_v3  ;;  %v3278_v58 = vadd.f32 %v3277_v55, %v8934_v20  ;;  %v3290_v60 = vpop.f32.mrf.mxu1  ;;  %v5953_v20 = vor.u32 %v7235_v57, %v5952_v56  ;;  %v5733_v56 = vor.u32 %v7180_v49, %v5732_v48  ;;  %v5552_v57 = vld [vmem:[%s11189_s2 + $0x648] sm:$0xf]  ;;  %v5393_v5 = vor.u32 %v7095_v54, %v5392_v53  ;;  %v6452_v48 = vld [vmem:[%s11189_s2 + $0xd50] sm:$0xf]  ;;  %v7360_v49 = vld [vmem:[%s11189_s2 + $0xd60] sm:$0xf0] }
  0xe2   :  { %3509 = vmatpush.bf16.msra.mxu2 %v5073_v4  ;;  %v7150_v4 = vld [vmem:[%s11189_s2 + $0x6d0] sm:$0xf0]  ;;  %v6112_v53 = vld [vmem:[%s11189_s2 + $0xaa8] sm:$0xf] }
  0xe3   :  { %3522 = vmatpush.bf16.msra.mxu3 %v5233_v7  ;;  %3484 = vmatmul.bf16.vlgmr.msra.gmra.mxu0 %v7907_v36  ;;  %v3291_v3 = vadd.f32 %v3290_v60, %v3278_v58  ;;  %v5932_v7 = vld [vmem:[%s11189_s2 + $0x940] sm:$0xf]  ;;  %v7135_v58 = vld [vmem:[%s11189_s2 + $0x658] sm:$0xf0] }
  0xe4   :  { %3528 = vmatpush.bf16.msrb.mxu0 %v5533_v8  ;;  %3497 = vmatmul.bf16.vlgmr.msra.gmra.mxu1 %v7917_v43  ;;  %v7230_v8 = vld [vmem:[%s11189_s2 + $0x950] sm:$0xf0] }
  0xe5   :  { %3541 = vmatpush.bf16.msrb.mxu1 %v5693_v9  ;;  %3510 = vmatmul.bf16.vlgmr.msra.gmra.mxu2 %v7905_v35  ;;  %v5453_v9 = vor.u32 %v7110_v0, %v5452_v63  ;;  %v5933_v15 = vor.u32 %v7230_v8, %v5932_v7  ;;  %v7215_v63 = vld [vmem:[%s11189_s2 + $0x8d8] sm:$0xf0]  ;;  %v6492_v7 = vld [vmem:[%s11189_s2 + $0xda0] sm:$0xf]  ;;  %v7370_v8 = vld [vmem:[%s11189_s2 + $0xdb0] sm:$0xf0] }
  0xe6   :  { %3554 = vmatpush.bf16.msrb.mxu2 %v5853_v10  ;;  %3523 = vmatmul.bf16.vlgmr.msra.gmra.mxu3 %v7915_v42  ;;  %v5613_v10 = vor.u32 %v7150_v4, %v5612_v2  ;;  %v6172_v2 = vld [vmem:[%s11189_s2 + $0xb20] sm:$0xf] }
  0xe7   :  { %3567 = vmatpush.bf16.msrb.mxu3 %v6013_v14  ;;  %v5592_v14 = vld [vmem:[%s11189_s2 + $0x698] sm:$0xf] }
  0xe8   :  { %3529 = vmatpush.bf16.msrb.mxu0 %v5513_v24  ;;  %v3303_v16 = vpop.f32.mrf.mxu2  ;;  %v3279_v29 = vpop.f32.mrf.mxu0  ;;  %v5593_v34 = vor.u32 %v7145_v17, %v5592_v14  ;;  %v6152_v17 = vld [vmem:[%s11189_s2 + $0xaf8] sm:$0xf] }
  0xe9   :  { %3542 = vmatpush.bf16.msrb.mxu1 %v5673_v25  ;;  %v3304_v24 = vadd.f32 %v3303_v16, %v3291_v3  ;;  %v3316_v25 = vpop.f32.mrf.mxu3  ;;  %v6332_v3 = vld [vmem:[%s11189_s2 + $0xc60] sm:$0xf]  ;;  %v6493_v16 = vor.u32 %v7370_v8, %v6492_v7  ;;  %v6632_v29 = vld [vmem:[%s11189_s2 + $0xeb8] sm:$0xf] }
  0xea   :  { %3555 = vmatpush.bf16.msrb.mxu2 %v5833_v27  ;;  %v5912_v27 = vld [vmem:[%s11189_s2 + $0x918] sm:$0xf] }
  0xeb   :  { %3568 = vmatpush.bf16.msrb.mxu3 %v5993_v31  ;;  %v3292_v31 = vpop.f32.mrf.mxu1  ;;  %v9133_v32 = vadd.f32 %v3316_v25, %v3304_v24  ;;  %v7325_v25 = vld [vmem:[%s11189_s2 + $0xc48] sm:$0xf0] }
  0xec   :  { %3530 = vmatpush.bf16.msrb.mxu0 %v5493_v45  ;;  %v5572_v45 = vld [vmem:[%s11189_s2 + $0x670] sm:$0xf]  ;;  %v6153_v31 = vor.u32 %v7285_v19, %v6152_v17 }
  0xed   :  { %3543 = vmatpush.bf16.msrb.mxu1 %v5653_v46  ;;  %v5913_v46 = vor.u32 %v7225_v28, %v5912_v27  ;;  %v6472_v27 = vld [vmem:[%s11189_s2 + $0xd78] sm:$0xf]  ;;  %v7365_v28 = vld [vmem:[%s11189_s2 + $0xd88] sm:$0xf0] }
  0xee   :  { %3556 = vmatpush.bf16.msrb.mxu2 %v5813_v47  ;;  %v7140_v47 = vld [vmem:[%s11189_s2 + $0x680] sm:$0xf0] }
  0xef   :  { %3569 = vmatpush.bf16.msrb.mxu3 %v5973_v51  ;;  %v7220_v51 = vld [vmem:[%s11189_s2 + $0x900] sm:$0xf0]  ;;  %v5573_v55 = vor.u32 %v7140_v47, %v5572_v45  ;;  %v6292_v45 = vld [vmem:[%s11189_s2 + $0xc10] sm:$0xf] }
  0xf0   :  { %3531 = vmatpush.bf16.msrb.mxu0 %v5473_v59  ;;  %v5712_v59 = vld [vmem:[%s11189_s2 + $0x788] sm:$0xf]  ;;  %v5893_v60 = vor.u32 %v7220_v51, %v5892_v50  ;;  %v3305_v0 = vpop.f32.mrf.mxu2  ;;  %v7320_v47 = vld [vmem:[%s11189_s2 + $0xc20] sm:$0xf0]  ;;  %v6612_v50 = vld [vmem:[%s11189_s2 + $0xe90] sm:$0xf] }
  0xf1   :  { %3544 = vmatpush.bf16.msrb.mxu1 %v5633_v61  ;;  %v7175_v61 = vld [vmem:[%s11189_s2 + $0x798] sm:$0xf0]  ;;  %v3318_v4 = vpop.f32.mrf.mxu3  ;;  %v7400_v51 = vld [vmem:[%s11189_s2 + $0xea0] sm:$0xf0]  ;;  %v6293_v54 = vor.u32 %v7320_v47, %v6292_v45 }
  0xf2   :  { %3557 = vmatpush.bf16.msrb.mxu2 %v5793_v62  ;;  %v5872_v62 = vld [vmem:[%s11189_s2 + $0x8c8] sm:$0xf]  ;;  %v6092_v4 = vld [vmem:[%s11189_s2 + $0xa80] sm:$0xf] }
  0xf3   :  { %3570 = vmatpush.bf16.msrb.mxu3 %v5953_v20  ;;  %v7290_v20 = vld [vmem:[%s11189_s2 + $0xb30] sm:$0xf0]  ;;  %v5873_v13 = vor.u32 %v7215_v63, %v5872_v62  ;;  %v7355_v62 = vld [vmem:[%s11189_s2 + $0xd38] sm:$0xf0]  ;;  %v6592_v63 = vld [vmem:[%s11189_s2 + $0xe68] sm:$0xf] }
  0xf4   :  { %3532 = vmatpush.bf16.msrb.mxu0 %v5453_v9  ;;  %v5553_v9 = vor.u32 %v7135_v58, %v5552_v57  ;;  %v6173_v14 = vor.u32 %v7290_v20, %v6172_v2  ;;  %v6272_v57 = vld [vmem:[%s11189_s2 + $0xbe8] sm:$0xf]  ;;  %v659_v58 = vperm.slane %v8729_v1, 1  ;;  %v7395_v1 = vld [vmem:[%s11189_s2 + $0xe78] sm:$0xf0] }
  0xf5   :  { %3545 = vmatpush.bf16.msrb.mxu1 %v5613_v10  ;;  %v5713_v10 = vor.u32 %v7175_v61, %v5712_v59  ;;  %v6613_v59 = vor.u32 %v7400_v51, %v6612_v50  ;;  %v6432_v61 = vld [vmem:[%s11189_s2 + $0xd28] sm:$0xf]  ;;  %v6052_v50 = vld [vmem:[%s11189_s2 + $0xa30] sm:$0xf]  ;;  %v7260_v51 = vld [vmem:[%s11189_s2 + $0xa40] sm:$0xf0] }
  0xf6   :  { %3558 = vmatpush.bf16.msrb.mxu2 %v5773_v11  ;;  %v6652_v11 = vld [vmem:[%s11189_s2 + $0xee0] sm:$0xf] }
  0xf7   :  { %3571 = vmatpush.bf16.msrb.mxu3 %v5933_v15  ;;  %v6333_v15 = vor.u32 %v7330_v6, %v6332_v3  ;;  %v6653_v24 = vor.u32 %v7410_v12, %v6652_v11  ;;  %v6433_v3 = vor.u32 %v7355_v62, %v6432_v61  ;;  %v6252_v6 = vld [vmem:[%s11189_s2 + $0xbc0] sm:$0xf]  ;;  %v7350_v12 = vld [vmem:[%s11189_s2 + $0xd10] sm:$0xf0]  ;;  %v6032_v61 = vld [vmem:[%s11189_s2 + $0xa08] sm:$0xf] }
  0xf8   :  { %3533 = vmatpush.bf16.msrb.mxu0 %v5433_v30  ;;  %v7405_v30 = vld [vmem:[%s11189_s2 + $0xec8] sm:$0xf0]  ;;  %v6412_v11 = vld [vmem:[%s11189_s2 + $0xd00] sm:$0xf]  ;;  %v7255_v62 = vld [vmem:[%s11189_s2 + $0xa18] sm:$0xf0] }
  0xf9   :  { %3546 = vmatpush.bf16.msrb.mxu1 %v5593_v34  ;;  %v6313_v34 = vor.u32 %v7325_v25, %v6312_v21  ;;  %v6413_v19 = vor.u32 %v7350_v12, %v6412_v11  ;;  %v6072_v21 = vld [vmem:[%s11189_s2 + $0xa58] sm:$0xf]  ;;  %v7008_v11 = vld [vmem:[%s11189_s2 + $0x264] sm:$0xf]  ;;  %v6033_v12 = vor.u32 %v7255_v62, %v6032_v61 }
  0xfa   :  { %3559 = vmatpush.bf16.msrb.mxu2 %v5753_v37  ;;  %v6473_v37 = vor.u32 %v7365_v28, %v6472_v27  ;;  %v6232_v25 = vld [vmem:[%s11189_s2 + $0xb98] sm:$0xf] }
  0xfb   :  { %3572 = vmatpush.bf16.msrb.mxu3 %v5913_v46  ;;  %v6633_v46 = vor.u32 %v7405_v30, %v6632_v29  ;;  %v7305_v29 = vld [vmem:[%s11189_s2 + $0xba8] sm:$0xf0]  ;;  %v6392_v30 = vld [vmem:[%s11189_s2 + $0xcd8] sm:$0xf] }
  0xfc   :  { %3534 = vmatpush.bf16.msrb.mxu0 %v5413_v52  ;;  %v6133_v52 = vor.u32 %v7280_v44, %v6132_v40  ;;  %v6552_v40 = vld [vmem:[%s11189_s2 + $0xe18] sm:$0xf]  ;;  %v7385_v44 = vld [vmem:[%s11189_s2 + $0xe28] sm:$0xf0] }
  0xfd   :  { %3547 = vmatpush.bf16.msrb.mxu1 %v5573_v55  ;;  %v6453_v55 = vor.u32 %v7360_v49, %v6452_v48  ;;  %v6233_v48 = vor.u32 %v7305_v29, %v6232_v25  ;;  %v6963_v29 = vld [vmem:[%s11189_s2 + $0xfc] sm:$0xf] }
  0xfe   :  { %3560 = vmatpush.bf16.msrb.mxu2 %v5733_v56  ;;  %v7275_v56 = vld [vmem:[%s11189_s2 + $0xab8] sm:$0xf0] }
  0xff   :  { %3573 = vmatpush.bf16.msrb.mxu3 %v5893_v60  ;;  %v7315_v60 = vld [vmem:[%s11189_s2 + $0xbf8] sm:$0xf0]  ;;  %v6113_v0 = vor.u32 %v7275_v56, %v6112_v53  ;;  %v6372_v56 = vld [vmem:[%s11189_s2 + $0xcb0] sm:$0xf] }
 0x100   :  { %3535 = vmatpush.bf16.msrb.mxu0 %v5393_v5  ;;  %v3329_v2 = vpop.f32.mrf.mxu0  ;;  %v6273_v20 = vor.u32 %v7315_v60, %v6272_v57  ;;  %v7270_v5 = vld [vmem:[%s11189_s2 + $0xa90] sm:$0xf0]  ;;  %v7340_v57 = vld [vmem:[%s11189_s2 + $0xcc0] sm:$0xf0]  ;;  %v6053_v60 = vor.u32 %v7260_v51, %v6052_v50 }
 0x101   :  { %3548 = vmatpush.bf16.msrb.mxu1 %v5553_v9  ;;  %v3330_v7 = vadd.f32 %v3329_v2, %v659_v58  ;;  %v3342_v8 = vpop.f32.mrf.mxu1  ;;  %v6593_v9 = vor.u32 %v7395_v1, %v6592_v63  ;;  %v6532_v58 = vld [vmem:[%s11189_s2 + $0xdf0] sm:$0xf]  ;;  %v6373_v1 = vor.u32 %v7340_v57, %v6372_v56  ;;  %v7295_v2 = vld [vmem:[%s11189_s2 + $0xb58] sm:$0xf0]  ;;  %v6958_v51 = vld [vmem:[%s11189_s2 + $0xd4] sm:$0xf] }
 0x102   :  { %3561 = vmatpush.bf16.msrb.mxu2 %v5713_v10  ;;  %v7310_v10 = vld [vmem:[%s11189_s2 + $0xbd0] sm:$0xf0]  ;;  %v5174_v57 = vld [vmem:[%s11189_s2 + $0x364] sm:$0xf0] }
 0x103   :  { %3574 = vmatpush.bf16.msrb.mxu3 %v5873_v13  ;;  %3536 = vmatmul.bf16.vlgmr.msrb.gmra.mxu0 %v8030_v38  ;;  %v6572_v13 = vld [vmem:[%s11189_s2 + $0xe40] sm:$0xf]  ;;  %v6253_v17 = vor.u32 %v7310_v10, %v6252_v6  ;;  %v6512_v6 = vld [vmem:[%s11189_s2 + $0xdc8] sm:$0xf]  ;;  %v4894_v10 = vld [vmem:[%s11189_s2 + $0x134] sm:$0xf0] }
 0x104   :  { %3580 = vmatpush.bf16.msra.mxu0 %v6173_v14  ;;  %3549 = vmatmul.bf16.vlgmr.msrb.gmra.mxu1 %v8034_v41  ;;  %v7390_v14 = vld [vmem:[%s11189_s2 + $0xe50] sm:$0xf0] }
 0x105   :  { %3593 = vmatpush.bf16.msra.mxu1 %v6333_v15  ;;  %3562 = vmatmul.bf16.vlgmr.msrb.gmra.mxu2 %v8022_v33  ;;  %v3343_v15 = vadd.f32 %v3342_v8, %v3330_v7  ;;  %v6573_v28 = vor.u32 %v7390_v14, %v6572_v13  ;;  %v7375_v7 = vld [vmem:[%s11189_s2 + $0xdd8] sm:$0xf0]  ;;  %v5054_v13 = vld [vmem:[%s11189_s2 + $0x274] sm:$0xf0]  ;;  %v7048_v14 = vld [vmem:[%s11189_s2 + $0x3a4] sm:$0xf] }
 0x106   :  { %3606 = vmatpush.bf16.msra.mxu2 %v6493_v16  ;;  %3575 = vmatmul.bf16.vlgmr.msrb.gmra.mxu3 %v8032_v39  ;;  %v6093_v16 = vor.u32 %v7270_v5, %v6092_v4  ;;  %v7335_v5 = vld [vmem:[%s11189_s2 + $0xc98] sm:$0xf0]  ;;  %v7038_v56 = vld [vmem:[%s11189_s2 + $0x354] sm:$0xf] }
 0x107   :  { %3619 = vmatpush.bf16.msra.mxu3 %v6653_v24  ;;  %v7265_v24 = vld [vmem:[%s11189_s2 + $0xa68] sm:$0xf0]  ;;  %v5177_v62 = vor.u32 %v7038_v56, %v5174_v57  ;;  %v6938_v57 = vld [vmem:[%s11189_s2 + $0x34] sm:$0xf] }
 0x108   :  { %3581 = vmatpush.bf16.msra.mxu0 %v6153_v31  ;;  %v3355_v27 = vpop.f32.mrf.mxu2  ;;  %v7345_v31 = vld [vmem:[%s11189_s2 + $0xce8] sm:$0xf0]  ;;  %v6073_v45 = vor.u32 %v7265_v24, %v6072_v21  ;;  %v3331_v47 = vpop.f32.mrf.mxu0  ;;  %v5374_v21 = vld [vmem:[%s11189_s2 + $0x4f4] sm:$0xf0]  ;;  %v6513_v24 = vor.u32 %v7375_v7, %v6512_v6  ;;  %v5314_v6 = vld [vmem:[%s11189_s2 + $0x47c] sm:$0xf0] }
 0x109   :  { %3594 = vmatpush.bf16.msra.mxu1 %v6313_v34  ;;  %v3356_v34 = vadd.f32 %v3355_v27, %v3343_v15  ;;  %v6393_v49 = vor.u32 %v7345_v31, %v6392_v30  ;;  %v3344_v53 = vpop.f32.mrf.mxu1  ;;  %v5214_v15 = vld [vmem:[%s11189_s2 + $0x3b4] sm:$0xf0]  ;;  %v5057_v27 = vor.u32 %v7008_v11, %v5054_v13  ;;  %v4874_v30 = vld [vmem:[%s11189_s2 + $0x10c] sm:$0xf0]  ;;  %v7003_v31 = vld [vmem:[%s11189_s2 + $0x23c] sm:$0xf] }
 0x10a   :  { %3607 = vmatpush.bf16.msra.mxu2 %v6473_v37  ;;  %v3368_v37 = vpop.f32.mrf.mxu3  ;;  %v5354_v47 = vld [vmem:[%s11189_s2 + $0x4cc] sm:$0xf0]  ;;  %v6998_v53 = vld [vmem:[%s11189_s2 + $0x214] sm:$0xf]  ;;  %v6948_v11 = vld [vmem:[%s11189_s2 + $0x84] sm:$0xf] }
 0x10b   :  { %3620 = vmatpush.bf16.msra.mxu3 %v6633_v46  ;;  %v9332_v46 = vadd.f32 %v3368_v37, %v3356_v34  ;;  %v5034_v37 = vld [vmem:[%s11189_s2 + $0x24c] sm:$0xf0]  ;;  %v6988_v13 = vld [vmem:[%s11189_s2 + $0x1c4] sm:$0xf] }
 0x10c   :  { %3582 = vmatpush.bf16.msra.mxu0 %v6133_v52  ;;  %v6212_v52 = vld [vmem:[%s11189_s2 + $0xb70] sm:$0xf] }
 0x10d   :  { %3595 = vmatpush.bf16.msra.mxu1 %v6293_v54  ;;  %v6553_v54 = vor.u32 %v7385_v44, %v6552_v40  ;;  %v7043_v40 = vld [vmem:[%s11189_s2 + $0x37c] sm:$0xf]  ;;  %v5194_v44 = vld [vmem:[%s11189_s2 + $0x38c] sm:$0xf0] }
 0x10e   :  { %3608 = vmatpush.bf16.msra.mxu2 %v6453_v55  ;;  %v7300_v55 = vld [vmem:[%s11189_s2 + $0xb80] sm:$0xf0]  ;;  %v5197_v50 = vor.u32 %v7043_v40, %v5194_v44  ;;  %v4954_v44 = vld [vmem:[%s11189_s2 + $0x1ac] sm:$0xf0] }
 0x10f   :  { %3621 = vmatpush.bf16.msra.mxu3 %v6613_v59  ;;  %v7380_v59 = vld [vmem:[%s11189_s2 + $0xe00] sm:$0xf0]  ;;  %v6213_v63 = vor.u32 %v7300_v55, %v6212_v52  ;;  %v4854_v52 = vld [vmem:[%s11189_s2 + $0xe4] sm:$0xf0] }
 0x110   :  { %3583 = vmatpush.bf16.msra.mxu0 %v6113_v0  ;;  %v6192_v0 = vld [vmem:[%s11189_s2 + $0xb48] sm:$0xf]  ;;  %v6533_v4 = vor.u32 %v7380_v59, %v6532_v58  ;;  %v7078_v58 = vld [vmem:[%s11189_s2 + $0x494] sm:$0xf] }
 0x111   :  { %3596 = vmatpush.bf16.msra.mxu1 %v6273_v20  ;;  %v6352_v20 = vld [vmem:[%s11189_s2 + $0xc88] sm:$0xf] }
 0x112   :  { %3609 = vmatpush.bf16.msra.mxu2 %v6433_v3  ;;  %v3357_v3 = vpop.f32.mrf.mxu2  ;;  %v3370_v8 = vpop.f32.mrf.mxu3  ;;  %v5014_v55 = vld [vmem:[%s11189_s2 + $0x224] sm:$0xf0] }
 0x113   :  { %3622 = vmatpush.bf16.msra.mxu3 %v6593_v9  ;;  %v6968_v9 = vld [vmem:[%s11189_s2 + $0x124] sm:$0xf]  ;;  %v5334_v59 = vld [vmem:[%s11189_s2 + $0x4a4] sm:$0xf0]  ;;  %v5017_v61 = vor.u32 %v6998_v53, %v5014_v55  ;;  %v7033_v3 = vld [vmem:[%s11189_s2 + $0x32c] sm:$0xf] }
 0x114   :  { %3584 = vmatpush.bf16.msra.mxu0 %v6093_v16  ;;  %v6193_v16 = vor.u32 %v7295_v2, %v6192_v0  ;;  %v4897_v25 = vor.u32 %v6968_v9, %v4894_v10  ;;  %v6993_v0 = vld [vmem:[%s11189_s2 + $0x1ec] sm:$0xf]  ;;  %v5337_v2 = vor.u32 %v7078_v58, %v5334_v59  ;;  %v4774_v58 = vld [vmem:[%s11189_s2 + $0x44] sm:$0xf0]  ;;  %v6978_v59 = vld [vmem:[%s11189_s2 + $0x174] sm:$0xf] }
 0x115   :  { %3597 = vmatpush.bf16.msra.mxu1 %v6253_v17  ;;  %v6353_v17 = vor.u32 %v7335_v5, %v6352_v20  ;;  %v4994_v20 = vld [vmem:[%s11189_s2 + $0x1fc] sm:$0xf0]  ;;  %v7073_v5 = vld [vmem:[%s11189_s2 + $0x46c] sm:$0xf] }
 0x116   :  { %3610 = vmatpush.bf16.msra.mxu2 %v6413_v19  ;;  %v7088_v19 = vld [vmem:[%s11189_s2 + $0x4e4] sm:$0xf]  ;;  %v4997_v9 = vor.u32 %v6993_v0, %v4994_v20  ;;  %v7058_v0 = vld [vmem:[%s11189_s2 + $0x3f4] sm:$0xf]  ;;  %v4777_v20 = vor.u32 %v6938_v57, %v4774_v58 }
 0x117   :  { %3623 = vmatpush.bf16.msra.mxu3 %v6573_v28  ;;  %v5217_v28 = vor.u32 %v7048_v14, %v5214_v15  ;;  %v5377_v34 = vor.u32 %v7088_v19, %v5374_v21  ;;  %v7028_v19 = vld [vmem:[%s11189_s2 + $0x304] sm:$0xf]  ;;  %v5134_v21 = vld [vmem:[%s11189_s2 + $0x314] sm:$0xf0]  ;;  %v7118_v58 = vld [vmem:[%s11189_s2 + $0x5d4] sm:$0xf] }
 0x118   :  { %3585 = vmatpush.bf16.msra.mxu0 %v6073_v45  ;;  %v7083_v45 = vld [vmem:[%s11189_s2 + $0x4bc] sm:$0xf] }
 0x119   :  { %3598 = vmatpush.bf16.msra.mxu1 %v6233_v48  ;;  %v4877_v48 = vor.u32 %v6963_v29, %v4874_v30  ;;  %v5137_v29 = vor.u32 %v7028_v19, %v5134_v21  ;;  %v6943_v30 = vld [vmem:[%s11189_s2 + $0x5c] sm:$0xf]  ;;  %v7168_v19 = vld [vmem:[%s11189_s2 + $0x764] sm:$0xf] }
 0x11a   :  { %3611 = vmatpush.bf16.msra.mxu2 %v6393_v49  ;;  %v5037_v49 = vor.u32 %v7003_v31, %v5034_v37  ;;  %v4794_v31 = vld [vmem:[%s11189_s2 + $0x6c] sm:$0xf0] }
 0x11b   :  { %3624 = vmatpush.bf16.msra.mxu3 %v6553_v54  ;;  %v5357_v54 = vor.u32 %v7083_v45, %v5354_v47  ;;  %v7023_v45 = vld [vmem:[%s11189_s2 + $0x2dc] sm:$0xf]  ;;  %v5114_v47 = vld [vmem:[%s11189_s2 + $0x2ec] sm:$0xf0] }
 0x11c   :  { %3586 = vmatpush.bf16.msra.mxu0 %v6053_v60  ;;  %v4857_v60 = vor.u32 %v6958_v51, %v4854_v52  ;;  %v5274_v51 = vld [vmem:[%s11189_s2 + $0x42c] sm:$0xf0]  ;;  %v4797_v52 = vor.u32 %v6943_v30, %v4794_v31  ;;  %v5117_v56 = vor.u32 %v7023_v45, %v5114_v47  ;;  %v6014_v30 = vld [vmem:[%s11189_s2 + $0x9f4] sm:$0xf0]  ;;  %v7163_v47 = vld [vmem:[%s11189_s2 + $0x73c] sm:$0xf] }
 0x11d   :  { %3599 = vmatpush.bf16.msra.mxu1 %v6213_v63  ;;  %v6953_v63 = vld [vmem:[%s11189_s2 + $0xac] sm:$0xf]  ;;  %v5514_v45 = vld [vmem:[%s11189_s2 + $0x60c] sm:$0xf0] }
 0x11e   :  { %3612 = vmatpush.bf16.msra.mxu2 %v6373_v1  ;;  %v4834_v1 = vld [vmem:[%s11189_s2 + $0xbc] sm:$0xf0] }
 0x11f   :  { %3625 = vmatpush.bf16.msra.mxu3 %v6533_v4  ;;  %v5154_v4 = vld [vmem:[%s11189_s2 + $0x33c] sm:$0xf0]  ;;  %v4837_v7 = vor.u32 %v6953_v63, %v4834_v1  ;;  %v7018_v63 = vld [vmem:[%s11189_s2 + $0x2b4] sm:$0xf]  ;;  %v5094_v1 = vld [vmem:[%s11189_s2 + $0x2c4] sm:$0xf0] }
 0x120   :  { %3587 = vmatpush.bf16.msra.mxu0 %v6033_v12  ;;  %v3381_v8 = vpop.f32.mrf.mxu0  ;;  %v5157_v10 = vor.u32 %v7033_v3, %v5154_v4  ;;  %v4814_v12 = vld [vmem:[%s11189_s2 + $0x94] sm:$0xf0]  ;;  %v6933_v3 = vld [vmem:[%s11189_s2 + $0xc] sm:$0xf]  ;;  %v4754_v4 = vld [vmem:[%s11189_s2 + $0x1c] sm:$0xf0] }
 0x121   :  { %3600 = vmatpush.bf16.msra.mxu1 %v6193_v16  ;;  %v3382_v14 = vadd.f32 %v3381_v8, %v9332_v46  ;;  %v3394_v15 = vpop.f32.mrf.mxu1  ;;  %v5317_v16 = vor.u32 %v7073_v5, %v5314_v6  ;;  %v5294_v46 = vld [vmem:[%s11189_s2 + $0x454] sm:$0xf0]  ;;  %v5097_v6 = vor.u32 %v7018_v63, %v5094_v1  ;;  %v4914_v8 = vld [vmem:[%s11189_s2 + $0x15c] sm:$0xf0]  ;;  %v4757_v21 = vor.u32 %v6933_v3, %v4754_v4  ;;  %v7198_v63 = vld [vmem:[%s11189_s2 + $0x854] sm:$0xf] }
 0x122   :  { %3613 = vmatpush.bf16.msra.mxu2 %v6353_v17  ;;  %v4974_v17 = vld [vmem:[%s11189_s2 + $0x1d4] sm:$0xf0]  ;;  %v5814_v1 = vld [vmem:[%s11189_s2 + $0x864] sm:$0xf0] }
 0x123   :  { %3626 = vmatpush.bf16.msra.mxu3 %v6513_v24  ;;  %3588 = vmatmul.bf16.vlgmr.msra.gmra.mxu0 %v8217_v18  ;;  %v7068_v24 = vld [vmem:[%s11189_s2 + $0x444] sm:$0xf]  ;;  %v5817_v4 = vor.u32 %v7198_v63, %v5814_v1  ;;  %v7098_v1 = vld [vmem:[%s11189_s2 + $0x534] sm:$0xf] }
 0x124   :  { %3632 = vmatpush.bf16.msrb.mxu0 %v4897_v25  ;;  %3601 = vmatmul.bf16.vlgmr.msra.gmra.mxu1 %v8230_v23  ;;  %v3395_v25 = vadd.f32 %v3394_v15, %v3382_v14  ;;  %v5297_v40 = vor.u32 %v7068_v24, %v5294_v46  ;;  %v5234_v14 = vld [vmem:[%s11189_s2 + $0x3dc] sm:$0xf0]  ;;  %v5694_v24 = vld [vmem:[%s11189_s2 + $0x774] sm:$0xf0]  ;;  %v7208_v46 = vld [vmem:[%s11189_s2 + $0x8a4] sm:$0xf] }
 0x125   :  { %3645 = vmatpush.bf16.msrb.mxu1 %v5057_v27  ;;  %3614 = vmatmul.bf16.vlgmr.msra.gmra.mxu2 %v8228_v22  ;;  %v4817_v27 = vor.u32 %v6948_v11, %v4814_v12  ;;  %v5074_v12 = vld [vmem:[%s11189_s2 + $0x29c] sm:$0xf0] }
 0x126   :  { %3658 = vmatpush.bf16.msrb.mxu2 %v5217_v28  ;;  %3627 = vmatmul.bf16.vlgmr.msra.gmra.mxu3 %v8238_v26  ;;  %v4977_v28 = vor.u32 %v6988_v13, %v4974_v17  ;;  %v7053_v13 = vld [vmem:[%s11189_s2 + $0x3cc] sm:$0xf]  ;;  %v5534_v17 = vld [vmem:[%s11189_s2 + $0x634] sm:$0xf0] }
 0x127   :  { %3671 = vmatpush.bf16.msrb.mxu3 %v5377_v34  ;;  %v6983_v34 = vld [vmem:[%s11189_s2 + $0x19c] sm:$0xf]  ;;  %v5237_v31 = vor.u32 %v7053_v13, %v5234_v14  ;;  %v7233_v13 = vld [vmem:[%s11189_s2 + $0x96c] sm:$0xf]  ;;  %v5954_v14 = vld [vmem:[%s11189_s2 + $0x97c] sm:$0xf0] }
 0x128   :  { %3633 = vmatpush.bf16.msrb.mxu0 %v4877_v48  ;;  %v3407_v37 = vpop.f32.mrf.mxu2  ;;  %v4957_v55 = vor.u32 %v6983_v34, %v4954_v44  ;;  %v7123_v44 = vld [vmem:[%s11189_s2 + $0x5fc] sm:$0xf] }
 0x129   :  { %3646 = vmatpush.bf16.msrb.mxu1 %v5037_v49  ;;  %v3408_v48 = vadd.f32 %v3407_v37, %v3395_v25  ;;  %v3420_v49 = vpop.f32.mrf.mxu3  ;;  %v5854_v25 = vld [vmem:[%s11189_s2 + $0x8b4] sm:$0xf0]  ;;  %v5697_v37 = vor.u32 %v7168_v19, %v5694_v24  ;;  %v7108_v24 = vld [vmem:[%s11189_s2 + $0x584] sm:$0xf] }
 0x12a   :  { %3659 = vmatpush.bf16.msrb.mxu2 %v5197_v50  ;;  %v7063_v50 = vld [vmem:[%s11189_s2 + $0x41c] sm:$0xf] }
 0x12b   :  { %3672 = vmatpush.bf16.msrb.mxu3 %v5357_v54  ;;  %v9531_v53 = vadd.f32 %v3420_v49, %v3408_v48  ;;  %v3383_v54 = vpop.f32.mrf.mxu0  ;;  %v5674_v49 = vld [vmem:[%s11189_s2 + $0x74c] sm:$0xf0] }
 0x12c   :  { %3634 = vmatpush.bf16.msrb.mxu0 %v4857_v60  ;;  %v3396_v60 = vpop.f32.mrf.mxu1  ;;  %v5994_v54 = vld [vmem:[%s11189_s2 + $0x9cc] sm:$0xf0] }
 0x12d   :  { %3647 = vmatpush.bf16.msrb.mxu1 %v5017_v61  ;;  %v5277_v61 = vor.u32 %v7063_v50, %v5274_v51  ;;  %v7203_v50 = vld [vmem:[%s11189_s2 + $0x87c] sm:$0xf]  ;;  %v5834_v51 = vld [vmem:[%s11189_s2 + $0x88c] sm:$0xf0]  ;;  %v7158_v60 = vld [vmem:[%s11189_s2 + $0x714] sm:$0xf] }
 0x12e   :  { %3660 = vmatpush.bf16.msrb.mxu2 %v5177_v62  ;;  %v4934_v62 = vld [vmem:[%s11189_s2 + $0x184] sm:$0xf0]  ;;  %v5837_v57 = vor.u32 %v7203_v50, %v5834_v51  ;;  %v5594_v51 = vld [vmem:[%s11189_s2 + $0x6ac] sm:$0xf0] }
 0x12f   :  { %3673 = vmatpush.bf16.msrb.mxu3 %v5337_v2  ;;  %v5254_v2 = vld [vmem:[%s11189_s2 + $0x404] sm:$0xf0]  ;;  %v4937_v5 = vor.u32 %v6978_v59, %v4934_v62 }
 0x130   :  { %3635 = vmatpush.bf16.msrb.mxu0 %v4837_v7  ;;  %v6973_v7 = vld [vmem:[%s11189_s2 + $0x14c] sm:$0xf]  ;;  %v5257_v11 = vor.u32 %v7058_v0, %v5254_v2  ;;  %v5494_v59 = vld [vmem:[%s11189_s2 + $0x5e4] sm:$0xf0]  ;;  %v7238_v0 = vld [vmem:[%s11189_s2 + $0x994] sm:$0xf] }
 0x131   :  { %3648 = vmatpush.bf16.msrb.mxu1 %v4997_v9  ;;  %v7013_v9 = vld [vmem:[%s11189_s2 + $0x28c] sm:$0xf]  ;;  %v3422_v15 = vpop.f32.mrf.mxu3  ;;  %v5654_v62 = vld [vmem:[%s11189_s2 + $0x724] sm:$0xf0] }
 0x132   :  { %3661 = vmatpush.bf16.msrb.mxu2 %v5157_v10  ;;  %v3409_v10 = vpop.f32.mrf.mxu2  ;;  %v5974_v2 = vld [vmem:[%s11189_s2 + $0x9a4] sm:$0xf0]  ;;  %v5657_v3 = vor.u32 %v7158_v60, %v5654_v62 }
 0x133   :  { %3674 = vmatpush.bf16.msrb.mxu3 %v5317_v16  ;;  %v7128_v16 = vld [vmem:[%s11189_s2 + $0x624] sm:$0xf]  ;;  %v7193_v10 = vld [vmem:[%s11189_s2 + $0x82c] sm:$0xf] }
 0x134   :  { %3636 = vmatpush.bf16.msrb.mxu0 %v4817_v27  ;;  %v4917_v27 = vor.u32 %v6973_v7, %v4914_v8  ;;  %v5537_v34 = vor.u32 %v7128_v16, %v5534_v17  ;;  %v7153_v7 = vld [vmem:[%s11189_s2 + $0x6ec] sm:$0xf]  ;;  %v5977_v8 = vor.u32 %v7238_v0, %v5974_v2  ;;  %v5414_v0 = vld [vmem:[%s11189_s2 + $0x544] sm:$0xf0]  ;;  %v7138_v2 = vld [vmem:[%s11189_s2 + $0x674] sm:$0xf] }
 0x135   :  { %3649 = vmatpush.bf16.msrb.mxu1 %v4977_v28  ;;  %v5077_v28 = vor.u32 %v7013_v9, %v5074_v12  ;;  %v5634_v9 = vld [vmem:[%s11189_s2 + $0x6fc] sm:$0xf0] }
 0x136   :  { %3662 = vmatpush.bf16.msrb.mxu2 %v5137_v29  ;;  %v7248_v29 = vld [vmem:[%s11189_s2 + $0x9e4] sm:$0xf]  ;;  %v5637_v19 = vor.u32 %v7153_v7, %v5634_v9  ;;  %v5894_v7 = vld [vmem:[%s11189_s2 + $0x904] sm:$0xf0]  ;;  %v7093_v9 = vld [vmem:[%s11189_s2 + $0x50c] sm:$0xf] }
 0x137   :  { %3675 = vmatpush.bf16.msrb.mxu3 %v5297_v40  ;;  %v5857_v40 = vor.u32 %v7208_v46, %v5854_v25  ;;  %v6017_v48 = vor.u32 %v7248_v29, %v6014_v30  ;;  %v5454_v46 = vld [vmem:[%s11189_s2 + $0x594] sm:$0xf0]  ;;  %v7148_v25 = vld [vmem:[%s11189_s2 + $0x6c4] sm:$0xf] }
 0x138   :  { %3637 = vmatpush.bf16.msrb.mxu0 %v4797_v52  ;;  %v7243_v52 = vld [vmem:[%s11189_s2 + $0x9bc] sm:$0xf]  ;;  %v7188_v29 = vld [vmem:[%s11189_s2 + $0x804] sm:$0xf]  ;;  %v5774_v30 = vld [vmem:[%s11189_s2 + $0x814] sm:$0xf0] }
 0x139   :  { %3650 = vmatpush.bf16.msrb.mxu1 %v4957_v55  ;;  %v5517_v55 = vor.u32 %v7123_v44, %v5514_v45  ;;  %v5777_v44 = vor.u32 %v7188_v29, %v5774_v30  ;;  %v7103_v45 = vld [vmem:[%s11189_s2 + $0x55c] sm:$0xf]  ;;  %v6334_v29 = vld [vmem:[%s11189_s2 + $0xc74] sm:$0xf0]  ;;  %v7368_v30 = vld [vmem:[%s11189_s2 + $0xda4] sm:$0xf] }
 0x13a   :  { %3663 = vmatpush.bf16.msrb.mxu2 %v5117_v56  ;;  %v5677_v56 = vor.u32 %v7163_v47, %v5674_v49  ;;  %v5434_v47 = vld [vmem:[%s11189_s2 + $0x56c] sm:$0xf0] }
 0x13b   :  { %3676 = vmatpush.bf16.msrb.mxu3 %v5277_v61  ;;  %v5997_v61 = vor.u32 %v7243_v52, %v5994_v54  ;;  %v7183_v52 = vld [vmem:[%s11189_s2 + $0x7dc] sm:$0xf]  ;;  %v5754_v54 = vld [vmem:[%s11189_s2 + $0x7ec] sm:$0xf0]  ;;  %v5437_v60 = vor.u32 %v7103_v45, %v5434_v47 }
 0x13c   :  { %3638 = vmatpush.bf16.msrb.mxu0 %v4777_v20  ;;  %v5497_v20 = vor.u32 %v7118_v58, %v5494_v59  ;;  %v5914_v58 = vld [vmem:[%s11189_s2 + $0x92c] sm:$0xf0]  ;;  %v5757_v63 = vor.u32 %v7183_v52, %v5754_v54  ;;  %v7323_v52 = vld [vmem:[%s11189_s2 + $0xc3c] sm:$0xf] }
 0x13d   :  { %3651 = vmatpush.bf16.msrb.mxu1 %v4937_v5  ;;  %v7113_v5 = vld [vmem:[%s11189_s2 + $0x5ac] sm:$0xf] }
 0x13e   :  { %3664 = vmatpush.bf16.msrb.mxu2 %v5097_v6  ;;  %v5474_v6 = vld [vmem:[%s11189_s2 + $0x5bc] sm:$0xf0] }
 0x13f   :  { %3677 = vmatpush.bf16.msrb.mxu3 %v5257_v11  ;;  %v5794_v11 = vld [vmem:[%s11189_s2 + $0x83c] sm:$0xf0]  ;;  %v5477_v16 = vor.u32 %v7113_v5, %v5474_v6  ;;  %v5734_v5 = vld [vmem:[%s11189_s2 + $0x7c4] sm:$0xf0]  ;;  %v7218_v6 = vld [vmem:[%s11189_s2 + $0x8f4] sm:$0xf] }
 0x140   :  { %3639 = vmatpush.bf16.msrb.mxu0 %v4757_v21  ;;  %v3433_v12 = vpop.f32.mrf.mxu0  ;;  %v5797_v21 = vor.u32 %v7193_v10, %v5794_v11  ;;  %v5394_v10 = vld [vmem:[%s11189_s2 + $0x51c] sm:$0xf0] }
 0x141   :  { %3652 = vmatpush.bf16.msrb.mxu1 %v4917_v27  ;;  %v3434_v15 = vadd.f32 %v3433_v12, %v9531_v53  ;;  %v3446_v17 = vpop.f32.mrf.mxu1  ;;  %v5957_v53 = vor.u32 %v7233_v13, %v5954_v14  ;;  %v7133_v13 = vld [vmem:[%s11189_s2 + $0x64c] sm:$0xf]  ;;  %v5554_v14 = vld [vmem:[%s11189_s2 + $0x65c] sm:$0xf0] }
 0x142   :  { %3665 = vmatpush.bf16.msrb.mxu2 %v5077_v28  ;;  %v5614_v28 = vld [vmem:[%s11189_s2 + $0x6d4] sm:$0xf0] }
 0x143   :  { %3678 = vmatpush.bf16.msrb.mxu3 %v5237_v31  ;;  %3640 = vmatmul.bf16.vlgmr.msrb.gmra.mxu0 %v7907_v36  ;;  %v3447_v27 = vadd.f32 %v3446_v17, %v3434_v15  ;;  %v7228_v31 = vld [vmem:[%s11189_s2 + $0x944] sm:$0xf]  ;;  %v7173_v15 = vld [vmem:[%s11189_s2 + $0x78c] sm:$0xf]  ;;  %v5714_v17 = vld [vmem:[%s11189_s2 + $0x79c] sm:$0xf0] }
 0x144   :  { %3684 = vmatpush.bf16.msra.mxu0 %v5537_v34  ;;  %3653 = vmatmul.bf16.vlgmr.msrb.gmra.mxu1 %v7917_v43  ;;  %v5934_v34 = vld [vmem:[%s11189_s2 + $0x954] sm:$0xf0] }
 0x145   :  { %3697 = vmatpush.bf16.msra.mxu1 %v5697_v37  ;;  %3666 = vmatmul.bf16.vlgmr.msrb.gmra.mxu2 %v7905_v35  ;;  %v5457_v37 = vor.u32 %v7108_v24, %v5454_v46  ;;  %v5937_v49 = vor.u32 %v7228_v31, %v5934_v34  ;;  %v7288_v46 = vld [vmem:[%s11189_s2 + $0xb24] sm:$0xf]  ;;  %v6494_v31 = vld [vmem:[%s11189_s2 + $0xdb4] sm:$0xf0]  ;;  %v5557_v34 = vor.u32 %v7133_v13, %v5554_v14  ;;  %v6114_v13 = vld [vmem:[%s11189_s2 + $0xabc] sm:$0xf0] }
 0x146   :  { %3710 = vmatpush.bf16.msra.mxu2 %v5857_v40  ;;  %3679 = vmatmul.bf16.vlgmr.msrb.gmra.mxu3 %v7915_v42  ;;  %v5617_v40 = vor.u32 %v7148_v25, %v5614_v28  ;;  %v6174_v25 = vld [vmem:[%s11189_s2 + $0xb34] sm:$0xf0]  ;;  %v5397_v28 = vor.u32 %v7093_v9, %v5394_v10  ;;  %v7273_v10 = vld [vmem:[%s11189_s2 + $0xaac] sm:$0xf] }
 0x147   :  { %3723 = vmatpush.bf16.msra.mxu3 %v6017_v48  ;;  %v7143_v48 = vld [vmem:[%s11189_s2 + $0x69c] sm:$0xf]  ;;  %v6177_v47 = vor.u32 %v7288_v46, %v6174_v25  ;;  %v7313_v14 = vld [vmem:[%s11189_s2 + $0xbec] sm:$0xf]  ;;  %v6594_v25 = vld [vmem:[%s11189_s2 + $0xe7c] sm:$0xf0] }
 0x148   :  { %3685 = vmatpush.bf16.msra.mxu0 %v5517_v55  ;;  %v3459_v50 = vpop.f32.mrf.mxu2  ;;  %v3435_v59 = vpop.f32.mrf.mxu0  ;;  %v5597_v62 = vor.u32 %v7143_v48, %v5594_v51  ;;  %v6154_v51 = vld [vmem:[%s11189_s2 + $0xb0c] sm:$0xf0]  ;;  %v7393_v46 = vld [vmem:[%s11189_s2 + $0xe6c] sm:$0xf] }
 0x149   :  { %3698 = vmatpush.bf16.msra.mxu1 %v5677_v56  ;;  %v9724_v55 = vadd.f32 %v3459_v50, %v3447_v27  ;;  %v9726_v56 = vpop.f32.mrf.mxu3  ;;  %v7283_v50 = vld [vmem:[%s11189_s2 + $0xafc] sm:$0xf]  ;;  %v6474_v59 = vld [vmem:[%s11189_s2 + $0xd8c] sm:$0xf0] }
 0x14a   :  { %3711 = vmatpush.bf16.msra.mxu2 %v5837_v57  ;;  %v7223_v57 = vld [vmem:[%s11189_s2 + $0x91c] sm:$0xf] }
 0x14b   :  { %3724 = vmatpush.bf16.msra.mxu3 %v5997_v61  ;;  %v3448_v61 = vpop.f32.mrf.mxu1 }
 0x14c   :  { %3686 = vmatpush.bf16.msra.mxu0 %v5497_v20  ;;  %v5917_v20 = vor.u32 %v7223_v57, %v5914_v58  ;;  %v6314_v57 = vld [vmem:[%s11189_s2 + $0xc4c] sm:$0xf0]  ;;  %v7363_v58 = vld [vmem:[%s11189_s2 + $0xd7c] sm:$0xf] }
 0x14d   :  { %3699 = vmatpush.bf16.msra.mxu1 %v5657_v3  ;;  %v5574_v3 = vld [vmem:[%s11189_s2 + $0x684] sm:$0xf0]  ;;  %v6634_v61 = vld [vmem:[%s11189_s2 + $0xecc] sm:$0xf0] }
 0x14e   :  { %3712 = vmatpush.bf16.msra.mxu2 %v5817_v4  ;;  %v7178_v4 = vld [vmem:[%s11189_s2 + $0x7b4] sm:$0xf]  ;;  %v5577_v11 = vor.u32 %v7138_v2, %v5574_v3  ;;  %v6134_v2 = vld [vmem:[%s11189_s2 + $0xae4] sm:$0xf0] }
 0x14f   :  { %3725 = vmatpush.bf16.msra.mxu3 %v5977_v8  ;;  %v5417_v8 = vor.u32 %v7098_v1, %v5414_v0  ;;  %v5737_v12 = vor.u32 %v7178_v4, %v5734_v5  ;;  %v6477_v1 = vor.u32 %v7363_v58, %v6474_v59  ;;  %v7278_v0 = vld [vmem:[%s11189_s2 + $0xad4] sm:$0xf]  ;;  %v6294_v4 = vld [vmem:[%s11189_s2 + $0xc24] sm:$0xf0]  ;;  %v7263_v58 = vld [vmem:[%s11189_s2 + $0xa5c] sm:$0xf] }
 0x150   :  { %3687 = vmatpush.bf16.msra.mxu0 %v5477_v16  ;;  %v5897_v16 = vor.u32 %v7218_v6, %v5894_v7  ;;  %v3461_v24 = vpop.f32.mrf.mxu2  ;;  %v7358_v5 = vld [vmem:[%s11189_s2 + $0xd54] sm:$0xf]  ;;  %v6454_v6 = vld [vmem:[%s11189_s2 + $0xd64] sm:$0xf0]  ;;  %v6137_v9 = vor.u32 %v7278_v0, %v6134_v2  ;;  %v6074_v59 = vld [vmem:[%s11189_s2 + $0xa6c] sm:$0xf0] }
 0x151   :  { %3700 = vmatpush.bf16.msra.mxu1 %v5637_v19  ;;  %v7213_v19 = vld [vmem:[%s11189_s2 + $0x8cc] sm:$0xf]  ;;  %v3474_v27 = vpop.f32.mrf.mxu3  ;;  %v7398_v7 = vld [vmem:[%s11189_s2 + $0xe94] sm:$0xf]  ;;  %v6434_v24 = vld [vmem:[%s11189_s2 + $0xd3c] sm:$0xf0] }
 0x152   :  { %3713 = vmatpush.bf16.msra.mxu2 %v5797_v21  ;;  %v5874_v21 = vld [vmem:[%s11189_s2 + $0x8dc] sm:$0xf0]  ;;  %v6394_v0 = vld [vmem:[%s11189_s2 + $0xcec] sm:$0xf0] }
 0x153   :  { %3726 = vmatpush.bf16.msra.mxu3 %v5957_v53  ;;  %v7328_v53 = vld [vmem:[%s11189_s2 + $0xc64] sm:$0xf]  ;;  %v5877_v45 = vor.u32 %v7213_v19, %v5874_v21  ;;  %v6274_v19 = vld [vmem:[%s11189_s2 + $0xbfc] sm:$0xf0]  ;;  %v7353_v21 = vld [vmem:[%s11189_s2 + $0xd2c] sm:$0xf] }
 0x154   :  { %3688 = vmatpush.bf16.msra.mxu0 %v5457_v37  ;;  %v5717_v37 = vor.u32 %v7173_v15, %v5714_v17  ;;  %v6337_v48 = vor.u32 %v7328_v53, %v6334_v29  ;;  %v9870_v15 = vld [vmem:[%s11190_s3] sm:$0x1f]  ;;  %v6117_v53 = vor.u32 %v7273_v10, %v6114_v13  ;;  %v6437_v29 = vor.u32 %v7353_v21, %v6434_v24  ;;  %v7258_v10 = vld [vmem:[%s11189_s2 + $0xa34] sm:$0xf]  ;;  %v6534_v24 = vld [vmem:[%s11189_s2 + $0xe04] sm:$0xf0] }
 0x155   :  { %3701 = vmatpush.bf16.msra.mxu1 %v5617_v40  ;;  %v7408_v40 = vld [vmem:[%s11189_s2 + $0xee4] sm:$0xf]  ;;  %v7378_v21 = vld [vmem:[%s11189_s2 + $0xdf4] sm:$0xf] }
 0x156   :  { %3714 = vmatpush.bf16.msra.mxu2 %v5777_v44  ;;  %v6654_v44 = vld [vmem:[%s11189_s2 + $0xef4] sm:$0xf0] }
 0x157   :  { %3727 = vmatpush.bf16.msra.mxu3 %v5937_v49  ;;  %v6497_v49 = vor.u32 %v7368_v30, %v6494_v31  ;;  %v6657_v54 = vor.u32 %v7408_v40, %v6654_v44  ;;  %v7268_v30 = vld [vmem:[%s11189_s2 + $0xa84] sm:$0xf]  ;;  %v6094_v31 = vld [vmem:[%s11189_s2 + $0xa94] sm:$0xf0]  ;;  %v6597_v44 = vor.u32 %v7393_v46, %v6594_v25  ;;  %v7253_v25 = vld [vmem:[%s11189_s2 + $0xa0c] sm:$0xf] }
 0x158   :  { %3689 = vmatpush.bf16.msra.mxu0 %v5437_v60  ;;  %v7403_v60 = vld [vmem:[%s11189_s2 + $0xebc] sm:$0xf] }
 0x159   :  { %3702 = vmatpush.bf16.msra.mxu1 %v5597_v62  ;;  %v6157_v62 = vor.u32 %v7283_v50, %v6154_v51  ;;  %v6637_v3 = vor.u32 %v7403_v60, %v6634_v61  ;;  %v6574_v50 = vld [vmem:[%s11189_s2 + $0xe54] sm:$0xf0]  ;;  %v7303_v60 = vld [vmem:[%s11189_s2 + $0xb9c] sm:$0xf] }
 0x15a   :  { %3715 = vmatpush.bf16.msra.mxu2 %v5757_v63  ;;  %v6317_v63 = vor.u32 %v7323_v52, %v6314_v57  ;;  %v6097_v52 = vor.u32 %v7268_v30, %v6094_v31  ;;  %v6194_v30 = vld [vmem:[%s11189_s2 + $0xb5c] sm:$0xf0]  ;;  %v7333_v31 = vld [vmem:[%s11189_s2 + $0xc8c] sm:$0xf] }
 0x15b   :  { %3728 = vmatpush.bf16.msra.mxu3 %v5917_v20  ;;  %v7318_v20 = vld [vmem:[%s11189_s2 + $0xc14] sm:$0xf] }
 0x15c   :  { %3690 = vmatpush.bf16.msra.mxu0 %v5417_v8  ;;  %v6614_v8 = vld [vmem:[%s11189_s2 + $0xea4] sm:$0xf0] }
 0x15d   :  { %3703 = vmatpush.bf16.msra.mxu1 %v5577_v11  ;;  %v6297_v11 = vor.u32 %v7318_v20, %v6294_v4  ;;  %v6617_v17 = vor.u32 %v7398_v7, %v6614_v8  ;;  %v6554_v4 = vld [vmem:[%s11189_s2 + $0xe2c] sm:$0xf0] }
 0x15e   :  { %3716 = vmatpush.bf16.msra.mxu2 %v5737_v12  ;;  %v6457_v12 = vor.u32 %v7358_v5, %v6454_v6  ;;  %v6077_v5 = vor.u32 %v7263_v58, %v6074_v59 }
 0x15f   :  { %3729 = vmatpush.bf16.msra.mxu3 %v5897_v16  ;;  %v660_v16 = vperm.slane %v9870_v15, 2 }
 0x160   :  { %3691 = vmatpush.bf16.msra.mxu0 %v5397_v28  ;;  %v3485_v27 = vpop.f32.mrf.mxu0  ;;  %v6277_v28 = vor.u32 %v7313_v14, %v6274_v19  ;;  %v6374_v19 = vld [vmem:[%s11189_s2 + $0xcc4] sm:$0xf0] }
 0x161   :  { %3704 = vmatpush.bf16.msra.mxu1 %v5557_v34  ;;  %v7308_v34 = vld [vmem:[%s11189_s2 + $0xbc4] sm:$0xf]  ;;  %v3498_v40 = vpop.f32.mrf.mxu1 }
 0x162   :  { %3717 = vmatpush.bf16.msra.mxu2 %v5717_v37  ;;  %v3486_v37 = vadd.f32 %v3485_v27, %v660_v16  ;;  %v6214_v16 = vld [vmem:[%s11189_s2 + $0xb84] sm:$0xf0] }
 0x163   :  { %3730 = vmatpush.bf16.msra.mxu3 %v5877_v45  ;;  %3692 = vmatmul.bf16.vlgmr.msra.gmra.mxu0 %v8030_v38  ;;  %v6254_v45 = vld [vmem:[%s11189_s2 + $0xbd4] sm:$0xf0] }
 0x164   :  { %3736 = vmatpush.bf16.msrb.mxu0 %v6177_v47  ;;  %3705 = vmatmul.bf16.vlgmr.msra.gmra.mxu1 %v8034_v41  ;;  %v7348_v47 = vld [vmem:[%s11189_s2 + $0xd04] sm:$0xf]  ;;  %v3499_v51 = vadd.f32 %v3498_v40, %v3486_v37  ;;  %v6537_v37 = vor.u32 %v7378_v21, %v6534_v24  ;;  %v6354_v40 = vld [vmem:[%s11189_s2 + $0xc9c] sm:$0xf0]  ;;  %v7001_v21 = vld [vmem:[%s11189_s2 + $0x228] sm:$0xf0] }
 0x165   :  { %3749 = vmatpush.bf16.msrb.mxu1 %v6337_v48  ;;  %3718 = vmatmul.bf16.vlgmr.msra.gmra.mxu2 %v8022_v33  ;;  %v6414_v48 = vld [vmem:[%s11189_s2 + $0xd14] sm:$0xf0]  ;;  %v6357_v59 = vor.u32 %v7333_v31, %v6354_v40  ;;  %v6956_v31 = vld [vmem:[%s11189_s2 + $0xc0] sm:$0xf0] }
 0x166   :  { %3762 = vmatpush.bf16.msrb.mxu2 %v6497_v49  ;;  %3731 = vmatmul.bf16.vlgmr.msra.gmra.mxu3 %v8032_v39  ;;  %v7388_v49 = vld [vmem:[%s11189_s2 + $0xe44] sm:$0xf]  ;;  %v6417_v57 = vor.u32 %v7348_v47, %v6414_v48  ;;  %v4900_v48 = vld [vmem:[%s11189_s2 + $0x128] sm:$0xf]  ;;  %v5180_v24 = vld [vmem:[%s11189_s2 + $0x358] sm:$0xf] }
 0x167   :  { %3775 = vmatpush.bf16.msrb.mxu3 %v6657_v54  ;;  %v6257_v54 = vor.u32 %v7308_v34, %v6254_v45  ;;  %v6514_v45 = vld [vmem:[%s11189_s2 + $0xddc] sm:$0xf0]  ;;  %v6996_v40 = vld [vmem:[%s11189_s2 + $0x200] sm:$0xf0] }
 0x168   :  { %3737 = vmatpush.bf16.msrb.mxu0 %v6157_v62  ;;  %v3511_v61 = vpop.f32.mrf.mxu2  ;;  %v6577_v62 = vor.u32 %v7388_v49, %v6574_v50  ;;  %v3487_v7 = vpop.f32.mrf.mxu0  ;;  %v6971_v49 = vld [vmem:[%s11189_s2 + $0x138] sm:$0xf0]  ;;  %v5060_v50 = vld [vmem:[%s11189_s2 + $0x268] sm:$0xf] }
 0x169   :  { %3750 = vmatpush.bf16.msrb.mxu1 %v6317_v63  ;;  %v6234_v63 = vld [vmem:[%s11189_s2 + $0xbac] sm:$0xf0]  ;;  %v3512_v2 = vadd.f32 %v3511_v61, %v3499_v51  ;;  %v3524_v20 = vpop.f32.mrf.mxu3  ;;  %v3500_v13 = vpop.f32.mrf.mxu1  ;;  %v7091_v61 = vld [vmem:[%s11189_s2 + $0x4f8] sm:$0xf0]  ;;  %v5200_v7 = vld [vmem:[%s11189_s2 + $0x380] sm:$0xf] }
 0x16a   :  { %3763 = vmatpush.bf16.msrb.mxu2 %v6477_v1  ;;  %v7343_v1 = vld [vmem:[%s11189_s2 + $0xcdc] sm:$0xf]  ;;  %v6237_v8 = vor.u32 %v7303_v60, %v6234_v63  ;;  %v5380_v60 = vld [vmem:[%s11189_s2 + $0x4e8] sm:$0xf]  ;;  %v4901_v63 = vor.u32 %v6971_v49, %v4900_v48  ;;  %v7076_v48 = vld [vmem:[%s11189_s2 + $0x480] sm:$0xf0] }
 0x16b   :  { %3776 = vmatpush.bf16.msrb.mxu3 %v6637_v3  ;;  %v7383_v3 = vld [vmem:[%s11189_s2 + $0xe1c] sm:$0xf]  ;;  %v9936_v6 = vadd.f32 %v3524_v20, %v3512_v2  ;;  %v4880_v2 = vld [vmem:[%s11189_s2 + $0x100] sm:$0xf]  ;;  %v6966_v20 = vld [vmem:[%s11189_s2 + $0x110] sm:$0xf0] }
 0x16c   :  { %3738 = vmatpush.bf16.msrb.mxu0 %v6137_v9  ;;  %v6397_v9 = vor.u32 %v7343_v1, %v6394_v0  ;;  %v6557_v14 = vor.u32 %v7383_v3, %v6554_v4  ;;  %v5040_v3 = vld [vmem:[%s11189_s2 + $0x240] sm:$0xf]  ;;  %v5381_v4 = vor.u32 %v7091_v61, %v5380_v60 }
 0x16d   :  { %3751 = vmatpush.bf16.msrb.mxu1 %v6297_v11  ;;  %v6054_v11 = vld [vmem:[%s11189_s2 + $0xa44] sm:$0xf0] }
 0x16e   :  { %3764 = vmatpush.bf16.msrb.mxu2 %v6457_v12  ;;  %v7298_v12 = vld [vmem:[%s11189_s2 + $0xb74] sm:$0xf]  ;;  %v6057_v46 = vor.u32 %v7258_v10, %v6054_v11  ;;  %v4881_v11 = vor.u32 %v6966_v20, %v4880_v2 }
 0x16f   :  { %3777 = vmatpush.bf16.msrb.mxu3 %v6617_v17  ;;  %v7338_v17 = vld [vmem:[%s11189_s2 + $0xcb4] sm:$0xf]  ;;  %v6217_v27 = vor.u32 %v7298_v12, %v6214_v16  ;;  %v6961_v16 = vld [vmem:[%s11189_s2 + $0xe8] sm:$0xf0] }
 0x170   :  { %3739 = vmatpush.bf16.msrb.mxu0 %v6117_v53  ;;  %v6034_v53 = vld [vmem:[%s11189_s2 + $0xa1c] sm:$0xf0]  ;;  %v3513_v34 = vpop.f32.mrf.mxu2  ;;  %v7086_v10 = vld [vmem:[%s11189_s2 + $0x4d0] sm:$0xf0] }
 0x171   :  { %3752 = vmatpush.bf16.msrb.mxu1 %v6277_v28  ;;  %v6377_v28 = vor.u32 %v7338_v17, %v6374_v19  ;;  %v3526_v47 = vpop.f32.mrf.mxu3  ;;  %v6037_v51 = vor.u32 %v7253_v25, %v6034_v53  ;;  %v5020_v17 = vld [vmem:[%s11189_s2 + $0x218] sm:$0xf]  ;;  %v7081_v53 = vld [vmem:[%s11189_s2 + $0x4a8] sm:$0xf0]  ;;  %v5000_v34 = vld [vmem:[%s11189_s2 + $0x1f0] sm:$0xf] }
 0x172   :  { %3765 = vmatpush.bf16.msrb.mxu2 %v6437_v29  ;;  %v7293_v29 = vld [vmem:[%s11189_s2 + $0xb4c] sm:$0xf]  ;;  %v5340_v25 = vld [vmem:[%s11189_s2 + $0x498] sm:$0xf]  ;;  %v5320_v47 = vld [vmem:[%s11189_s2 + $0x470] sm:$0xf] }
 0x173   :  { %3778 = vmatpush.bf16.msrb.mxu3 %v6597_v44  ;;  %v7373_v44 = vld [vmem:[%s11189_s2 + $0xdcc] sm:$0xf]  ;;  %v6197_v58 = vor.u32 %v7293_v29, %v6194_v30  ;;  %v4840_v30 = vld [vmem:[%s11189_s2 + $0xb0] sm:$0xf]  ;;  %v5321_v61 = vor.u32 %v7076_v48, %v5320_v47 }
 0x174   :  { %3740 = vmatpush.bf16.msrb.mxu0 %v6097_v52  ;;  %v7011_v52 = vld [vmem:[%s11189_s2 + $0x278] sm:$0xf0]  ;;  %v4841_v49 = vor.u32 %v6956_v31, %v4840_v30  ;;  %v4760_v48 = vld [vmem:[%s11189_s2 + $0x10] sm:$0xf] }
 0x175   :  { %3753 = vmatpush.bf16.msrb.mxu1 %v6257_v54  ;;  %v5220_v54 = vld [vmem:[%s11189_s2 + $0x3a8] sm:$0xf]  ;;  %v5061_v1 = vor.u32 %v7011_v52, %v5060_v50 }
 0x176   :  { %3766 = vmatpush.bf16.msrb.mxu2 %v6417_v57  ;;  %v7051_v57 = vld [vmem:[%s11189_s2 + $0x3b8] sm:$0xf0] }
 0x177   :  { %3779 = vmatpush.bf16.msrb.mxu3 %v6577_v62  ;;  %v6517_v62 = vor.u32 %v7373_v44, %v6514_v45  ;;  %v5221_v0 = vor.u32 %v7051_v57, %v5220_v54  ;;  %v5160_v44 = vld [vmem:[%s11189_s2 + $0x330] sm:$0xf]  ;;  %v7036_v45 = vld [vmem:[%s11189_s2 + $0x340] sm:$0xf0]  ;;  %v4820_v54 = vld [vmem:[%s11189_s2 + $0x88] sm:$0xf] }
 0x178   :  { %3741 = vmatpush.bf16.msrb.mxu0 %v6077_v5  ;;  %v7006_v5 = vld [vmem:[%s11189_s2 + $0x250] sm:$0xf0]  ;;  %v5161_v52 = vor.u32 %v7036_v45, %v5160_v44  ;;  %v6951_v57 = vld [vmem:[%s11189_s2 + $0x98] sm:$0xf0]  ;;  %v5260_v44 = vld [vmem:[%s11189_s2 + $0x3f8] sm:$0xf] }
 0x179   :  { %3754 = vmatpush.bf16.msrb.mxu1 %v6237_v8  ;;  %v7046_v8 = vld [vmem:[%s11189_s2 + $0x390] sm:$0xf0]  ;;  %v5041_v12 = vor.u32 %v7006_v5, %v5040_v3  ;;  %v4821_v20 = vor.u32 %v6951_v57, %v4820_v54  ;;  %v4800_v5 = vld [vmem:[%s11189_s2 + $0x60] sm:$0xf]  ;;  %v7061_v45 = vld [vmem:[%s11189_s2 + $0x408] sm:$0xf0] }
 0x17a   :  { %3767 = vmatpush.bf16.msrb.mxu2 %v6397_v9  ;;  %v5360_v9 = vld [vmem:[%s11189_s2 + $0x4c0] sm:$0xf]  ;;  %v5201_v13 = vor.u32 %v7046_v8, %v5200_v7  ;;  %v6946_v7 = vld [vmem:[%s11189_s2 + $0x70] sm:$0xf0]  ;;  %v6976_v54 = vld [vmem:[%s11189_s2 + $0x160] sm:$0xf0] }
 0x17b   :  { %3780 = vmatpush.bf16.msrb.mxu3 %v6557_v14  ;;  %v4860_v14 = vld [vmem:[%s11189_s2 + $0xd8] sm:$0xf]  ;;  %v5361_v19 = vor.u32 %v7086_v10, %v5360_v9  ;;  %v4960_v8 = vld [vmem:[%s11189_s2 + $0x1a0] sm:$0xf]  ;;  %v5080_v57 = vld [vmem:[%s11189_s2 + $0x290] sm:$0xf] }
 0x17c   :  { %3742 = vmatpush.bf16.msrb.mxu0 %v6057_v46  ;;  %v7041_v46 = vld [vmem:[%s11189_s2 + $0x368] sm:$0xf0] }
 0x17d   :  { %3755 = vmatpush.bf16.msrb.mxu1 %v6217_v27  ;;  %v4861_v27 = vor.u32 %v6961_v16, %v4860_v14  ;;  %v5181_v29 = vor.u32 %v7041_v46, %v5180_v24 }
 0x17e   :  { %3768 = vmatpush.bf16.msrb.mxu2 %v6377_v28  ;;  %v5021_v28 = vor.u32 %v7001_v21, %v5020_v17  ;;  %v5280_v17 = vld [vmem:[%s11189_s2 + $0x420] sm:$0xf]  ;;  %v4801_v21 = vor.u32 %v6946_v7, %v4800_v5 }
 0x17f   :  { %3781 = vmatpush.bf16.msrb.mxu3 %v6537_v37  ;;  %v5341_v37 = vor.u32 %v7081_v53, %v5340_v25 }
 0x180   :  { %3743 = vmatpush.bf16.msrb.mxu0 %v6037_v51  ;;  %v3537_v50 = vpop.f32.mrf.mxu0  ;;  %v5001_v51 = vor.u32 %v6996_v40, %v5000_v34  ;;  %v6981_v34 = vld [vmem:[%s11189_s2 + $0x188] sm:$0xf0] }
 0x181   :  { %3756 = vmatpush.bf16.msrb.mxu1 %v6197_v58  ;;  %v4980_v58 = vld [vmem:[%s11189_s2 + $0x1c8] sm:$0xf]  ;;  %v3550_v60 = vpop.f32.mrf.mxu1  ;;  %v7021_v40 = vld [vmem:[%s11189_s2 + $0x2c8] sm:$0xf0] }
 0x182   :  { %3769 = vmatpush.bf16.msrb.mxu2 %v6357_v59  ;;  %v3538_v59 = vadd.f32 %v3537_v50, %v9936_v6  ;;  %v7071_v6 = vld [vmem:[%s11189_s2 + $0x458] sm:$0xf0] }
 0x183   :  { %3782 = vmatpush.bf16.msrb.mxu3 %v6517_v62  ;;  %3744 = vmatmul.bf16.vlgmr.msrb.gmra.mxu0 %v8217_v18  ;;  %v6991_v62 = vld [vmem:[%s11189_s2 + $0x1d8] sm:$0xf0] }
 0x184   :  { %3788 = vmatpush.bf16.msra.mxu0 %v4901_v63  ;;  %3757 = vmatmul.bf16.vlgmr.msrb.gmra.mxu1 %v8230_v23  ;;  %v5140_v63 = vld [vmem:[%s11189_s2 + $0x308] sm:$0xf]  ;;  %v3551_v2 = vadd.f32 %v3550_v60, %v3538_v59  ;;  %v4981_v3 = vor.u32 %v6991_v62, %v4980_v58  ;;  %v5261_v59 = vor.u32 %v7061_v45, %v5260_v44  ;;  %v7016_v60 = vld [vmem:[%s11189_s2 + $0x2a0] sm:$0xf0]  ;;  %v7161_v44 = vld [vmem:[%s11189_s2 + $0x728] sm:$0xf0] }
 0x185   :  { %3801 = vmatpush.bf16.msra.mxu1 %v5061_v1  ;;  %3770 = vmatmul.bf16.vlgmr.msrb.gmra.mxu2 %v8228_v22  ;;  %v7031_v1 = vld [vmem:[%s11189_s2 + $0x318] sm:$0xf0]  ;;  %v7056_v62 = vld [vmem:[%s11189_s2 + $0x3e0] sm:$0xf0]  ;;  %v5081_v7 = vor.u32 %v7016_v60, %v5080_v57  ;;  %v5820_v45 = vld [vmem:[%s11189_s2 + $0x858] sm:$0xf] }
 0x186   :  { %3814 = vmatpush.bf16.msra.mxu2 %v5221_v0  ;;  %3783 = vmatmul.bf16.vlgmr.msrb.gmra.mxu3 %v8238_v26  ;;  %v5300_v0 = vld [vmem:[%s11189_s2 + $0x448] sm:$0xf]  ;;  %v5800_v57 = vld [vmem:[%s11189_s2 + $0x830] sm:$0xf] }
 0x187   :  { %3827 = vmatpush.bf16.msra.mxu3 %v5381_v4  ;;  %v5141_v4 = vor.u32 %v7031_v1, %v5140_v63  ;;  %v5301_v10 = vor.u32 %v7071_v6, %v5300_v0  ;;  %v5540_v1 = vld [vmem:[%s11189_s2 + $0x628] sm:$0xf]  ;;  %v7131_v0 = vld [vmem:[%s11189_s2 + $0x638] sm:$0xf0]  ;;  %v5960_v60 = vld [vmem:[%s11189_s2 + $0x970] sm:$0xf] }
 0x188   :  { %3789 = vmatpush.bf16.msra.mxu0 %v4881_v11  ;;  %v3563_v9 = vpop.f32.mrf.mxu2  ;;  %v6986_v11 = vld [vmem:[%s11189_s2 + $0x1b0] sm:$0xf0]  ;;  %v3539_v46 = vpop.f32.mrf.mxu0  ;;  %v5700_v6 = vld [vmem:[%s11189_s2 + $0x768] sm:$0xf] }
 0x189   :  { %3802 = vmatpush.bf16.msra.mxu1 %v5041_v12  ;;  %v5120_v12 = vld [vmem:[%s11189_s2 + $0x2e0] sm:$0xf]  ;;  %v3564_v14 = vadd.f32 %v3563_v9, %v3551_v2  ;;  %v3576_v16 = vpop.f32.mrf.mxu3  ;;  %v4961_v25 = vor.u32 %v6986_v11, %v4960_v8  ;;  %v3552_v30 = vpop.f32.mrf.mxu1  ;;  %v6020_v8 = vld [vmem:[%s11189_s2 + $0x9e8] sm:$0xf]  ;;  %v7251_v9 = vld [vmem:[%s11189_s2 + $0x9f8] sm:$0xf0]  ;;  %v5541_v11 = vor.u32 %v7131_v0, %v5540_v1 }
 0x18a   :  { %3815 = vmatpush.bf16.msra.mxu2 %v5201_v13  ;;  %v7026_v13 = vld [vmem:[%s11189_s2 + $0x2f0] sm:$0xf0]  ;;  %v5840_v46 = vld [vmem:[%s11189_s2 + $0x880] sm:$0xf] }
 0x18b   :  { %3828 = vmatpush.bf16.msra.mxu3 %v5361_v19  ;;  %v7066_v19 = vld [vmem:[%s11189_s2 + $0x430] sm:$0xf0]  ;;  %v10135_v24 = vadd.f32 %v3576_v16, %v3564_v14  ;;  %v5121_v53 = vor.u32 %v7026_v13, %v5120_v12  ;;  %v5520_v14 = vld [vmem:[%s11189_s2 + $0x600] sm:$0xf] }
 0x18c   :  { %3790 = vmatpush.bf16.msra.mxu0 %v4861_v27  ;;  %v4780_v27 = vld [vmem:[%s11189_s2 + $0x38] sm:$0xf]  ;;  %v5281_v31 = vor.u32 %v7066_v19, %v5280_v17  ;;  %v7126_v16 = vld [vmem:[%s11189_s2 + $0x610] sm:$0xf0]  ;;  %v5680_v17 = vld [vmem:[%s11189_s2 + $0x740] sm:$0xf]  ;;  %v6021_v19 = vor.u32 %v7251_v9, %v6020_v8 }
 0x18d   :  { %3803 = vmatpush.bf16.msra.mxu1 %v5021_v28  ;;  %v6941_v28 = vld [vmem:[%s11189_s2 + $0x48] sm:$0xf0]  ;;  %v7191_v8 = vld [vmem:[%s11189_s2 + $0x818] sm:$0xf0]  ;;  %v5940_v9 = vld [vmem:[%s11189_s2 + $0x948] sm:$0xf] }
 0x18e   :  { %3816 = vmatpush.bf16.msra.mxu2 %v5181_v29  ;;  %v4940_v29 = vld [vmem:[%s11189_s2 + $0x178] sm:$0xf]  ;;  %v4781_v47 = vor.u32 %v6941_v28, %v4780_v27  ;;  %v7246_v27 = vld [vmem:[%s11189_s2 + $0x9d0] sm:$0xf0]  ;;  %v5521_v28 = vor.u32 %v7126_v16, %v5520_v14  ;;  %v5440_v14 = vld [vmem:[%s11189_s2 + $0x560] sm:$0xf] }
 0x18f   :  { %3829 = vmatpush.bf16.msra.mxu3 %v5341_v37  ;;  %v5100_v37 = vld [vmem:[%s11189_s2 + $0x2b8] sm:$0xf]  ;;  %v4941_v50 = vor.u32 %v6981_v34, %v4940_v29  ;;  %v7121_v34 = vld [vmem:[%s11189_s2 + $0x5e8] sm:$0xf0]  ;;  %v7106_v16 = vld [vmem:[%s11189_s2 + $0x570] sm:$0xf0] }
 0x190   :  { %3791 = vmatpush.bf16.msra.mxu0 %v4841_v49  ;;  %v6936_v49 = vld [vmem:[%s11189_s2 + $0x20] sm:$0xf0]  ;;  %v3565_v58 = vpop.f32.mrf.mxu2 }
 0x191   :  { %3804 = vmatpush.bf16.msra.mxu1 %v5001_v51  ;;  %v5101_v51 = vor.u32 %v7021_v40, %v5100_v37  ;;  %v3578_v63 = vpop.f32.mrf.mxu3  ;;  %v4761_v2 = vor.u32 %v6936_v49, %v4760_v48  ;;  %v5660_v37 = vld [vmem:[%s11189_s2 + $0x718] sm:$0xf]  ;;  %v7241_v49 = vld [vmem:[%s11189_s2 + $0x9a8] sm:$0xf0]  ;;  %v7196_v58 = vld [vmem:[%s11189_s2 + $0x840] sm:$0xf0] }
 0x192   :  { %3817 = vmatpush.bf16.msra.mxu2 %v5161_v52  ;;  %v4920_v52 = vld [vmem:[%s11189_s2 + $0x150] sm:$0xf]  ;;  %v5980_v48 = vld [vmem:[%s11189_s2 + $0x998] sm:$0xf] }
 0x193   :  { %3830 = vmatpush.bf16.msra.mxu3 %v5321_v61  ;;  %v5240_v61 = vld [vmem:[%s11189_s2 + $0x3d0] sm:$0xf]  ;;  %v4921_v5 = vor.u32 %v6976_v54, %v4920_v52  ;;  %v7116_v54 = vld [vmem:[%s11189_s2 + $0x5c0] sm:$0xf0] }
 0x194   :  { %3792 = vmatpush.bf16.msra.mxu0 %v4821_v20  ;;  %v7171_v20 = vld [vmem:[%s11189_s2 + $0x778] sm:$0xf0]  ;;  %v5480_v52 = vld [vmem:[%s11189_s2 + $0x5b0] sm:$0xf] }
 0x195   :  { %3805 = vmatpush.bf16.msra.mxu1 %v4981_v3  ;;  %v5860_v3 = vld [vmem:[%s11189_s2 + $0x8a8] sm:$0xf]  ;;  %v5701_v12 = vor.u32 %v7171_v20, %v5700_v6  ;;  %v5481_v63 = vor.u32 %v7116_v54, %v5480_v52  ;;  %v5801_v6 = vor.u32 %v7196_v58, %v5800_v57  ;;  %v7111_v20 = vld [vmem:[%s11189_s2 + $0x598] sm:$0xf0]  ;;  %v7181_v52 = vld [vmem:[%s11189_s2 + $0x7c8] sm:$0xf0] }
 0x196   :  { %3818 = vmatpush.bf16.msra.mxu2 %v5141_v4  ;;  %v7211_v4 = vld [vmem:[%s11189_s2 + $0x8b8] sm:$0xf0]  ;;  %v5900_v54 = vld [vmem:[%s11189_s2 + $0x8f8] sm:$0xf]  ;;  %v7096_v57 = vld [vmem:[%s11189_s2 + $0x520] sm:$0xf0] }
 0x197   :  { %3831 = vmatpush.bf16.msra.mxu3 %v5301_v10  ;;  %v5241_v10 = vor.u32 %v7056_v62, %v5240_v61  ;;  %v5861_v13 = vor.u32 %v7211_v4, %v5860_v3  ;;  %v7236_v61 = vld [vmem:[%s11189_s2 + $0x980] sm:$0xf0]  ;;  %v5620_v3 = vld [vmem:[%s11189_s2 + $0x6c8] sm:$0xf] }
 0x198   :  { %3793 = vmatpush.bf16.msra.mxu0 %v4801_v21  ;;  %v7166_v21 = vld [vmem:[%s11189_s2 + $0x750] sm:$0xf0] }
 0x199   :  { %3806 = vmatpush.bf16.msra.mxu1 %v4961_v25  ;;  %v7206_v25 = vld [vmem:[%s11189_s2 + $0x890] sm:$0xf0]  ;;  %v5681_v29 = vor.u32 %v7166_v21, %v5680_v17  ;;  %v5600_v17 = vld [vmem:[%s11189_s2 + $0x6a0] sm:$0xf] }
 0x19a   :  { %3819 = vmatpush.bf16.msra.mxu2 %v5121_v53  ;;  %v6000_v53 = vld [vmem:[%s11189_s2 + $0x9c0] sm:$0xf]  ;;  %v5841_v30 = vor.u32 %v7206_v25, %v5840_v46  ;;  %v7146_v46 = vld [vmem:[%s11189_s2 + $0x6b0] sm:$0xf0] }
 0x19b   :  { %3832 = vmatpush.bf16.msra.mxu3 %v5281_v31  ;;  %v5500_v31 = vld [vmem:[%s11189_s2 + $0x5d8] sm:$0xf]  ;;  %v6001_v40 = vor.u32 %v7246_v27, %v6000_v53  ;;  %v5760_v25 = vld [vmem:[%s11189_s2 + $0x7e0] sm:$0xf]  ;;  %v7186_v53 = vld [vmem:[%s11189_s2 + $0x7f0] sm:$0xf0] }
 0x19c   :  { %3794 = vmatpush.bf16.msra.mxu0 %v4781_v47  ;;  %v7201_v47 = vld [vmem:[%s11189_s2 + $0x868] sm:$0xf0] }
 0x19d   :  { %3807 = vmatpush.bf16.msra.mxu1 %v4941_v50  ;;  %v5501_v50 = vor.u32 %v7121_v34, %v5500_v31  ;;  %v5441_v34 = vor.u32 %v7106_v16, %v5440_v14 }
 0x19e   :  { %3820 = vmatpush.bf16.msra.mxu2 %v5101_v51  ;;  %v5661_v51 = vor.u32 %v7161_v44, %v5660_v37  ;;  %v5601_v44 = vor.u32 %v7146_v46, %v5600_v17  ;;  %v7286_v46 = vld [vmem:[%s11189_s2 + $0xb10] sm:$0xf0] }
 0x19f   :  { %3833 = vmatpush.bf16.msra.mxu3 %v5261_v59 }
 0x1a0   :  { %3795 = vmatpush.bf16.msra.mxu0 %v4761_v2  ;;  %v3589_v59 = vpop.f32.mrf.mxu0  ;;  %v5460_v2 = vld [vmem:[%s11189_s2 + $0x588] sm:$0xf] }
 0x1a1   :  { %3808 = vmatpush.bf16.msra.mxu1 %v4921_v5  ;;  %v3590_v62 = vadd.f32 %v3589_v59, %v10135_v24  ;;  %v3602_v1 = vpop.f32.mrf.mxu1  ;;  %v5961_v24 = vor.u32 %v7236_v61, %v5960_v60  ;;  %v7151_v5 = vld [vmem:[%s11189_s2 + $0x6d8] sm:$0xf0]  ;;  %v5560_v60 = vld [vmem:[%s11189_s2 + $0x650] sm:$0xf]  ;;  %v7136_v61 = vld [vmem:[%s11189_s2 + $0x660] sm:$0xf0] }
 0x1a2   :  { %3821 = vmatpush.bf16.msra.mxu2 %v5081_v7  ;;  %v5780_v7 = vld [vmem:[%s11189_s2 + $0x808] sm:$0xf] }
 0x1a3   :  { %3834 = vmatpush.bf16.msra.mxu3 %v5241_v10  ;;  %3796 = vmatmul.bf16.vlgmr.msra.gmra.mxu0 %v7907_v36  ;;  %v5640_v36 = vld [vmem:[%s11189_s2 + $0x6f0] sm:$0xf]  ;;  %v3603_v4 = vadd.f32 %v3602_v1, %v3590_v62  ;;  %v7231_v10 = vld [vmem:[%s11189_s2 + $0x958] sm:$0xf0]  ;;  %v7176_v1 = vld [vmem:[%s11189_s2 + $0x7a0] sm:$0xf0] }
 0x1a4   :  { %3840 = vmatpush.bf16.msrb.mxu0 %v5541_v11  ;;  %3809 = vmatmul.bf16.vlgmr.msra.gmra.mxu1 %v7917_v43  ;;  %v7156_v43 = vld [vmem:[%s11189_s2 + $0x700] sm:$0xf0]  ;;  %v5461_v11 = vor.u32 %v7111_v20, %v5460_v2  ;;  %v5720_v62 = vld [vmem:[%s11189_s2 + $0x790] sm:$0xf]  ;;  %v6180_v20 = vld [vmem:[%s11189_s2 + $0xb28] sm:$0xf] }
 0x1a5   :  { %3853 = vmatpush.bf16.msrb.mxu1 %v5701_v12  ;;  %3822 = vmatmul.bf16.vlgmr.msra.gmra.mxu2 %v7905_v35  ;;  %v5821_v35 = vor.u32 %v7201_v47, %v5820_v45  ;;  %v5641_v0 = vor.u32 %v7156_v43, %v5640_v36  ;;  %v5621_v12 = vor.u32 %v7151_v5, %v5620_v3  ;;  %v5420_v47 = vld [vmem:[%s11189_s2 + $0x538] sm:$0xf]  ;;  %v7221_v36 = vld [vmem:[%s11189_s2 + $0x908] sm:$0xf0]  ;;  %v5400_v43 = vld [vmem:[%s11189_s2 + $0x510] sm:$0xf] }
 0x1a6   :  { %3866 = vmatpush.bf16.msrb.mxu2 %v5861_v13  ;;  %3835 = vmatmul.bf16.vlgmr.msra.gmra.mxu3 %v7915_v42  ;;  %v5981_v42 = vor.u32 %v7241_v49, %v5980_v48  ;;  %v5781_v13 = vor.u32 %v7191_v8, %v5780_v7  ;;  %v5761_v45 = vor.u32 %v7186_v53, %v5760_v25  ;;  %v7101_v48 = vld [vmem:[%s11189_s2 + $0x548] sm:$0xf0]  ;;  %v5580_v49 = vld [vmem:[%s11189_s2 + $0x678] sm:$0xf]  ;;  %v7291_v3 = vld [vmem:[%s11189_s2 + $0xb38] sm:$0xf0] }
 0x1a7   :  { %3879 = vmatpush.bf16.msrb.mxu3 %v6021_v19  ;;  %v5941_v19 = vor.u32 %v7231_v10, %v5940_v9  ;;  %v5401_v5 = vor.u32 %v7096_v57, %v5400_v43  ;;  %v7331_v7 = vld [vmem:[%s11189_s2 + $0xc78] sm:$0xf0]  ;;  %v6500_v8 = vld [vmem:[%s11189_s2 + $0xda8] sm:$0xf]  ;;  %v5561_v10 = vor.u32 %v7136_v61, %v5560_v60  ;;  %v6181_v16 = vor.u32 %v7291_v3, %v6180_v20  ;;  %v6320_v25 = vld [vmem:[%s11189_s2 + $0xc40] sm:$0xf] }
 0x1a8   :  { %3841 = vmatpush.bf16.msrb.mxu0 %v5521_v28  ;;  %v3615_v21 = vpop.f32.mrf.mxu2  ;;  %v3591_v31 = vpop.f32.mrf.mxu0  ;;  %v7371_v9 = vld [vmem:[%s11189_s2 + $0xdb8] sm:$0xf0]  ;;  %v7276_v57 = vld [vmem:[%s11189_s2 + $0xac0] sm:$0xf0]  ;;  %v6600_v61 = vld [vmem:[%s11189_s2 + $0xe70] sm:$0xf] }
 0x1a9   :  { %3854 = vmatpush.bf16.msrb.mxu1 %v5681_v29  ;;  %v3616_v27 = vadd.f32 %v3615_v21, %v3603_v4  ;;  %v3628_v28 = vpop.f32.mrf.mxu3  ;;  %v5920_v29 = vld [vmem:[%s11189_s2 + $0x920] sm:$0xf]  ;;  %v3604_v37 = vpop.f32.mrf.mxu1  ;;  %v7406_v31 = vld [vmem:[%s11189_s2 + $0xed0] sm:$0xf0]  ;;  %v7356_v60 = vld [vmem:[%s11189_s2 + $0xd40] sm:$0xf0] }
 0x1aa   :  { %3867 = vmatpush.bf16.msrb.mxu2 %v5841_v30  ;;  %v7226_v30 = vld [vmem:[%s11189_s2 + $0x930] sm:$0xf0]  ;;  %v6160_v21 = vld [vmem:[%s11189_s2 + $0xb00] sm:$0xf]  ;;  %v6260_v20 = vld [vmem:[%s11189_s2 + $0xbc8] sm:$0xf] }
 0x1ab   :  { %3880 = vmatpush.bf16.msrb.mxu3 %v6001_v40  ;;  %v10334_v40 = vadd.f32 %v3628_v28, %v3616_v27  ;;  %v7326_v27 = vld [vmem:[%s11189_s2 + $0xc50] sm:$0xf0]  ;;  %v6480_v28 = vld [vmem:[%s11189_s2 + $0xd80] sm:$0xf] }
 0x1ac   :  { %3842 = vmatpush.bf16.msrb.mxu0 %v5501_v50  ;;  %v5921_v50 = vor.u32 %v7226_v30, %v5920_v29  ;;  %v7366_v29 = vld [vmem:[%s11189_s2 + $0xd90] sm:$0xf0]  ;;  %v6640_v30 = vld [vmem:[%s11189_s2 + $0xec0] sm:$0xf]  ;;  %v6321_v37 = vor.u32 %v7326_v27, %v6320_v25 }
 0x1ad   :  { %3855 = vmatpush.bf16.msrb.mxu1 %v5661_v51  ;;  %v7141_v51 = vld [vmem:[%s11189_s2 + $0x688] sm:$0xf0]  ;;  %v7306_v25 = vld [vmem:[%s11189_s2 + $0xbb0] sm:$0xf0] }
 0x1ae   :  { %3868 = vmatpush.bf16.msrb.mxu2 %v5821_v35  ;;  %v5740_v35 = vld [vmem:[%s11189_s2 + $0x7b8] sm:$0xf]  ;;  %v5581_v58 = vor.u32 %v7141_v51, %v5580_v49  ;;  %v6641_v49 = vor.u32 %v7406_v31, %v6640_v30  ;;  %v7346_v27 = vld [vmem:[%s11189_s2 + $0xcf0] sm:$0xf0]  ;;  %v6560_v30 = vld [vmem:[%s11189_s2 + $0xe20] sm:$0xf] }
 0x1af   :  { %3881 = vmatpush.bf16.msrb.mxu3 %v5981_v42  ;;  %v5421_v42 = vor.u32 %v7101_v48, %v5420_v47  ;;  %v5741_v59 = vor.u32 %v7181_v52, %v5740_v35  ;;  %v7281_v47 = vld [vmem:[%s11189_s2 + $0xae8] sm:$0xf0]  ;;  %v6300_v48 = vld [vmem:[%s11189_s2 + $0xc18] sm:$0xf]  ;;  %v7386_v31 = vld [vmem:[%s11189_s2 + $0xe30] sm:$0xf0] }
 0x1b0   :  { %3843 = vmatpush.bf16.msrb.mxu0 %v5481_v63  ;;  %v5901_v63 = vor.u32 %v7221_v36, %v5900_v54  ;;  %v3617_v2 = vpop.f32.mrf.mxu2  ;;  %v6460_v51 = vld [vmem:[%s11189_s2 + $0xd58] sm:$0xf]  ;;  %v7361_v35 = vld [vmem:[%s11189_s2 + $0xd68] sm:$0xf0]  ;;  %v6120_v36 = vld [vmem:[%s11189_s2 + $0xab0] sm:$0xf] }
 0x1b1   :  { %3856 = vmatpush.bf16.msrb.mxu1 %v5641_v0  ;;  %v5880_v0 = vld [vmem:[%s11189_s2 + $0x8d0] sm:$0xf]  ;;  %v3630_v4 = vpop.f32.mrf.mxu3  ;;  %v6620_v52 = vld [vmem:[%s11189_s2 + $0xe98] sm:$0xf]  ;;  %v6461_v43 = vor.u32 %v7361_v35, %v6460_v51  ;;  %v7271_v2 = vld [vmem:[%s11189_s2 + $0xa98] sm:$0xf0]  ;;  %v6561_v35 = vor.u32 %v7386_v31, %v6560_v30 }
 0x1b2   :  { %3869 = vmatpush.bf16.msrb.mxu2 %v5801_v6  ;;  %v7216_v6 = vld [vmem:[%s11189_s2 + $0x8e0] sm:$0xf0] }
 0x1b3   :  { %3882 = vmatpush.bf16.msrb.mxu3 %v5961_v24  ;;  %v6340_v24 = vld [vmem:[%s11189_s2 + $0xc68] sm:$0xf]  ;;  %v5881_v14 = vor.u32 %v7216_v6, %v5880_v0 }
 0x1b4   :  { %3844 = vmatpush.bf16.msrb.mxu0 %v5461_v11  ;;  %v5721_v11 = vor.u32 %v7176_v1, %v5720_v62  ;;  %v6341_v17 = vor.u32 %v7331_v7, %v6340_v24  ;;  %v6121_v62 = vor.u32 %v7276_v57, %v6120_v36  ;;  %v6100_v6 = vld [vmem:[%s11189_s2 + $0xa88] sm:$0xf]  ;;  %v6540_v36 = vld [vmem:[%s11189_s2 + $0xdf8] sm:$0xf] }
 0x1b5   :  { %3857 = vmatpush.bf16.msrb.mxu1 %v5621_v12  ;;  %v6660_v12 = vld [vmem:[%s11189_s2 + $0xee8] sm:$0xf] }
 0x1b6   :  { %3870 = vmatpush.bf16.msrb.mxu2 %v5781_v13  ;;  %v7411_v13 = vld [vmem:[%s11189_s2 + $0xef8] sm:$0xf0]  ;;  %v6420_v7 = vld [vmem:[%s11189_s2 + $0xd08] sm:$0xf] }
 0x1b7   :  { %3883 = vmatpush.bf16.msrb.mxu3 %v5941_v19  ;;  %v6501_v19 = vor.u32 %v7371_v9, %v6500_v8  ;;  %v6661_v53 = vor.u32 %v7411_v13, %v6660_v12  ;;  %v7351_v8 = vld [vmem:[%s11189_s2 + $0xd18] sm:$0xf0]  ;;  %v6580_v9 = vld [vmem:[%s11189_s2 + $0xe48] sm:$0xf]  ;;  %v6101_v12 = vor.u32 %v7271_v2, %v6100_v6 }
 0x1b8   :  { %3845 = vmatpush.bf16.msrb.mxu0 %v5441_v34  ;;  %v6161_v34 = vor.u32 %v7286_v46, %v6160_v21 }
 0x1b9   :  { %3858 = vmatpush.bf16.msrb.mxu1 %v5601_v44  ;;  %v6481_v44 = vor.u32 %v7366_v29, %v6480_v28 }
 0x1ba   :  { %3871 = vmatpush.bf16.msrb.mxu2 %v5761_v45  ;;  %v6140_v45 = vld [vmem:[%s11189_s2 + $0xad8] sm:$0xf] }
 0x1bb   :  { %3884 = vmatpush.bf16.msrb.mxu3 %v5921_v50  ;;  %v7321_v50 = vld [vmem:[%s11189_s2 + $0xc28] sm:$0xf0]  ;;  %v6141_v54 = vor.u32 %v7281_v47, %v6140_v45 }
 0x1bc   :  { %3846 = vmatpush.bf16.msrb.mxu0 %v5421_v42  ;;  %v6301_v42 = vor.u32 %v7321_v50, %v6300_v48  ;;  %v6060_v48 = vld [vmem:[%s11189_s2 + $0xa38] sm:$0xf] }
 0x1bd   :  { %3859 = vmatpush.bf16.msrb.mxu1 %v5581_v58  ;;  %v7316_v58 = vld [vmem:[%s11189_s2 + $0xc00] sm:$0xf0]  ;;  %v6220_v50 = vld [vmem:[%s11189_s2 + $0xb78] sm:$0xf] }
 0x1be   :  { %3872 = vmatpush.bf16.msrb.mxu2 %v5741_v59  ;;  %v6440_v59 = vld [vmem:[%s11189_s2 + $0xd30] sm:$0xf] }
 0x1bf   :  { %3885 = vmatpush.bf16.msrb.mxu3 %v5901_v63  ;;  %v6441_v0 = vor.u32 %v7356_v60, %v6440_v59 }
 0x1c0   :  { %3847 = vmatpush.bf16.msrb.mxu0 %v5401_v5  ;;  %v3641_v63 = vpop.f32.mrf.mxu0  ;;  %v7311_v5 = vld [vmem:[%s11189_s2 + $0xbd8] sm:$0xf0] }
 0x1c1   :  { %3860 = vmatpush.bf16.msrb.mxu1 %v5561_v10  ;;  %v3654_v24 = vpop.f32.mrf.mxu1  ;;  %v7391_v10 = vld [vmem:[%s11189_s2 + $0xe58] sm:$0xf0]  ;;  %v6261_v13 = vor.u32 %v7311_v5, %v6260_v20 }
 0x1c2   :  { %3873 = vmatpush.bf16.msrb.mxu2 %v5721_v11  ;;  %v6581_v46 = vor.u32 %v7391_v10, %v6580_v9 }
 0x1c3   :  { %3886 = vmatpush.bf16.msrb.mxu3 %v5881_v14  ;;  %3848 = vmatmul.bf16.vlgmr.msrb.gmra.mxu0 %v8030_v38  ;;  %v6280_v38 = vld [vmem:[%s11189_s2 + $0xbf0] sm:$0xf]  ;;  %v6421_v14 = vor.u32 %v7351_v8, %v6420_v7 }
 0x1c4   :  { %3892 = vmatpush.bf16.msra.mxu0 %v6181_v16  ;;  %3861 = vmatmul.bf16.vlgmr.msrb.gmra.mxu1 %v8034_v41  ;;  %v6281_v1 = vor.u32 %v7316_v58, %v6280_v38  ;;  %v6080_v16 = vld [vmem:[%s11189_s2 + $0xa60] sm:$0xf]  ;;  %v6200_v58 = vld [vmem:[%s11189_s2 + $0xb50] sm:$0xf] }
 0x1c5   :  { %3905 = vmatpush.bf16.msra.mxu1 %v6341_v17  ;;  %3874 = vmatmul.bf16.vlgmr.msrb.gmra.mxu2 %v8022_v33  ;;  %v7401_v33 = vld [vmem:[%s11189_s2 + $0xea8] sm:$0xf0]  ;;  %v7266_v17 = vld [vmem:[%s11189_s2 + $0xa70] sm:$0xf0] }
 0x1c6   :  { %3918 = vmatpush.bf16.msra.mxu2 %v6501_v19  ;;  %3887 = vmatmul.bf16.vlgmr.msrb.gmra.mxu3 %v8032_v39  ;;  %v661_v39 = vperm.slane %v9870_v15, 3  ;;  %v6621_v41 = vor.u32 %v7401_v33, %v6620_v52  ;;  %v7396_v15 = vld [vmem:[%s11189_s2 + $0xe80] sm:$0xf0]  ;;  %v6240_v19 = vld [vmem:[%s11189_s2 + $0xba0] sm:$0xf] }
 0x1c7   :  { %3931 = vmatpush.bf16.msra.mxu3 %v6661_v53  ;;  %v6601_v4 = vor.u32 %v7396_v15, %v6600_v61  ;;  %v6400_v53 = vld [vmem:[%s11189_s2 + $0xce0] sm:$0xf]  ;;  %v6241_v45 = vor.u32 %v7306_v25, %v6240_v19  ;;  %v7301_v52 = vld [vmem:[%s11189_s2 + $0xb88] sm:$0xf0]  ;;  %v6380_v33 = vld [vmem:[%s11189_s2 + $0xcb8] sm:$0xf] }
 0x1c8   :  { %3893 = vmatpush.bf16.msra.mxu0 %v6161_v34  ;;  %v3642_v3 = vadd.f32 %v3641_v63, %v661_v39  ;;  %v3667_v21 = vpop.f32.mrf.mxu2  ;;  %v6081_v34 = vor.u32 %v7266_v17, %v6080_v16  ;;  %v6401_v47 = vor.u32 %v7346_v27, %v6400_v53  ;;  %v6221_v57 = vor.u32 %v7301_v52, %v6220_v50  ;;  %v6040_v39 = vld [vmem:[%s11189_s2 + $0xa10] sm:$0xf]  ;;  %v7296_v61 = vld [vmem:[%s11189_s2 + $0xb60] sm:$0xf0] }
 0x1c9   :  { %3906 = vmatpush.bf16.msra.mxu1 %v6321_v37  ;;  %v3680_v29 = vpop.f32.mrf.mxu3  ;;  %v3656_v51 = vpop.f32.mrf.mxu1  ;;  %v6360_v15 = vld [vmem:[%s11189_s2 + $0xc90] sm:$0xf]  ;;  %v6201_v2 = vor.u32 %v7296_v61, %v6200_v58 }
 0x1ca   :  { %3919 = vmatpush.bf16.msra.mxu2 %v6481_v44  ;;  %v3655_v11 = vadd.f32 %v3654_v24, %v3642_v3  ;;  %v3643_v44 = vpop.f32.mrf.mxu0 }
 0x1cb   :  { %3932 = vmatpush.bf16.msra.mxu3 %v6641_v49  ;;  %v7261_v49 = vld [vmem:[%s11189_s2 + $0xa48] sm:$0xf0] }
 0x1cc   :  { %3894 = vmatpush.bf16.msra.mxu0 %v6141_v54  ;;  %v3668_v28 = vadd.f32 %v3667_v21, %v3655_v11  ;;  %v7341_v54 = vld [vmem:[%s11189_s2 + $0xcc8] sm:$0xf0] }
 0x1cd   :  { %3907 = vmatpush.bf16.msra.mxu1 %v6301_v42  ;;  %v7381_v42 = vld [vmem:[%s11189_s2 + $0xe08] sm:$0xf0]  ;;  %v6381_v38 = vor.u32 %v7341_v54, %v6380_v33 }
 0x1ce   :  { %3920 = vmatpush.bf16.msra.mxu2 %v6461_v43  ;;  %v3681_v37 = vadd.f32 %v3680_v29, %v3668_v28  ;;  %v6061_v43 = vor.u32 %v7261_v49, %v6060_v48  ;;  %v6541_v60 = vor.u32 %v7381_v42, %v6540_v36  ;;  %v7495_v48 = vld [vmem:[%s11190_s3] sm:$0x1f] }
 0x1cf   :  { %3933 = vmatpush.bf16.msra.mxu3 %v6621_v41  ;;  %v7256_v41 = vld [vmem:[%s11189_s2 + $0xa20] sm:$0xf0]  ;;  %v662_v49 = vperm.slane %v7495_v48, 4 }
 0x1d0   :  { %3895 = vmatpush.bf16.msra.mxu0 %v6121_v62  ;;  %v3669_v59 = vpop.f32.mrf.mxu2  ;;  %v7336_v62 = vld [vmem:[%s11189_s2 + $0xca0] sm:$0xf0]  ;;  %v6041_v6 = vor.u32 %v7256_v41, %v6040_v39 }
 0x1d1   :  { %3908 = vmatpush.bf16.msra.mxu1 %v6281_v1  ;;  %v3682_v63 = vpop.f32.mrf.mxu3  ;;  %v6520_v1 = vld [vmem:[%s11189_s2 + $0xdd0] sm:$0xf]  ;;  %v6361_v20 = vor.u32 %v7336_v62, %v6360_v15 }
 0x1d2   :  { %3921 = vmatpush.bf16.msra.mxu2 %v6441_v0  ;;  %v7376_v0 = vld [vmem:[%s11189_s2 + $0xde0] sm:$0xf0] }
 0x1d3   :  { %3934 = vmatpush.bf16.msra.mxu3 %v6601_v4  ;;  %v6521_v3 = vor.u32 %v7376_v0, %v6520_v1  ;;  %v3945_v0 = vsel %vm3944_vm0, %v9133_v32, 0.0 }
 0x1d4   :  { %3896 = vmatpush.bf16.msra.mxu0 %v6101_v12 }
 0x1d5   :  { %3909 = vmatpush.bf16.msra.mxu1 %v6261_v13 }
 0x1d6   :  { %3922 = vmatpush.bf16.msra.mxu2 %v6421_v14 }
 0x1d7   :  { %3935 = vmatpush.bf16.msra.mxu3 %v6581_v46 }
 0x1d8   :  { %3897 = vmatpush.bf16.msra.mxu0 %v6081_v34 }
 0x1d9   :  { %3910 = vmatpush.bf16.msra.mxu1 %v6241_v45 }
 0x1da   :  { %3923 = vmatpush.bf16.msra.mxu2 %v6401_v47 }
 0x1db   :  { %3936 = vmatpush.bf16.msra.mxu3 %v6561_v35 }
 0x1dc   :  { %3898 = vmatpush.bf16.msra.mxu0 %v6061_v43 }
 0x1dd   :  { %3911 = vmatpush.bf16.msra.mxu1 %v6221_v57 }
 0x1de   :  { %3924 = vmatpush.bf16.msra.mxu2 %v6381_v38 }
 0x1df   :  { %3937 = vmatpush.bf16.msra.mxu3 %v6541_v60  ;;  %v10592_v60 = vadd.f32 %v9726_v56, %v9724_v55 }
 0x1e0   :  { %3899 = vmatpush.bf16.msra.mxu0 %v6041_v6  ;;  %v3693_v24 = vpop.f32.mrf.mxu0  ;;  %v3948_v6 = vsel %vm3944_vm0, %v10334_v40, 0.0 }
 0x1e1   :  { %3912 = vmatpush.bf16.msra.mxu1 %v6201_v2  ;;  %v3694_v4 = vadd.f32 %v3693_v24, %v3681_v37  ;;  %v3706_v5 = vpop.f32.mrf.mxu1  ;;  %v3946_v1 = vsel %vm3944_vm0, %v10592_v60, 0.0 }
 0x1e2   :  { %3925 = vmatpush.bf16.msra.mxu2 %v6361_v20  ;;  %v3947_v20 = vadd.f32 %v3946_v1, %v3945_v0  ;;  %v6840_v1 = vld [vmem:[%s11191_s4 + $0x160] sm:$0xf] }
 0x1e3   :  { %3938 = vmatpush.bf16.msra.mxu3 %v6521_v3  ;;  %3900 = vmatmul.bf16.vlgmr.msra.gmra.mxu0 %v8217_v18  ;;  %v3707_v7 = vadd.f32 %v3706_v5, %v3694_v4 }
 0x1e4   :  { %3913 = vmatmul.bf16.vlgmr.msra.gmra.mxu1 %v8230_v23  ;;  %v3949_v5 = vadd.f32 %v3948_v6, %v3947_v20  ;;  %v7457_v6 = vld [vmem:[%s11191_s4 + $0x164] sm:$0xf0] }
 0x1e5   :  { %3926 = vmatmul.bf16.vlgmr.msra.gmra.mxu2 %v8228_v22 }
 0x1e6   :  { %3939 = vmatmul.bf16.vlgmr.msra.gmra.mxu3 %v8238_v26 }
 0x1e8   :  { %v3719_v8 = vpop.f32.mrf.mxu2  ;;  %v3695_v12 = vpop.f32.mrf.mxu0 }
 0x1e9   :  { %v3720_v9 = vadd.f32 %v3719_v8, %v3707_v7  ;;  %v3732_v10 = vpop.f32.mrf.mxu3  ;;  %v3708_v13 = vpop.f32.mrf.mxu1 }
 0x1eb   :  { %v3733_v11 = vadd.f32 %v3732_v10, %v3720_v9 }
 0x1f0   :  { %v3721_v14 = vpop.f32.mrf.mxu2 }
 0x1f1   :  { %v3734_v16 = vpop.f32.mrf.mxu3  ;;  %v7522_v14 = vmov 524.0  }
 0x1f2   :  { %7482 = vrcp.f32 %v7522_v14 }
 0x1f8   :  { %v10606_v16 = vpop.eup %7482 }
 0x1f9   :  { %vm3962_vm2 = vweird.f32 %v10606_v16 }
 0x200   :  { %v3745_v17 = vpop.f32.mrf.mxu0 }
 0x201   :  { %v3746_v18 = vadd.f32 %v3745_v17, %v3733_v11  ;;  %v3758_v19 = vpop.f32.mrf.mxu1  ;;  %v3958_v17 = vmul.f32 524.0, %v10606_v16 }
 0x203   :  { %v3759_v23 = vadd.f32 %v3758_v19, %v3746_v18  ;;  %v3959_v18 = vsub.f32 1.0, %v3958_v17  ;;  %v6720_v19 = vld [vmem:[%s11191_s4 + $0x70] sm:$0xf] }
 0x208   :  { %v3771_v21 = vpop.f32.mrf.mxu2  ;;  %v3747_v26 = vpop.f32.mrf.mxu0 }
 0x209   :  { %v3772_v22 = vadd.f32 %v3771_v21, %v3759_v23  ;;  %v3784_v46 = vpop.f32.mrf.mxu3  ;;  %v3760_v25 = vpop.f32.mrf.mxu1  ;;  %v7427_v23 = vld [vmem:[%s11191_s4 + $0x74] sm:$0xf0]  ;;  %v6784_v21 = vld [vmem:[%s11191_s4 + $0xf0] sm:$0xf] }
 0x20a   :  { %v6912_v26 = vld [vmem:[%s11191_s4 + $0x1f0] sm:$0xf]  ;;  %v7475_v25 = vld [vmem:[%s11191_s4 + $0x1f4] sm:$0xf0] }
 0x20b   :  { %v10585_v53 = vadd.f32 %v3784_v46, %v3772_v22  ;;  %v6721_v22 = vor.u32 %v7427_v23, %v6720_v19  ;;  %v7443_v46 = vld [vmem:[%s11191_s4 + $0xf4] sm:$0xf0] }
 0x20d   :  { %v3950_v55 = vsel %vm3944_vm0, %v10585_v53, 0.0  ;;  %4419 = vmatpush.bf16.msrb.mxu0 %v6721_v22 }
 0x20e   :  { %v3951_v9 = vadd.f32 %v3950_v55, %v3949_v5  ;;  %v7419_v55 = vld [vmem:[%s11191_s4 + $0x34] sm:$0xf0]  ;;  %v6880_v5 = vld [vmem:[%s11191_s4 + $0x1b0] sm:$0xf] }
 0x210   :  { %v3773_v27 = vpop.f32.mrf.mxu2 }
 0x211   :  { %v3786_v28 = vpop.f32.mrf.mxu3  ;;  %v6785_v27 = vor.u32 %v7443_v46, %v6784_v21 }
 0x212   :  { %v6913_v28 = vor.u32 %v7475_v25, %v6912_v26 }
 0x213   :  { %4432 = vmatpush.bf16.msrb.mxu1 %v6785_v27 }
 0x214   :  { %4458 = vmatpush.bf16.msrb.mxu3 %v6913_v28 }
 0x220   :  { %v3797_v29 = vpop.f32.mrf.mxu0 }
 0x221   :  { %v3810_v30 = vpop.f32.mrf.mxu1  ;;  %v3798_v50 = vadd.f32 %v3797_v29, %v662_v49  ;;  %v6712_v29 = vld [vmem:[%s11191_s4 + $0x60] sm:$0xf]  ;;  %v6704_v49 = vld [vmem:[%s11191_s4 + $0x50] sm:$0xf] }
 0x223   :  { %v3811_v52 = vadd.f32 %v3810_v30, %v3798_v50  ;;  %v7425_v30 = vld [vmem:[%s11191_s4 + $0x64] sm:$0xf0]  ;;  %v7423_v50 = vld [vmem:[%s11191_s4 + $0x54] sm:$0xf0] }
 0x228   :  { %v3823_v31 = vpop.f32.mrf.mxu2  ;;  %v3799_v37 = vpop.f32.mrf.mxu0 }
 0x229   :  { %v3836_v34 = vpop.f32.mrf.mxu3  ;;  %v3812_v44 = vpop.f32.mrf.mxu1  ;;  %v3824_v36 = vadd.f32 %v3823_v31, %v3811_v52  ;;  %v6776_v31 = vld [vmem:[%s11191_s4 + $0xe0] sm:$0xf]  ;;  %v7441_v37 = vld [vmem:[%s11191_s4 + $0xe4] sm:$0xf0]  ;;  %v6896_v52 = vld [vmem:[%s11191_s4 + $0x1d0] sm:$0xf] }
 0x22a   :  { %v6904_v44 = vld [vmem:[%s11191_s4 + $0x1e0] sm:$0xf] }
 0x22b   :  { %v3837_v57 = vadd.f32 %v3836_v34, %v3824_v36  ;;  %v6713_v34 = vor.u32 %v7425_v30, %v6712_v29  ;;  %v6705_v36 = vor.u32 %v7423_v50, %v6704_v49 }
 0x22d   :  { %4420 = vmatpush.bf16.msrb.mxu0 %v6713_v34  ;;  %v7417_v34 = vld [vmem:[%s11191_s4 + $0x24] sm:$0xf0] }
 0x230   :  { %v3825_v45 = vpop.f32.mrf.mxu2 }
 0x231   :  { %v3838_v47 = vpop.f32.mrf.mxu3  ;;  %v7473_v45 = vld [vmem:[%s11191_s4 + $0x1e4] sm:$0xf0]  ;;  %4421 = vmatpush.bf16.msrb.mxu0 %v6705_v36  ;;  %v6736_v36 = vld [vmem:[%s11191_s4 + $0x90] sm:$0xf] }
 0x232   :  { %v6777_v47 = vor.u32 %v7441_v37, %v6776_v31  ;;  %v6905_v48 = vor.u32 %v7473_v45, %v6904_v44  ;;  %v6680_v31 = vld [vmem:[%s11191_s4 + $0x20] sm:$0xf]  ;;  %v7433_v45 = vld [vmem:[%s11191_s4 + $0xa4] sm:$0xf0] }
 0x233   :  { %v6744_v37 = vld [vmem:[%s11191_s4 + $0xa0] sm:$0xf]  ;;  %v6681_v44 = vor.u32 %v7417_v34, %v6680_v31  ;;  %v7447_v31 = vld [vmem:[%s11191_s4 + $0x114] sm:$0xf0]  ;;  %v7422_v34 = vld [vmem:[%s11191_s4 + $0x54] sm:$0xf] }
 0x234   :  { %4433 = vmatpush.bf16.msrb.mxu1 %v6777_v47  ;;  %4459 = vmatpush.bf16.msrb.mxu3 %v6905_v48  ;;  %v6872_v47 = vld [vmem:[%s11191_s4 + $0x1a0] sm:$0xf]  ;;  %v7465_v48 = vld [vmem:[%s11191_s4 + $0x1a4] sm:$0xf0]  ;;  %v6745_v49 = vor.u32 %v7433_v45, %v6744_v37  ;;  %v7454_v45 = vld [vmem:[%s11191_s4 + $0x154] sm:$0xf] }
 0x235   :  { %v6873_v50 = vor.u32 %v7465_v48, %v6872_v47  ;;  %v6834_v47 = vld [vmem:[%s11191_s4 + $0x158] sm:$0xf0] }
 0x240   :  { %v3849_v51 = vpop.f32.mrf.mxu0 }
 0x241   :  { %v3862_v35 = vpop.f32.mrf.mxu1  ;;  %v3850_v41 = vadd.f32 %v3849_v51, %v3837_v57  ;;  %v6768_v51 = vld [vmem:[%s11191_s4 + $0xd0] sm:$0xf] }
 0x243   :  { %v3863_v58 = vadd.f32 %v3862_v35, %v3850_v41  ;;  %v7439_v35 = vld [vmem:[%s11191_s4 + $0xd4] sm:$0xf0]  ;;  %v6848_v41 = vld [vmem:[%s11191_s4 + $0x170] sm:$0xf] }
 0x244   :  { %v6769_v57 = vor.u32 %v7439_v35, %v6768_v51  ;;  %v6832_v51 = vld [vmem:[%s11191_s4 + $0x150] sm:$0xf]  ;;  %v7455_v35 = vld [vmem:[%s11191_s4 + $0x154] sm:$0xf0] }
 0x246   :  { %4434 = vmatpush.bf16.msrb.mxu1 %v6769_v57  ;;  %v6864_v57 = vld [vmem:[%s11191_s4 + $0x190] sm:$0xf] }
 0x248   :  { %v3875_v33 = vpop.f32.mrf.mxu2  ;;  %v3851_v42 = vpop.f32.mrf.mxu0 }
 0x249   :  { %v3888_v54 = vpop.f32.mrf.mxu3  ;;  %v3864_v43 = vpop.f32.mrf.mxu1  ;;  %v3876_v59 = vadd.f32 %v3875_v33, %v3863_v58  ;;  %v7471_v33 = vld [vmem:[%s11191_s4 + $0x1d4] sm:$0xf0]  ;;  %v6696_v42 = vld [vmem:[%s11191_s4 + $0x40] sm:$0xf] }
 0x24a   :  { %v7421_v43 = vld [vmem:[%s11191_s4 + $0x44] sm:$0xf0]  ;;  %v7459_v58 = vld [vmem:[%s11191_s4 + $0x174] sm:$0xf0] }
 0x24b   :  { %v3889_v61 = vadd.f32 %v3888_v54, %v3876_v59  ;;  %v3960_v54 = vmul.f32 %v10606_v16, %v3959_v18  ;;  %v7437_v59 = vld [vmem:[%s11191_s4 + $0xc4] sm:$0xf0]  ;;  %v6697_v0 = vor.u32 %v7421_v43, %v6696_v42  ;;  %v7431_v43 = vld [vmem:[%s11191_s4 + $0x94] sm:$0xf0] }
 0x24d   :  { %4422 = vmatpush.bf16.msrb.mxu0 %v6697_v0  ;;  %v7429_v0 = vld [vmem:[%s11191_s4 + $0x84] sm:$0xf0] }
 0x250   :  { %v3877_v38 = vpop.f32.mrf.mxu2 }
 0x251   :  { %v3890_v39 = vpop.f32.mrf.mxu3  ;;  %v6897_v38 = vor.u32 %v7471_v33, %v6896_v52  ;;  %v6833_v52 = vor.u32 %v7455_v35, %v6832_v51  ;;  %v6672_v33 = vld [vmem:[%s11191_s4 + $0x10] sm:$0xf]  ;;  %v6898_v51 = vld [vmem:[%s11191_s4 + $0x1d8] sm:$0xf0] }
 0x252   :  { %v6760_v39 = vld [vmem:[%s11191_s4 + $0xc0] sm:$0xf] }
 0x253   :  { %4460 = vmatpush.bf16.msrb.mxu3 %v6897_v38  ;;  %v7463_v38 = vld [vmem:[%s11191_s4 + $0x194] sm:$0xf0] }
 0x260   :  { %v3901_v15 = vpop.f32.mrf.mxu0 }
 0x261   :  { %v3914_v62 = vpop.f32.mrf.mxu1  ;;  %v3902_v63 = vadd.f32 %v3901_v15, %v3889_v61  ;;  %v6888_v61 = vld [vmem:[%s11191_s4 + $0x1c0] sm:$0xf]  ;;  %v7469_v15 = vld [vmem:[%s11191_s4 + $0x1c4] sm:$0xf0] }
 0x262   :  { %v6889_v20 = vor.u32 %v7469_v15, %v6888_v61  ;;  %v6664_v15 = vld [vmem:[%s11191_s4] sm:$0xf] }
 0x263   :  { %v3915_v2 = vadd.f32 %v3914_v62, %v3902_v63  ;;  %v6849_v62 = vor.u32 %v7459_v58, %v6848_v41  ;;  %v3961_v63 = vadd.f32 %v10606_v16, %v3960_v54  ;;  %v7415_v54 = vld [vmem:[%s11191_s4 + $0x14] sm:$0xf0]  ;;  %v6865_v41 = vor.u32 %v7463_v38, %v6864_v57  ;;  %v6824_v58 = vld [vmem:[%s11191_s4 + $0x140] sm:$0xf]  ;;  %v6826_v57 = vld [vmem:[%s11191_s4 + $0x148] sm:$0xf0] }
 0x264   :  { %4461 = vmatpush.bf16.msrb.mxu3 %v6889_v20  ;;  %v6673_v42 = vor.u32 %v7415_v54, %v6672_v33  ;;  %v7445_v33 = vld [vmem:[%s11191_s4 + $0x104] sm:$0xf0]  ;;  %v7420_v54 = vld [vmem:[%s11191_s4 + $0x44] sm:$0xf] }
 0x265   :  { %4445 = vmatpush.bf16.msrb.mxu2 %v6849_v62  ;;  %v7413_v62 = vld [vmem:[%s11191_s4 + $0x4] sm:$0xf0] }
 0x268   :  { %v3927_v3 = vpop.f32.mrf.mxu2  ;;  %v3903_v4 = vpop.f32.mrf.mxu0 }
 0x269   :  { %v3928_v56 = vadd.f32 %v3927_v3, %v3915_v2  ;;  %v3940_v24 = vpop.f32.mrf.mxu3  ;;  %v3916_v7 = vpop.f32.mrf.mxu1  ;;  %v6761_v2 = vor.u32 %v7437_v59, %v6760_v39  ;;  %v6688_v3 = vld [vmem:[%s11191_s4 + $0x30] sm:$0xf]  ;;  %v7435_v4 = vld [vmem:[%s11191_s4 + $0xb4] sm:$0xf0]  ;;  %v6737_v39 = vor.u32 %v7431_v43, %v6736_v36  ;;  %v7453_v59 = vld [vmem:[%s11191_s4 + $0x144] sm:$0xf0] }
 0x26a   :  { %v7467_v7 = vld [vmem:[%s11191_s4 + $0x1b4] sm:$0xf0]  ;;  %v6825_v61 = vor.u32 %v7453_v59, %v6824_v58  ;;  %v7452_v43 = vld [vmem:[%s11191_s4 + $0x144] sm:$0xf]  ;;  %v6890_v58 = vld [vmem:[%s11191_s4 + $0x1c8] sm:$0xf0] }
 0x26b   :  { %v10602_v8 = vadd.f32 %v3940_v24, %v3928_v56  ;;  %v6752_v56 = vld [vmem:[%s11191_s4 + $0xb0] sm:$0xf]  ;;  %v6841_v24 = vor.u32 %v7457_v6, %v6840_v1  ;;  %4435 = vmatpush.bf16.msrb.mxu1 %v6761_v2  ;;  %v6665_v1 = vor.u32 %v7413_v62, %v6664_v15  ;;  %v6856_v6 = vld [vmem:[%s11191_s4 + $0x180] sm:$0xf]  ;;  %v7461_v2 = vld [vmem:[%s11191_s4 + $0x184] sm:$0xf0] }
 0x26c   :  { %v6920_v59 = vld [vmem:[%s11191_s4 + $0x200] sm:$0xf]  ;;  %v7477_v15 = vld [vmem:[%s11191_s4 + $0x204] sm:$0x30] }
 0x26d   :  { %v3953_v10 = vsel %vm3952_vm1, %v10602_v8, 0.0  ;;  %4446 = vmatpush.bf16.msrb.mxu2 %v6841_v24  ;;  %v7426_v24 = vld [vmem:[%s11191_s4 + $0x74] sm:$0xf]  ;;  %v6921_v62 = vor.u32 %v7477_v15, %v6920_v59 }
 0x26e   :  { %v3954_v11 = vadd.f32 %v3953_v10, %v3951_v9  ;;  %v10717_v9 = vsel %vm3962_vm2, %v10606_v16, %v3961_v63  ;;  %v6689_v10 = vor.u32 %v7419_v55, %v6688_v3  ;;  %v6728_v63 = vld [vmem:[%s11191_s4 + $0x80] sm:$0xf]  ;;  %v6857_v3 = vor.u32 %v7461_v2, %v6856_v6  ;;  %v6816_v55 = vld [vmem:[%s11191_s4 + $0x130] sm:$0xf]  ;;  %v7450_v6 = vld [vmem:[%s11191_s4 + $0x134] sm:$0xf] }
 0x26f   :  { %v6729_v20 = vor.u32 %v7429_v0, %v6728_v63  ;;  %v7418_v63 = vld [vmem:[%s11191_s4 + $0x34] sm:$0xf]  ;;  %v4414_v2 = vsel %vm4412_vm3, %v6921_v62, 0 }
 0x270   :  { %v3929_v12 = vpop.f32.mrf.mxu2  ;;  %3955 = vadd.xlane.f32.xlu0 %v3954_v11  ;;  %4423 = vmatpush.bf16.msrb.mxu0 %v6689_v10  ;;  %v6850_v10 = vld [vmem:[%s11191_s4 + $0x178] sm:$0xf0] }
 0x271   :  { %v3942_v13 = vpop.f32.mrf.mxu3  ;;  %v6753_v12 = vor.u32 %v7435_v4, %v6752_v56  ;;  %4447 = vmatpush.bf16.msrb.mxu2 %v6833_v52  ;;  %v7451_v56 = vld [vmem:[%s11191_s4 + $0x134] sm:$0xf0]  ;;  %v6792_v52 = vld [vmem:[%s11191_s4 + $0x100] sm:$0xf] }
 0x272   :  { %v6881_v13 = vor.u32 %v7467_v7, %v6880_v5  ;;  %v6817_v4 = vor.u32 %v7451_v56, %v6816_v55  ;;  %v6722_v5 = vld [vmem:[%s11191_s4 + $0x78] sm:$0xf0]  ;;  %v7458_v7 = vld [vmem:[%s11191_s4 + $0x174] sm:$0xf]  ;;  %v6793_v36 = vor.u32 %v7445_v33, %v6792_v52 }
 0x273   :  { %4436 = vmatpush.bf16.msrb.mxu1 %v6753_v12  ;;  %v6853_v12 = vor.u32 %v7458_v7, %v6850_v10  ;;  %v6882_v56 = vld [vmem:[%s11191_s4 + $0x1b8] sm:$0xf0]  ;;  %v7448_v7 = vld [vmem:[%s11191_s4 + $0x124] sm:$0xf] }
 0x274   :  { %4462 = vmatpush.bf16.msrb.mxu3 %v6881_v13  ;;  %4424 = vmatpush.bf16.msrb.mxu0 %v6681_v44  ;;  %v7474_v13 = vld [vmem:[%s11191_s4 + $0x1f4] sm:$0xf]  ;;  %v6706_v44 = vld [vmem:[%s11191_s4 + $0x58] sm:$0xf0] }
 0x275   :  { %4448 = vmatpush.bf16.msrb.mxu2 %v6825_v61  ;;  %v6709_v48 = vor.u32 %v7422_v34, %v6706_v44  ;;  %v6794_v34 = vld [vmem:[%s11191_s4 + $0x108] sm:$0xf0] }
 0x277   :  { %4437 = vmatpush.bf16.msrb.mxu1 %v6745_v49  ;;  %v6837_v49 = vor.u32 %v7454_v45, %v6834_v47  ;;  %v7460_v45 = vld [vmem:[%s11191_s4 + $0x184] sm:$0xf]  ;;  %v6858_v47 = vld [vmem:[%s11191_s4 + $0x188] sm:$0xf0] }
 0x278   :  { %4463 = vmatpush.bf16.msrb.mxu3 %v6873_v50  ;;  %4425 = vmatpush.bf16.msrb.mxu0 %v6673_v42  ;;  %v7470_v50 = vld [vmem:[%s11191_s4 + $0x1d4] sm:$0xf]  ;;  %v6698_v42 = vld [vmem:[%s11191_s4 + $0x48] sm:$0xf0] }
 0x279   :  { %4449 = vmatpush.bf16.msrb.mxu2 %v6817_v4  ;;  %v6901_v35 = vor.u32 %v7470_v50, %v6898_v51  ;;  %v6701_v38 = vor.u32 %v7420_v54, %v6698_v42  ;;  %v6682_v4 = vld [vmem:[%s11191_s4 + $0x28] sm:$0xf0]  ;;  %v7476_v54 = vld [vmem:[%s11191_s4 + $0x204] sm:$0xf] }
 0x27b   :  { %4438 = vmatpush.bf16.msrb.mxu1 %v6737_v39  ;;  %v6829_v39 = vor.u32 %v7452_v43, %v6826_v57  ;;  %v7442_v43 = vld [vmem:[%s11191_s4 + $0xf4] sm:$0xf]  ;;  %v6786_v57 = vld [vmem:[%s11191_s4 + $0xf8] sm:$0xf0] }
 0x27c   :  { %4464 = vmatpush.bf16.msrb.mxu3 %v6865_v41  ;;  %4426 = vmatpush.bf16.msrb.mxu0 %v6665_v1  ;;  %v7468_v41 = vld [vmem:[%s11191_s4 + $0x1c4] sm:$0xf]  ;;  %v6690_v1 = vld [vmem:[%s11191_s4 + $0x38] sm:$0xf0] }
 0x27d   :  { %v6893_v61 = vor.u32 %v7468_v41, %v6890_v58  ;;  %v6693_v0 = vor.u32 %v7418_v63, %v6690_v1  ;;  %v6789_v63 = vor.u32 %v7442_v43, %v6786_v57 }
 0x27f   :  { %4439 = vmatpush.bf16.msrb.mxu1 %v6729_v20  ;;  %v6818_v20 = vld [vmem:[%s11191_s4 + $0x138] sm:$0xf0] }
 0x280   :  { %4465 = vmatpush.bf16.msrb.mxu3 %v6857_v3  ;;  %v7466_v3 = vld [vmem:[%s11191_s4 + $0x1b4] sm:$0xf]  ;;  %v6821_v55 = vor.u32 %v7450_v6, %v6818_v20  ;;  %v6778_v6 = vld [vmem:[%s11191_s4 + $0xe8] sm:$0xf0]  ;;  %v7436_v20 = vld [vmem:[%s11191_s4 + $0xc4] sm:$0xf] }
 0x284   :  { %4510 = vmatpush.bf16.msra.mxu3 %v6853_v12  ;;  %v7464_v12 = vld [vmem:[%s11191_s4 + $0x1a4] sm:$0xf] }
 0x2e3   :  { %v3956_v11 = vpop.xlane.xlu0 %3955 }
 0x2e4   :  { %v3964_v14 = vmul.f32 %v10717_v9, %v3956_v11  ;;  %v6725_v11 = vor.u32 %v7426_v24, %v6722_v5  ;;  %v7416_v24 = vld [vmem:[%s11191_s4 + $0x24] sm:$0xf]  ;;  %v6885_v5 = vor.u32 %v7466_v3, %v6882_v56  ;;  %v6762_v3 = vld [vmem:[%s11191_s4 + $0xc8] sm:$0xf0] }
 0x2e5   :  { %v6685_v10 = vor.u32 %v7416_v24, %v6682_v4  ;;  %v7434_v24 = vld [vmem:[%s11191_s4 + $0xb4] sm:$0xf]  ;;  %v6754_v4 = vld [vmem:[%s11191_s4 + $0xb8] sm:$0xf0] }
 0x2e6   :  { %v10721_v17 = vsub.f32 %v9133_v32, %v3964_v14  ;;  %v10724_v18 = vsub.f32 %v10592_v60, %v3964_v14  ;;  %v10727_v19 = vsub.f32 %v10334_v40, %v3964_v14  ;;  %v10730_v16 = vsub.f32 %v10585_v53, %v3964_v14  ;;  %4484 = vmatpush.bf16.msra.mxu1 %v6725_v11  ;;  %v6810_v11 = vld [vmem:[%s11191_s4 + $0x128] sm:$0xf0] }
 0x2e7   :  { %v10733_v23 = vsub.f32 %v10602_v8, %v3964_v14  ;;  %v6914_v14 = vld [vmem:[%s11191_s4 + $0x1f8] sm:$0xf0] }
 0x2e8   :  { %v3970_v21 = vmul.f32 %v10721_v17, %v10721_v17  ;;  %v3971_v32 = vmul.f32 %v10724_v18, %v10724_v18  ;;  %v3972_v60 = vmul.f32 %v10727_v19, %v10727_v19  ;;  %v3973_v40 = vmul.f32 %v10730_v16, %v10730_v16 }
 0x2e9   :  { %v3974_v8 = vmul.f32 %v10733_v23, %v10733_v23 }
 0x2ea   :  { %v3975_v53 = vsel %vm3944_vm0, %v3970_v21, 0.0  ;;  %v3976_v22 = vsel %vm3944_vm0, %v3971_v32, 0.0  ;;  %v3978_v26 = vsel %vm3944_vm0, %v3972_v60, 0.0  ;;  %v3980_v27 = vsel %vm3944_vm0, %v3973_v40, 0.0  ;;  %v6808_v32 = vld [vmem:[%s11191_s4 + $0x120] sm:$0xf] }
 0x2eb   :  { %v3977_v46 = vadd.f32 %v3976_v22, %v3975_v53  ;;  %v3982_v29 = vsel %vm3952_vm1, %v3974_v8, 0.0  ;;  %v6917_v21 = vor.u32 %v7474_v13, %v6914_v14  ;;  %v7449_v60 = vld [vmem:[%s11191_s4 + $0x124] sm:$0xf0]  ;;  %v7424_v40 = vld [vmem:[%s11191_s4 + $0x64] sm:$0xf] }
 0x2ec   :  { %v6809_v53 = vor.u32 %v7449_v60, %v6808_v32  ;;  %v6714_v22 = vld [vmem:[%s11191_s4 + $0x68] sm:$0xf0] }
 0x2ed   :  { %v3979_v25 = vadd.f32 %v3978_v26, %v3977_v46  ;;  %v7456_v46 = vld [vmem:[%s11191_s4 + $0x164] sm:$0xf]  ;;  %v6842_v8 = vld [vmem:[%s11191_s4 + $0x168] sm:$0xf0]  ;;  %4523 = vmatpush.bf16.msra.mxu0 %v6917_v21  ;;  %v6717_v26 = vor.u32 %v7424_v40, %v6714_v22  ;;  %v6813_v21 = vor.u32 %v7448_v7, %v6810_v11  ;;  %v7414_v40 = vld [vmem:[%s11191_s4 + $0x14] sm:$0xf] }
 0x2ee   :  { %4450 = vmatpush.bf16.msrb.mxu2 %v6809_v53  ;;  %v6874_v13 = vld [vmem:[%s11191_s4 + $0x1a8] sm:$0xf0]  ;;  %v6674_v53 = vld [vmem:[%s11191_s4 + $0x18] sm:$0xf0]  ;;  %v7446_v22 = vld [vmem:[%s11191_s4 + $0x114] sm:$0xf] }
 0x2ef   :  { %v3981_v28 = vadd.f32 %v3980_v27, %v3979_v25  ;;  %v6845_v25 = vor.u32 %v7456_v46, %v6842_v8  ;;  %v7472_v27 = vld [vmem:[%s11191_s4 + $0x1e4] sm:$0xf]  ;;  %4485 = vmatpush.bf16.msra.mxu1 %v6717_v26  ;;  %v6877_v32 = vor.u32 %v7464_v12, %v6874_v13  ;;  %v6802_v46 = vld [vmem:[%s11191_s4 + $0x118] sm:$0xf0]  ;;  %v7430_v12 = vld [vmem:[%s11191_s4 + $0x94] sm:$0xf] }
 0x2f0   :  { %v6805_v26 = vor.u32 %v7446_v22, %v6802_v46  ;;  %v6738_v13 = vld [vmem:[%s11191_s4 + $0x98] sm:$0xf0] }
 0x2f1   :  { %v3983_v30 = vadd.f32 %v3982_v29, %v3981_v28  ;;  %v6906_v28 = vld [vmem:[%s11191_s4 + $0x1e8] sm:$0xf0]  ;;  %4511 = vmatpush.bf16.msra.mxu3 %v6845_v25  ;;  %v7462_v25 = vld [vmem:[%s11191_s4 + $0x194] sm:$0xf] }
 0x2f2   :  { %v6909_v29 = vor.u32 %v7472_v27, %v6906_v28  ;;  %v6866_v27 = vld [vmem:[%s11191_s4 + $0x198] sm:$0xf0] }
 0x2f3   :  { %3984 = vadd.xlane.f32.xlu0 %v3983_v30  ;;  %v6800_v30 = vld [vmem:[%s11191_s4 + $0x110] sm:$0xf]  ;;  %4486 = vmatpush.bf16.msra.mxu1 %v6709_v48  ;;  %v6869_v28 = vor.u32 %v7462_v25, %v6866_v27  ;;  %v6861_v48 = vor.u32 %v7460_v45, %v6858_v47 }
 0x2f4   :  { %v6801_v37 = vor.u32 %v7447_v31, %v6800_v30  ;;  %4524 = vmatpush.bf16.msra.mxu0 %v6909_v29  ;;  %v7412_v29 = vld [vmem:[%s11191_s4 + $0x4] sm:$0xf]  ;;  %v6666_v30 = vld [vmem:[%s11191_s4 + $0x8] sm:$0xf0] }
 0x2f5   :  { %4512 = vmatpush.bf16.msra.mxu3 %v6837_v49  ;;  %v7444_v31 = vld [vmem:[%s11191_s4 + $0x104] sm:$0xf] }
 0x2f6   :  { %4451 = vmatpush.bf16.msrb.mxu2 %v6801_v37  ;;  %v6669_v37 = vor.u32 %v7412_v29, %v6666_v30  ;;  %v6797_v44 = vor.u32 %v7444_v31, %v6794_v34 }
 0x2f7   :  { %4487 = vmatpush.bf16.msra.mxu1 %v6701_v38 }
 0x2f8   :  { %4525 = vmatpush.bf16.msra.mxu0 %v6901_v35 }
 0x2f9   :  { %4513 = vmatpush.bf16.msra.mxu3 %v6829_v39 }
 0x2fa   :  { %4452 = vmatpush.bf16.msrb.mxu2 %v6793_v36  ;;  %v6922_v36 = vld [vmem:[%s11191_s4 + $0x208] sm:$0x30] }
 0x2fb   :  { %4488 = vmatpush.bf16.msra.mxu1 %v6693_v0  ;;  %v6925_v38 = vor.u32 %v7476_v54, %v6922_v36  ;;  %v7440_v0 = vld [vmem:[%s11191_s4 + $0xe4] sm:$0xf] }
 0x2fc   :  { %4526 = vmatpush.bf16.msra.mxu0 %v6893_v61 }
 0x2fd   :  { %4514 = vmatpush.bf16.msra.mxu3 %v6821_v55  ;;  %v6765_v55 = vor.u32 %v7436_v20, %v6762_v3 }
 0x2fe   :  { %4478 = vmatpush.bf16.msra.mxu2 %v4414_v2 }
 0x2ff   :  { %4489 = vmatpush.bf16.msra.mxu1 %v6685_v10  ;;  %v7432_v10 = vld [vmem:[%s11191_s4 + $0xa4] sm:$0xf] }
 0x300   :  { %4527 = vmatpush.bf16.msra.mxu0 %v6885_v5  ;;  %v6757_v5 = vor.u32 %v7434_v24, %v6754_v4 }
 0x301   :  { %4515 = vmatpush.bf16.msra.mxu3 %v6813_v21  ;;  %v7428_v21 = vld [vmem:[%s11191_s4 + $0x84] sm:$0xf] }
 0x304   :  { %4528 = vmatpush.bf16.msra.mxu0 %v6877_v32  ;;  %v6730_v32 = vld [vmem:[%s11191_s4 + $0x88] sm:$0xf0] }
 0x305   :  { %4516 = vmatpush.bf16.msra.mxu3 %v6805_v26 }
 0x308   :  { %4529 = vmatpush.bf16.msra.mxu0 %v6869_v28 }
 0x309   :  { %4517 = vmatpush.bf16.msra.mxu3 %v6797_v44 }
 0x30c   :  { %4530 = vmatpush.bf16.msra.mxu0 %v6861_v48 }
 0x366   :  { %v3985_v14 = vpop.xlane.xlu0 %3984 }
 0x367   :  { %v3986_v60 = vmul.f32 %v3985_v14, %v10717_v9  ;;  %v6677_v9 = vor.u32 %v7414_v40, %v6674_v53  ;;  %v6741_v14 = vor.u32 %v7430_v12, %v6738_v13 }
 0x369   :  { %v3987_v8 = vadd.f32 1e-05, %v3986_v60  ;;  %4490 = vmatpush.bf16.msra.mxu1 %v6677_v9  ;;  %v6733_v60 = vor.u32 %v7428_v21, %v6730_v32  ;;  %v4613_v21 = vld [vmem:[%s11193_s6 + $0xd8] sm:$0xff]  ;;  %v4596_v32 = vld [vmem:[%s11193_s6 + $0x50] sm:$0xff] }
 0x36b   :  { %7484 = vrsqrt.f32 %v3987_v8  ;;  %vm3994_vm5 = vweird.f32 %v3987_v8 }
 0x36d   :  { %4491 = vmatpush.bf16.msra.mxu1 %v6669_v37  ;;  %v4074_v37 = vld [vmem:[%s11192_s5] sm:$0x3] }
 0x36e   :  { %v4076_v44 = vperm.slane %v4074_v37, 0 }
 0x371   :  { %v7485_v49 = vpop.eup %7484 }
 0x372   :  { %v3989_v50 = vmul.f32 %v7485_v49, %v3987_v8  ;;  %vm3995_vm4 = vweird.f32 %v7485_v49 }
 0x373   :  { %vm3996_vm6 = vmor %vm3994_vm5, %vm3995_vm4 }
 0x374   :  { %v3990_v51 = vmul.f32 %v7485_v49, %v3989_v50  ;;  %v4077_v50 = vperm.slane %v4074_v37, 1  ;;  %v4588_v37 = vld [vmem:[%s11193_s6 + $0x10] sm:$0xff] }
 0x376   :  { %v3991_v35 = vmul.f32 0.5, %v3990_v51 }
 0x378   :  { %v3992_v52 = vsub.f32 1.5, %v3991_v35 }
 0x37a   :  { %v3993_v33 = vmul.f32 %v7485_v49, %v3992_v52 }
 0x37c   :  { %v3997_v42 = vsel %vm3996_vm6, %v7485_v49, %v3993_v33 }
 0x37d   :  { %v3998_v39 = vmul.f32 %v3997_v42, %v10721_v17  ;;  %v3999_v41 = vmul.f32 %v3997_v42, %v10724_v18  ;;  %v4000_v58 = vmul.f32 %v3997_v42, %v10727_v19  ;;  %v4001_v59 = vmul.f32 %v3997_v42, %v10730_v16  ;;  %v7438_v19 = vld [vmem:[%s11191_s4 + $0xd4] sm:$0xf]  ;;  %v6770_v16 = vld [vmem:[%s11191_s4 + $0xd8] sm:$0xf0] }
 0x37e   :  { %v4417_v17 = vsel %vm4412_vm3, %v6925_v38, 0  ;;  %v6781_v18 = vor.u32 %v7440_v0, %v6778_v6  ;;  %v6773_v2 = vor.u32 %v7438_v19, %v6770_v16  ;;  %v4002_v56 = vmul.f32 %v3997_v42, %v10733_v23  ;;  %v6746_v23 = vld [vmem:[%s11191_s4 + $0xa8] sm:$0xf0]  ;;  %v4616_v6 = vld [vmem:[%s11193_s6 + $0xf0] sm:$0xff]  ;;  %v4598_v16 = vld [vmem:[%s11193_s6 + $0x60] sm:$0xff] }
 0x37f   :  { %v4003_v61 = vpack.c.bf16 %v3998_v39, %v3998_v39  ;;  %v4004_v15 = vpack.c.bf16 %v3999_v41, %v3999_v41  ;;  %v4005_v62 = vpack.c.bf16 %v4000_v58, %v4000_v58  ;;  %v4006_v1 = vpack.c.bf16 %v4001_v59, %v4001_v59 }
 0x380   :  { %v4007_v7 = vpack.c.bf16 %v4002_v56, %v4002_v56  ;;  %v6749_v11 = vor.u32 %v7432_v10, %v6746_v23 }
 0x381   :  { %4427 = vmatmul.bf16.vlgmr.msrb.gmra.mxu0 %v4003_v61  ;;  %4440 = vmatmul.bf16.vlgmr.msrb.gmra.mxu1 %v4004_v15 }
 0x382   :  { %4453 = vmatmul.bf16.vlgmr.msrb.gmra.mxu2 %v4005_v62  ;;  %4466 = vmatmul.bf16.vlgmr.msrb.gmra.mxu3 %v4006_v1 }
 0x383   :  { %4497 = vmatpush.bf16.msrb.mxu2 %v6789_v63  ;;  %4543 = vmatpush.bf16.msrb.mxu1 %v4417_v17  ;;  %v4617_v63 = vld [vmem:[%s11193_s6 + $0xf8] sm:$0x3]  ;;  %v4599_v17 = vld [vmem:[%s11193_s6 + $0x68] sm:$0xff] }
 0x384   :  { %6930 = vmatpush.msk.msrb.mxu0 %vm3944_vm0, %v4617_v63 }
 0x386   :  { %4676 = vmatpush.msrb.mxu0 %v4616_v6 }
 0x387   :  { %4498 = vmatpush.bf16.msrb.mxu2 %v6781_v18  ;;  %v4615_v18 = vld [vmem:[%s11193_s6 + $0xe8] sm:$0xff] }
 0x388   :  { %4677 = vmatpush.msrb.mxu0 %v4615_v18 }
 0x38b   :  { %4499 = vmatpush.bf16.msrb.mxu2 %v6773_v2  ;;  %v4614_v2 = vld [vmem:[%s11193_s6 + $0xe0] sm:$0xff] }
 0x38c   :  { %4678 = vmatpush.msrb.mxu0 %v4614_v2 }
 0x38e   :  { %4679 = vmatpush.msrb.mxu0 %v4613_v21 }
 0x38f   :  { %4500 = vmatpush.bf16.msrb.mxu2 %v6765_v55 }
 0x391   :  { %4492 = vmatmul.bf16.vlgmr.msra.gmra.mxu1 %v4003_v61  ;;  %4531 = vmatmul.bf16.vlgmr.msra.gmra.mxu0 %v4006_v1  ;;  %v4600_v1 = vld [vmem:[%s11193_s6 + $0x70] sm:$0xff] }
 0x392   :  { %6926 = vmatmul.msk.bf16.vlgmr.msra.gmra.mxu2 %vm4408_vm7, %v4007_v7  ;;  %4518 = vmatmul.bf16.vlgmr.msra.gmra.mxu3 %v4005_v62  ;;  %v4601_v62 = vld [vmem:[%s11193_s6 + $0x78] sm:$0xff] }
 0x393   :  { %4501 = vmatpush.bf16.msrb.mxu2 %v6757_v5  ;;  %4655 = vmatpush.msrb.mxu3 %v4601_v62  ;;  %v7481_v62 = vld [vmem:[%s11195_s8] ss:$0 sm:$0xff] }
 0x395   :  { %4656 = vmatpush.msrb.mxu3 %v4600_v1 }
 0x397   :  { %4502 = vmatpush.bf16.msrb.mxu2 %v6749_v11  ;;  %4657 = vmatpush.msrb.mxu3 %v4599_v17 }
 0x399   :  { %4658 = vmatpush.msrb.mxu3 %v4598_v16 }
 0x39b   :  { %4503 = vmatpush.bf16.msrb.mxu2 %v6741_v14  ;;  %v4597_v14 = vld [vmem:[%s11193_s6 + $0x58] sm:$0xff] }
 0x39c   :  { %4659 = vmatpush.msrb.mxu3 %v4597_v14 }
 0x39e   :  { %4660 = vmatpush.msrb.mxu3 %v4596_v32 }
 0x39f   :  { %4504 = vmatpush.bf16.msrb.mxu2 %v6733_v60  ;;  %v4612_v60 = vld [vmem:[%s11193_s6 + $0xd0] sm:$0xff] }
 0x3a0   :  { %4680 = vmatpush.msrb.mxu0 %v4612_v60 }
 0x3a1   :  { %6927 = vmatmul.msk.bf16.vlgmr.msrb.gmra.mxu1 %vm4408_vm7, %v4007_v7 }
 0x3a2   :  { %4505 = vmatmul.bf16.vlgmr.msrb.gmra.mxu2 %v4004_v15  ;;  %v7523_v15 = vmov 250.0  }
 0x3a3   :  { %7486 = vrcp.f32 %v7523_v15 }
 0x3a9   :  { %v7487_v0 = vpop.eup %7486 }
 0x3aa   :  { %v4556_v19 = vmul.f32 250.0, %v7487_v0  ;;  %vm4560_vm9 = vweird.f32 %v7487_v0 }
 0x3ac   :  { %v4557_v20 = vsub.f32 1.0, %v4556_v19 }
 0x3ae   :  { %v4558_v3 = vmul.f32 %v7487_v0, %v4557_v20 }
 0x3b0   :  { %v4559_v55 = vadd.f32 %v7487_v0, %v4558_v3 }
 0x3b2   :  { %v11084_v56 = vsel %vm4560_vm9, %v7487_v0, %v4559_v55 }
 0x3fe   :  { %v4428_v40 = vpop.f32.mrf.mxu0  ;;  %v4441_v53 = vpop.f32.mrf.mxu1 }
 0x3ff   :  { %v4429_v48 = vadd.f32 %v4428_v40, %v4076_v44  ;;  %v4595_v40 = vld [vmem:[%s11193_s6 + $0x48] sm:$0xff]  ;;  %v4604_v44 = vld [vmem:[%s11193_s6 + $0x90] sm:$0xff] }
 0x400   :  { %4661 = vmatpush.msrb.mxu3 %v4595_v40 }
 0x401   :  { %v4442_v51 = vadd.f32 %v4441_v53, %v4429_v48  ;;  %v4611_v53 = vld [vmem:[%s11193_s6 + $0xc8] sm:$0xff]  ;;  %v4619_v48 = vld [vmem:[%s11194_s7] sm:$0x1f]  ;;  %s7524_s7 = smov [#allocation2]  }
 0x402   :  { %4681 = vmatpush.msrb.mxu0 %v4611_v53  ;;  %6928 = vmatpush.msk.msra.mxu2 %vm4624_vm10, %v4619_v48  ;;  %s4731_s8 = sshll.u32 %s7524_s7, 4  ;;  %s4732_s8 = int_to_ptr.vmem [resolvable:$true] %s4731_s8 }
 0x405   :  { %v4454_v22 = vpop.f32.mrf.mxu2  ;;  %v4467_v46 = vpop.f32.mrf.mxu3 }
 0x406   :  { %v4430_v8 = vpop.f32.mrf.mxu0  ;;  %v4443_v9 = vpop.f32.mrf.mxu1  ;;  %v4455_v35 = vadd.f32 %v4454_v22, %v4442_v51  ;;  %v4594_v22 = vld [vmem:[%s11193_s6 + $0x40] sm:$0xff] }
 0x407   :  { %4662 = vmatpush.msrb.mxu3 %v4594_v22  ;;  %v4593_v8 = vld [vmem:[%s11193_s6 + $0x38] sm:$0xff]  ;;  %v4618_v51 = vld [vmem:[%s11188_s1] sm:$0x3] }
 0x408   :  { %v4468_v42 = vadd.f32 %v4467_v46, %v4455_v35  ;;  %v4610_v46 = vld [vmem:[%s11193_s6 + $0xc0] sm:$0xff]  ;;  %v4609_v9 = vld [vmem:[%s11193_s6 + $0xb8] sm:$0xff]  ;;  %6929 = vmatmul.msk.f32.vlgmr.msra.gmra.mxu2 %vm4620_vm11, %v4618_v51 }
 0x409   :  { %4682 = vmatpush.msrb.mxu0 %v4610_v46  ;;  %4663 = vmatpush.msrb.mxu3 %v4593_v8 }
 0x40b   :  { %4683 = vmatpush.msrb.mxu0 %v4609_v9 }
 0x40d   :  { %v4456_v26 = vpop.f32.mrf.mxu2  ;;  %v4469_v25 = vpop.f32.mrf.mxu3 }
 0x40e   :  { %v4493_v27 = vpop.f32.mrf.mxu1  ;;  %v4532_v28 = vpop.f32.mrf.mxu0  ;;  %v4592_v26 = vld [vmem:[%s11193_s6 + $0x30] sm:$0xff] }
 0x40f   :  { %v4494_v52 = vadd.f32 %v4493_v27, %v4077_v50  ;;  %v4608_v25 = vld [vmem:[%s11193_s6 + $0xb0] sm:$0xff]  ;;  %4664 = vmatpush.msrb.mxu3 %v4592_v26  ;;  %v4591_v27 = vld [vmem:[%s11193_s6 + $0x28] sm:$0xff]  ;;  %v4602_v50 = vld [vmem:[%s11193_s6 + $0x80] sm:$0xff] }
 0x410   :  { %4684 = vmatpush.msrb.mxu0 %v4608_v25 }
 0x411   :  { %4665 = vmatpush.msrb.mxu3 %v4591_v27 }
 0x415   :  { %v4480_v29 = vpop.f32.mrf.mxu2  ;;  %v4519_v30 = vpop.f32.mrf.mxu3 }
 0x416   :  { %v4495_v31 = vpop.f32.mrf.mxu1  ;;  %v4534_v34 = vpop.f32.mrf.mxu0  ;;  %v4481_v57 = vadd.f32 %v4480_v29, %v4468_v42  ;;  %v4590_v29 = vld [vmem:[%s11193_s6 + $0x20] sm:$0xff] }
 0x417   :  { %4666 = vmatpush.msrb.mxu3 %v4590_v29  ;;  %v4589_v31 = vld [vmem:[%s11193_s6 + $0x18] sm:$0xff] }
 0x418   :  { %v4549_v58 = vsel %vm3944_vm0, %v4481_v57, 0.0  ;;  %v4605_v34 = vld [vmem:[%s11193_s6 + $0x98] sm:$0xff] }
 0x419   :  { %4667 = vmatpush.msrb.mxu3 %v4589_v31 }
 0x41b   :  { %4668 = vmatpush.msrb.mxu3 %v4588_v37 }
 0x41d   :  { %v4482_v45 = vpop.f32.mrf.mxu2  ;;  %v4521_v47 = vpop.f32.mrf.mxu3 }
 0x41e   :  { %v4545_v49 = vpop.f32.mrf.mxu1  ;;  %v4587_v45 = vld [vmem:[%s11193_s6 + $0x8] sm:$0xff] }
 0x41f   :  { %v4603_v47 = vld [vmem:[%s11193_s6 + $0x88] sm:$0xff]  ;;  %4669 = vmatpush.msrb.mxu3 %v4587_v45 }
 0x425   :  { %v4506_v33 = vpop.f32.mrf.mxu2 }
 0x426   :  { %v4507_v54 = vadd.f32 %v4506_v33, %v4494_v52  ;;  %v4547_v36 = vpop.f32.mrf.mxu1 }
 0x428   :  { %v4520_v43 = vadd.f32 %v4519_v30, %v4507_v54  ;;  %v4606_v30 = vld [vmem:[%s11193_s6 + $0xa0] sm:$0xff] }
 0x42a   :  { %v4533_v38 = vadd.f32 %v4532_v28, %v4520_v43  ;;  %v4607_v28 = vld [vmem:[%s11193_s6 + $0xa8] sm:$0xff] }
 0x42b   :  { %4685 = vmatpush.msrb.mxu0 %v4607_v28 }
 0x42c   :  { %v4546_v39 = vadd.f32 %v4545_v49, %v4533_v38  ;;  %v4586_v49 = vld [vmem:[%s11193_s6] sm:$0xff] }
 0x42d   :  { %v4508_v41 = vpop.f32.mrf.mxu2  ;;  %4686 = vmatpush.msrb.mxu0 %v4606_v30  ;;  %4670 = vmatpush.msrb.mxu3 %v4586_v49 }
 0x42e   :  { %v4551_v59 = vsel %vm4550_vm8, %v4546_v39, 0.0 }
 0x42f   :  { %v4552_v61 = vadd.f32 %v4551_v59, %v4549_v58  ;;  %4687 = vmatpush.msrb.mxu0 %v4605_v34 }
 0x431   :  { %4553 = vadd.xlane.f32.xlu1 %v4552_v61  ;;  %4688 = vmatpush.msrb.mxu0 %v4604_v44 }
 0x433   :  { %4689 = vmatpush.msrb.mxu0 %v4603_v47 }
 0x435   :  { %4690 = vmatpush.msrb.mxu0 %v4602_v50 }
 0x48b   :  { %v4645_v59 = vpop.f32.mrf.mxu2 }
 0x4a4   :  { %v4554_v24 = vpop.xlane.xlu1 %4553 }
 0x4a5   :  { %v4562_v4 = vmul.f32 %v11084_v56, %v4554_v24 }
 0x4a7   :  { %v11087_v5 = vsub.f32 %v4481_v57, %v4562_v4  ;;  %v11089_v7 = vsub.f32 %v4546_v39, %v4562_v4 }
 0x4a9   :  { %v4565_v10 = vmul.f32 %v11087_v5, %v11087_v5  ;;  %v4566_v23 = vmul.f32 %v11089_v7, %v11089_v7 }
 0x4ab   :  { %v4567_v11 = vsel %vm3944_vm0, %v4565_v10, 0.0  ;;  %v4568_v12 = vsel %vm4550_vm8, %v4566_v23, 0.0  ;;  %vm4700_vm0 = vcmask 33792  }
 0x4ac   :  { %v4569_v13 = vadd.f32 %v4568_v12, %v4567_v11 }
 0x4ae   :  { %4570 = vadd.xlane.f32.xlu1 %v4569_v13 }
 0x521   :  { %v4571_v35 = vpop.xlane.xlu1 %4570 }
 0x522   :  { %v4572_v52 = vmul.f32 %v4571_v35, %v11084_v56 }
 0x524   :  { %v4573_v33 = vadd.f32 1e-05, %v4572_v52 }
 0x526   :  { %7488 = vrsqrt.f32 %v4573_v33  ;;  %vm4580_vm13 = vweird.f32 %v4573_v33 }
 0x52c   :  { %v7489_v54 = vpop.eup %7488 }
 0x52d   :  { %v4575_v36 = vmul.f32 %v7489_v54, %v4573_v33  ;;  %vm4581_vm12 = vweird.f32 %v7489_v54 }
 0x52e   :  { %vm4582_vm14 = vmor %vm4580_vm13, %vm4581_vm12 }
 0x52f   :  { %v4576_v42 = vmul.f32 %v7489_v54, %v4575_v36 }
 0x531   :  { %v4577_v43 = vmul.f32 0.5, %v4576_v42 }
 0x533   :  { %v4578_v57 = vsub.f32 1.5, %v4577_v43 }
 0x535   :  { %v4579_v38 = vmul.f32 %v7489_v54, %v4578_v57 }
 0x537   :  { %v4583_v39 = vsel %vm4582_vm14, %v7489_v54, %v4579_v38 }
 0x538   :  { %v4584_v41 = vmul.f32 %v4583_v39, %v11087_v5  ;;  %v4585_v58 = vmul.f32 %v4583_v39, %v11089_v7 }
 0x53a   :  { %4671 = vmatmul.f32.vlgmr.msrb.gmra.mxu3 %v4584_v41  ;;  %6931 = vmatmul.msk.f32.vlgmr.msrb.gmra.mxu0 %vm4648_vm15, %v4585_v58 }
 0x5b7   :  { %v4692_v63 = vpop.f32.mrf.mxu0 }
 0x5bd   :  { %v4672_v61 = vpop.f32.mrf.mxu3 }
 0x5be   :  { %v4673_v15 = vadd.f32 %v4672_v61, %v4645_v59 }
 0x5c0   :  { %v4693_v1 = vadd.f32 %v4692_v63, %v4673_v15 }
 0x5c2   :  { %v4699_v0 = vadd.f32 %v7481_v62, %v4693_v1 }
 0x5c4   :  { %v4701_v6 = vsel %vm4700_vm0, %v4699_v0, -inf }
 0x5c5   :  { %4702 = vmax.xlane.f32.xlu2 %v4701_v6 }
 0x638   :  { %v4703_v17 = vpop.xlane.xlu2 %4702 }
 0x639   :  { %v4704_v18 = vsub.f32 %v4699_v0, %v4703_v17 }
 0x63b   :  { %v4705_v19 = vmul.f32 1.442695, %v4704_v18 }
 0x63d   :  { %7490 = vpow2.f32 %v4705_v19 }
 0x643   :  { %v7491_v16 = vpop.eup %7490 }
 0x644   :  { %v4707_v2 = vsel %vm4700_vm0, %v7491_v16, 0.0 }
 0x645   :  { %4708 = vadd.xlane.f32.xlu2 %v4707_v2 }
 0x6b8   :  { %v4709_v20 = vpop.xlane.xlu2 %4708 }
 0x6b9   :  { %7492 = vrcp.f32 %v4709_v20  ;;  %v4721_v24 = vand.u32 2147483648, %v4709_v20  ;;  %v4719_v5 = vand.u32 2147483647, %v4709_v20  ;;  %vm4715_vm2 = vweird.f32 %v4709_v20 }
 0x6bb   :  { %v4722_v10 = vor.u32 1.1754944e-38, %v4721_v24  ;;  %vm4720_vm4 = vcmp.eq.f32.partialorder %v4719_v5, 8.507059e+37 }
 0x6bf   :  { %v7493_v3 = vpop.eup %7492 }
 0x6c0   :  { %v4711_v55 = vmul.f32 %v7493_v3, %v4709_v20  ;;  %vm4716_vm1 = vweird.f32 %v7493_v3 }
 0x6c1   :  { %vm4717_vm3 = vmor %vm4715_vm2, %vm4716_vm1 }
 0x6c2   :  { %v4712_v56 = vsub.f32 1.0, %v4711_v55 }
 0x6c4   :  { %v4713_v4 = vmul.f32 %v7493_v3, %v4712_v56 }
 0x6c6   :  { %v4714_v7 = vadd.f32 %v7493_v3, %v4713_v4 }
 0x6c8   :  { %v4718_v23 = vsel %vm4717_vm3, %v7493_v3, %v4714_v7 }
 0x6c9   :  { %v4723_v11 = vsel %vm4720_vm4, %v4722_v10, %v4718_v23 }
 0x6ca   :  { %v4724_v12 = vmul.f32 %v7491_v16, %v4723_v11 }
 0x6cc   :  { %4725 = vst.msk [vmem:[#allocation2] sm:$0x3] %vm4700_vm0, %v4724_v12 }
 0x6cd   :  { %4736 = dma.vmem_to_hbm [thread:$0]  %s4732_s8, 32, %s4734_s10, [#allocation3]  }
 0x6ce   :  { %7520 = dma.done.wait [#allocation3], 32  }
 0x6cf   :  { %7521 = vsyncadd [#allocation3], 4294967264 }
 0x6d0   :  { %4741 = vsyncpa [#allocation3], 1 }

</bundles_post_ra>
